<compile_context>
chip_gen: v7x
topology: tpu7x:2x2x1
jax: 0.10.0
libtpu: 0.0.40
codegen_flags: <defaults>
</compile_context>

<pallas_src>
import math
import functools

import jax
import jax.numpy as jnp
from jax.experimental import pallas as pl
from jax.experimental.pallas import tpu as pltpu

LN_EPS = 1e-5  # torch.nn.LayerNorm default


# ----------------------- in-kernel math helpers (traced inside kernels) -----------------------

def _layernorm(z, g, b):
    mean = jnp.mean(z, axis=-1, keepdims=True)
    var = jnp.mean((z - mean) ** 2, axis=-1, keepdims=True)
    return (z - mean) * jax.lax.rsqrt(var + LN_EPS) * g + b


def _gelu(h):
    # tanh-approximate GELU (EUP tanh has its own bundle slot).
    # TODO(synk): torch nn.GELU() default is the exact erf form; deviation is ~1e-3 max.
    c = math.sqrt(2.0 / math.pi)
    return 0.5 * h * (1.0 + jnp.tanh(c * (h + 0.044715 * h * h * h)))


def _attention_heads(q_all, k_all, v_all, wo, bo, head_dims, Bb, Sq, Sk):
    # softmax(q_h k_h^T) v_h per head, batched over the Bb batch elements in this block.
    # The concat over heads is folded into the output projection:
    #   concat(heads) @ Wo == sum_h head_h @ Wo[off:off+dh, :].
    # The 1/sqrt(dh) scale is already folded into the Q projection (done at init).
    D = q_all.shape[-1]
    q3 = q_all.reshape(Bb, Sq, D)
    k3 = k_all.reshape(Bb, Sk, D)
    v3 = v_all.reshape(Bb, Sk, D)
    acc = jnp.zeros((Bb * Sq, wo.shape[-1]), jnp.float32)
    off = 0
    for dh in head_dims:                                        # static unroll over heads
        q = q3[..., off:off + dh]                                # (Bb, Sq, dh)
        k = k3[..., off:off + dh]                                # (Bb, Sk, dh)
        v = v3[..., off:off + dh]                                # (Bb, Sk, dh)
        s = jnp.einsum('bqd,bkd->bqk', q, k,
                       preferred_element_type=jnp.float32)       # (Bb, Sq, Sk)
        s = s - jnp.max(s, axis=-1, keepdims=True)
        p = jnp.exp(s)
        num = jnp.einsum('bqk,bkd->bqd', p, v,
                         preferred_element_type=jnp.float32)     # (Bb, Sq, dh)
        inv = pl.reciprocal(jnp.sum(p, axis=-1, keepdims=True), approx=True)  # EUP slot
        head = (num * inv).reshape(Bb * Sq, dh)
        acc = acc + jnp.dot(head, wo[off:off + dh, :],
                            preferred_element_type=jnp.float32)
        off += dh
    return acc + bo


def _mha_block(x, kv, wqkv, bqkv, wo, bo, g, b, head_dims, D, Bb, Sq, Sk):
    # MultiHeadAttention.forward: per-head projections (one fused QKV matmul when
    # key/value == query), attention, output projection, its own residual + LayerNorm.
    if kv is x:   # self-attention
        qkv = jnp.dot(x, wqkv, preferred_element_type=jnp.float32) + bqkv       # (R, 3D)
        q_all, k_all, v_all = qkv[:, :D], qkv[:, D:2 * D], qkv[:, 2 * D:]
    else:         # cross-attention: Q from x, K/V from kv (encoder output)
        q_all = jnp.dot(x, wqkv[:, :D], preferred_element_type=jnp.float32) + bqkv[:, :D]
        kvp = jnp.dot(kv, wqkv[:, D:], preferred_element_type=jnp.float32) + bqkv[:, D:]
        k_all, v_all = kvp[:, :D], kvp[:, D:]
    attn = _attention_heads(q_all, k_all, v_all, wo, bo, head_dims, Bb, Sq, Sk)
    return _layernorm(attn + x, g, b)        # residual = query (dropout == identity)


def _ffn_block(x, w1, b1, w2, b2, g, b):
    # FeedForward.forward: LayerNorm(fc2(GELU(fc1(x))) + x)   (dropout == identity)
    h = _gelu(jnp.dot(x, w1, preferred_element_type=jnp.float32) + b1)
    f = jnp.dot(h, w2, preferred_element_type=jnp.float32) + b2
    return _layernorm(f + x, g, b)


# ----------------------------- fused whole-stack Pallas kernels -----------------------------

def _encoder_stack_kernel(x_ref,
                          wqkv_ref, bqkv_ref, wo_ref, bo_ref, mha_g_ref, mha_b_ref,
                          ln1_g_ref, ln1_b_ref,
                          w1_ref, b1_ref, w2_ref, b2_ref, ff_g_ref, ff_b_ref,
                          ln2_g_ref, ln2_b_ref,
                          o_ref, *, D, head_dims, Bb, S):
    # grid = (batch_splits, num_layers); activation carried in the VMEM-resident output.
    @pl.when(pl.program_id(1) == 0)
    def _():
        o_ref[...] = x_ref[...]
    x = o_ref[...]                                               # (Bb*S, D)
    attn = _mha_block(x, x, wqkv_ref[0], bqkv_ref[0], wo_ref[0], bo_ref[0],
                      mha_g_ref[0], mha_b_ref[0], head_dims, D, Bb, S, S)
    x1 = _layernorm(attn + x, ln1_g_ref[0], ln1_b_ref[0])        # layer_norm1
    ff = _ffn_block(x1, w1_ref[0], b1_ref[0], w2_ref[0], b2_ref[0],
                    ff_g_ref[0], ff_b_ref[0])
    o_ref[...] = _layernorm(ff + x1, ln2_g_ref[0], ln2_b_ref[0])  # layer_norm2


def _decoder_stack_kernel(x_ref, e_ref,
                          sa_wqkv_ref, sa_bqkv_ref, sa_wo_ref, sa_bo_ref, sa_g_ref, sa_b_ref,
                          ln1_g_ref, ln1_b_ref,
                          ca_wqkv_ref, ca_bqkv_ref, ca_wo_ref, ca_bo_ref, ca_g_ref, ca_b_ref,
                          ln2_g_ref, ln2_b_ref,
                          w1_ref, b1_ref, w2_ref, b2_ref, ff_g_ref, ff_b_ref,
                          ln3_g_ref, ln3_b_ref,
                          o_ref, *, D, head_dims, Bb, St, Ss):
    @pl.when(pl.program_id(1) == 0)
    def _():
        o_ref[...] = x_ref[...]
    x = o_ref[...]                                               # (Bb*St, D)
    e = e_ref[...]                                               # (Bb*Ss, D), constant across layers
    sa = _mha_block(x, x, sa_wqkv_ref[0], sa_bqkv_ref[0], sa_wo_ref[0], sa_bo_ref[0],
                    sa_g_ref[0], sa_b_ref[0], head_dims, D, Bb, St, St)
    x1 = _layernorm(x + sa, ln1_g_ref[0], ln1_b_ref[0])          # norm1
    ca = _mha_block(x1, e, ca_wqkv_ref[0], ca_bqkv_ref[0], ca_wo_ref[0], ca_bo_ref[0],
                    ca_g_ref[0], ca_b_ref[0], head_dims, D, Bb, St, Ss)
    x2 = _layernorm(x1 + ca, ln2_g_ref[0], ln2_b_ref[0])         # norm2
    ff = _ffn_block(x2, w1_ref[0], b1_ref[0], w2_ref[0], b2_ref[0],
                    ff_g_ref[0], ff_b_ref[0])
    o_ref[...] = _layernorm(x2 + ff, ln3_g_ref[0], ln3_b_ref[0])  # norm3


# --------------------------------- pallas_call wrappers ---------------------------------

def _layer_param_spec(arr):
    # weights stacked as (num_layers, d0, d1); fetch layer `l` each grid step.
    return pl.BlockSpec((1,) + tuple(arr.shape[1:]), lambda b, l: (l, 0, 0))


_ENC_PARAM_ORDER = ["wqkv", "bqkv", "wo", "bo", "mha_ln_g", "mha_ln_b",
                    "ln1_g", "ln1_b",
                    "w1", "b1", "w2", "b2", "ff_ln_g", "ff_ln_b",
                    "ln2_g", "ln2_b"]

_DEC_PARAM_ORDER = ["sa_wqkv", "sa_bqkv", "sa_wo", "sa_bo", "sa_ln_g", "sa_ln_b",
                    "ln1_g", "ln1_b",
                    "ca_wqkv", "ca_bqkv", "ca_wo", "ca_bo", "ca_ln_g", "ca_ln_b",
                    "ln2_g", "ln2_b",
                    "w1", "b1", "w2", "b2", "ff_ln_g", "ff_ln_b",
                    "ln3_g", "ln3_b"]


def encoder_stack(x2d, p, *, L, B, S, D, head_dims, nb):
    Bb = B // nb
    act_spec = pl.BlockSpec((Bb * S, D), lambda b, l: (b, 0))
    params = [p[n] for n in _ENC_PARAM_ORDER]
    return pl.pallas_call(
        functools.partial(_encoder_stack_kernel, D=D, head_dims=head_dims, Bb=Bb, S=S),
        out_shape=jax.ShapeDtypeStruct((B * S, D), jnp.float32),
        grid=(nb, L),
        in_specs=[act_spec] + [_layer_param_spec(w) for w in params],
        out_specs=act_spec,
        compiler_params=pltpu.CompilerParams(
            dimension_semantics=("parallel", "arbitrary")),
    )(x2d, *params)


def decoder_stack(y2d, enc2d, p, *, L, B, St, Ss, D, head_dims, nb):
    Bb = B // nb
    x_spec = pl.BlockSpec((Bb * St, D), lambda b, l: (b, 0))
    e_spec = pl.BlockSpec((Bb * Ss, D), lambda b, l: (b, 0))
    params = [p[n] for n in _DEC_PARAM_ORDER]
    return pl.pallas_call(
        functools.partial(_decoder_stack_kernel, D=D, head_dims=head_dims,
                          Bb=Bb, St=St, Ss=Ss),
        out_shape=jax.ShapeDtypeStruct((B * St, D), jnp.float32),
        grid=(nb, L),
        in_specs=[x_spec, e_spec] + [_layer_param_spec(w) for w in params],
        out_specs=x_spec,
        compiler_params=pltpu.CompilerParams(
            dimension_semantics=("parallel", "arbitrary")),
    )(y2d, enc2d, *params)


# --------------------------- model orchestration ---------------------------

def embed(x, w, b, pos_enc):
    # Tiny Linear projection + sinusoidal positional-encoding add (plain XLA; sub-vreg sized).
    B, S, _ = x.shape
    return jnp.einsum("bsf,fd->bsd", x, w) + b + pos_enc[None, :S, :]


def transformer_forward(params, src, tgt, head_dims, nb):
    B, Ss, _ = src.shape
    _, St, _ = tgt.shape
    D = params["enc_emb_w"].shape[1]
    L = params["enc"]["wqkv"].shape[0]

    # Encoder stack (one pallas_call, activations VMEM-resident across layers).
    x = embed(src, params["enc_emb_w"], params["enc_emb_b"], params["pos_enc"])
    x = x.reshape(B * Ss, D)
    enc_out = encoder_stack(x, params["enc"], L=L, B=B, S=Ss, D=D,
                            head_dims=head_dims, nb=nb)

    # Decoder stack (one pallas_call).
    y = embed(tgt, params["dec_emb_w"], params["dec_emb_b"], params["pos_enc"])
    y = y.reshape(B * St, D)
    y = decoder_stack(y, enc_out, params["dec"], L=L, B=B, St=St, Ss=Ss, D=D,
                      head_dims=head_dims, nb=nb)

    # Final projection of the last decoder position ((B, D) @ (D, features) — plain XLA).
    last = y.reshape(B, St, D)[:, -1, :]
    return jnp.dot(last, params["fc_out_w"]) + params["fc_out_b"]


# ------------------------------- parameters --------------------------------

def positional_encoding(max_len, dim):
    pos = jnp.arange(max_len, dtype=jnp.float32)[:, None]
    div = jnp.exp(jnp.arange(0, dim, 2, dtype=jnp.float32) * (-math.log(10000.0) / dim))
    pe = jnp.zeros((max_len, dim), jnp.float32)
    pe = pe.at[:, 0::2].set(jnp.sin(pos * div))
    pe = pe.at[:, 1::2].set(jnp.cos(pos * div))
    return pe


def init_params(key, features_num, d_model, num_layers, num_heads, d_ff, max_len, head_dims):
    keys = iter(jax.random.split(key, 64))
    L = num_layers

    def lin(din, dout, stack=None):
        # nn.Linear init: U(-1/sqrt(fan_in)); bias stored as (1, dout); optional layer stack.
        k1, k2 = jax.random.split(next(keys))
        bound = 1.0 / math.sqrt(din)
        shape_w = (din, dout) if stack is None else (stack, din, dout)
        shape_b = (1, dout) if stack is None else (stack, 1, dout)
        w = jax.random.uniform(k1, shape_w, jnp.float32, -bound, bound)
        b = jax.random.uniform(k2, shape_b, jnp.float32, -bound, bound)
        return w, b

    ones = lambda: jnp.ones((L, 1, d_model), jnp.float32)
    zeros = lambda: jnp.zeros((L, 1, d_model), jnp.float32)

    # Fold the per-head 1/sqrt(dh) attention scale into the Q columns of wqkv / bqkv.
    q_scale = jnp.concatenate(
        [jnp.full((dh,), dh ** -0.5, jnp.float32) for dh in head_dims]
        + [jnp.ones((2 * d_model,), jnp.float32)])

    def mha():
        wqkv, bqkv = lin(d_model, 3 * d_model, L)   # per-head q/k/v Linears concatenated
        wo, bo = lin(d_model, d_model, L)
        return dict(wqkv=wqkv * q_scale, bqkv=bqkv * q_scale, wo=wo, bo=bo,
                    ln_g=ones(), ln_b=zeros())

    def ffn():
        w1, b1 = lin(d_model, d_ff, L)
        w2, b2 = lin(d_ff, d_model, L)
        return dict(w1=w1, b1=b1, w2=w2, b2=b2, ln_g=ones(), ln_b=zeros())

    m = mha()
    f = ffn()
    enc = dict(wqkv=m["wqkv"], bqkv=m["bqkv"], wo=m["wo"], bo=m["bo"],
               mha_ln_g=m["ln_g"], mha_ln_b=m["ln_b"],
               ln1_g=ones(), ln1_b=zeros(),
               w1=f["w1"], b1=f["b1"], w2=f["w2"], b2=f["b2"],
               ff_ln_g=f["ln_g"], ff_ln_b=f["ln_b"],
               ln2_g=ones(), ln2_b=zeros())

    sa = mha()
    ca = mha()
    fd = ffn()
    dec = dict(sa_wqkv=sa["wqkv"], sa_bqkv=sa["bqkv"], sa_wo=sa["wo"], sa_bo=sa["bo"],
               sa_ln_g=sa["ln_g"], sa_ln_b=sa["ln_b"],
               ln1_g=ones(), ln1_b=zeros(),
               ca_wqkv=ca["wqkv"], ca_bqkv=ca["bqkv"], ca_wo=ca["wo"], ca_bo=ca["bo"],
               ca_ln_g=ca["ln_g"], ca_ln_b=ca["ln_b"],
               ln2_g=ones(), ln2_b=zeros(),
               w1=fd["w1"], b1=fd["b1"], w2=fd["w2"], b2=fd["b2"],
               ff_ln_g=fd["ln_g"], ff_ln_b=fd["ln_b"],
               ln3_g=ones(), ln3_b=zeros())

    enc_emb_w, enc_emb_b = lin(features_num, d_model)
    dec_emb_w, dec_emb_b = lin(1, d_model)
    fc_out_w, fc_out_b = lin(d_model, features_num)

    return dict(enc_emb_w=enc_emb_w, enc_emb_b=enc_emb_b,
                dec_emb_w=dec_emb_w, dec_emb_b=dec_emb_b,
                fc_out_w=fc_out_w, fc_out_b=fc_out_b,
                pos_enc=positional_encoding(max_len, d_model),
                enc=enc, dec=dec)


def pick_batch_splits(B):
    # v7x has 2 TensorCores/chip: give each a batch slice via the "parallel" grid axis.
    # v5e/v6e are single-TC: fold the whole batch into one block (fewer grid steps).
    try:
        kind = jax.devices()[0].device_kind.lower()
    except Exception:
        kind = ""
    if "v7" in kind and B >= 2 and B % 2 == 0:
        return 2
    return 1


# ---------------------------------- main ------------------------------------

if __name__ == "__main__":
    features_num, d_model, num_layers, num_heads, d_ff, max_len = 4, 32, 2, 4, 64, 16
    B, S_src, S_tgt = 2, 8, 8

    head_dims = tuple([d_model // num_heads] * num_heads)  # 'equal' strategy
    assert sum(head_dims) == d_model

    key = jax.random.PRNGKey(0)
    kp, ks, kt = jax.random.split(key, 3)
    params = init_params(kp, features_num, d_model, num_layers, num_heads, d_ff,
                         max_len, head_dims)

    src = jax.random.normal(ks, (B, S_src, features_num), jnp.float32)
    tgt = jax.random.normal(kt, (B, S_tgt, 1), jnp.float32)

    nb = pick_batch_splits(B)
    fwd = jax.jit(functools.partial(transformer_forward, head_dims=head_dims, nb=nb))
    out = jax.block_until_ready(fwd(params, src, tgt))
    assert out.shape == (B, features_num), out.shape
    assert bool(jnp.all(jnp.isfinite(out)))
    print("KERNEL_OK")
</pallas_src>

<mosaic_0001>
module attributes {stable_mosaic.version = 11 : i64} {
  func.func @_encoder_stack_kernel(%arg0: i32, %arg1: i32, %arg2: memref<16x32xf32, #tpu.memory_space<vmem>>, %arg3: memref<1x32x96xf32, #tpu.memory_space<vmem>>, %arg4: memref<1x1x96xf32, #tpu.memory_space<vmem>>, %arg5: memref<1x32x32xf32, #tpu.memory_space<vmem>>, %arg6: memref<1x1x32xf32, #tpu.memory_space<vmem>>, %arg7: memref<1x1x32xf32, #tpu.memory_space<vmem>>, %arg8: memref<1x1x32xf32, #tpu.memory_space<vmem>>, %arg9: memref<1x1x32xf32, #tpu.memory_space<vmem>>, %arg10: memref<1x1x32xf32, #tpu.memory_space<vmem>>, %arg11: memref<1x32x64xf32, #tpu.memory_space<vmem>>, %arg12: memref<1x1x64xf32, #tpu.memory_space<vmem>>, %arg13: memref<1x64x32xf32, #tpu.memory_space<vmem>>, %arg14: memref<1x1x32xf32, #tpu.memory_space<vmem>>, %arg15: memref<1x1x32xf32, #tpu.memory_space<vmem>>, %arg16: memref<1x1x32xf32, #tpu.memory_space<vmem>>, %arg17: memref<1x1x32xf32, #tpu.memory_space<vmem>>, %arg18: memref<1x1x32xf32, #tpu.memory_space<vmem>>, %arg19: memref<16x32xf32, #tpu.memory_space<vmem>>) attributes {dimension_semantics = [#tpu.dimension_semantics<parallel>, #tpu.dimension_semantics<arbitrary>], iteration_bounds = array<i64: 1, 2>, scalar_prefetch = 0 : i64, scratch_operands = 0 : i64, tpu.core_type = #tpu.core_type<tc>, window_params = [{transform_indices = @transform_0, window_bounds = array<i64: 16, 32>}, {transform_indices = @transform_1, window_bounds = array<i64: 1, 32, 96>}, {transform_indices = @transform_2, window_bounds = array<i64: 1, 1, 96>}, {transform_indices = @transform_3, window_bounds = array<i64: 1, 32, 32>}, {transform_indices = @transform_4, window_bounds = array<i64: 1, 1, 32>}, {transform_indices = @transform_5, window_bounds = array<i64: 1, 1, 32>}, {transform_indices = @transform_6, window_bounds = array<i64: 1, 1, 32>}, {transform_indices = @transform_7, window_bounds = array<i64: 1, 1, 32>}, {transform_indices = @transform_8, window_bounds = array<i64: 1, 1, 32>}, {transform_indices = @transform_9, window_bounds = array<i64: 1, 32, 64>}, {transform_indices = @transform_10, window_bounds = array<i64: 1, 1, 64>}, {transform_indices = @transform_11, window_bounds = array<i64: 1, 64, 32>}, {transform_indices = @transform_12, window_bounds = array<i64: 1, 1, 32>}, {transform_indices = @transform_13, window_bounds = array<i64: 1, 1, 32>}, {transform_indices = @transform_14, window_bounds = array<i64: 1, 1, 32>}, {transform_indices = @transform_15, window_bounds = array<i64: 1, 1, 32>}, {transform_indices = @transform_16, window_bounds = array<i64: 1, 1, 32>}, {transform_indices = @transform_17, window_bounds = array<i64: 16, 32>}]} {
    %c0_i32 = arith.constant 0 : i32
    %0 = arith.cmpi eq, %arg1, %c0_i32 : i32
    %1 = arith.extui %0 : i1 to i32
    %c0_i32_0 = arith.constant 0 : i32
    %2 = arith.cmpi ne, %1, %c0_i32_0 : i32
    scf.if %2 {
      %c0_99 = arith.constant 0 : index
      %c0_100 = arith.constant 0 : index
      %236 = vector.load %arg2[%c0_99, %c0_100] : memref<16x32xf32, #tpu.memory_space<vmem>>, vector<16x32xf32>
      %c0_101 = arith.constant 0 : index
      %c0_102 = arith.constant 0 : index
      %237 = vector.load %arg19[%c0_101, %c0_102] : memref<16x32xf32, #tpu.memory_space<vmem>>, vector<16x32xf32>
      tpu.vector_store %arg19[%c0_101, %c0_102], %236 {strides = array<i32>} : memref<16x32xf32, #tpu.memory_space<vmem>>, vector<16x32xf32>,
    } else {
    }
    %c0 = arith.constant 0 : index
    %c0_1 = arith.constant 0 : index
    %3 = vector.load %arg19[%c0, %c0_1] : memref<16x32xf32, #tpu.memory_space<vmem>>, vector<16x32xf32>
    %c0_2 = arith.constant 0 : index
    %c0_3 = arith.constant 0 : index
    %c0_4 = arith.constant 0 : index
    %4 = vector.load %arg3[%c0_2, %c0_3, %c0_4] : memref<1x32x96xf32, #tpu.memory_space<vmem>>, vector<1x32x96xf32>
    %5 = vector.shape_cast %4 : vector<1x32x96xf32> to vector<32x96xf32>
    %c0_5 = arith.constant 0 : index
    %c0_6 = arith.constant 0 : index
    %c0_7 = arith.constant 0 : index
    %6 = vector.load %arg4[%c0_5, %c0_6, %c0_7] : memref<1x1x96xf32, #tpu.memory_space<vmem>>, vector<1x1x96xf32>
    %7 = vector.shape_cast %6 : vector<1x1x96xf32> to vector<1x96xf32>
    %c0_8 = arith.constant 0 : index
    %c0_9 = arith.constant 0 : index
    %c0_10 = arith.constant 0 : index
    %8 = vector.load %arg5[%c0_8, %c0_9, %c0_10] : memref<1x32x32xf32, #tpu.memory_space<vmem>>, vector<1x32x32xf32>
    %9 = vector.shape_cast %8 : vector<1x32x32xf32> to vector<32x32xf32>
    %c0_11 = arith.constant 0 : index
    %c0_12 = arith.constant 0 : index
    %c0_13 = arith.constant 0 : index
    %10 = vector.load %arg6[%c0_11, %c0_12, %c0_13] : memref<1x1x32xf32, #tpu.memory_space<vmem>>, vector<1x1x32xf32>
    %11 = vector.shape_cast %10 : vector<1x1x32xf32> to vector<1x32xf32>
    %c0_14 = arith.constant 0 : index
    %c0_15 = arith.constant 0 : index
    %c0_16 = arith.constant 0 : index
    %12 = vector.load %arg7[%c0_14, %c0_15, %c0_16] : memref<1x1x32xf32, #tpu.memory_space<vmem>>, vector<1x1x32xf32>
    %13 = vector.shape_cast %12 : vector<1x1x32xf32> to vector<1x32xf32>
    %c0_17 = arith.constant 0 : index
    %c0_18 = arith.constant 0 : index
    %c0_19 = arith.constant 0 : index
    %14 = vector.load %arg8[%c0_17, %c0_18, %c0_19] : memref<1x1x32xf32, #tpu.memory_space<vmem>>, vector<1x1x32xf32>
    %15 = vector.shape_cast %14 : vector<1x1x32xf32> to vector<1x32xf32>
    %cst = arith.constant dense<0.000000e+00> : vector<16x96xf32>
    %16 = tpu.matmul %3, %5, %cst {dimension_numbers = #tpu.dot_dimension_numbers<[1], [0], [0], [1], [0, 0, 1, 1], [], []>} : vector<16x32xf32>, vector<32x96xf32>, vector<16x96xf32> -> vector<16x96xf32>
    %17 = vector.broadcast %7 : vector<1x96xf32> to vector<16x96xf32>
    %18 = arith.addf %16, %17 : vector<16x96xf32>
    %19 = vector.extract_strided_slice %18 {offsets = [0, 0], sizes = [16, 32], strides = [1, 1]} : vector<16x96xf32> to vector<16x32xf32>
    %20 = vector.extract_strided_slice %18 {offsets = [0, 32], sizes = [16, 32], strides = [1, 1]} : vector<16x96xf32> to vector<16x32xf32>
    %21 = vector.extract_strided_slice %18 {offsets = [0, 64], sizes = [16, 32], strides = [1, 1]} : vector<16x96xf32> to vector<16x32xf32>
    %22 = vector.shape_cast %19 : vector<16x32xf32> to vector<2x8x32xf32>
    %23 = vector.shape_cast %20 : vector<16x32xf32> to vector<2x8x32xf32>
    %24 = vector.shape_cast %21 : vector<16x32xf32> to vector<2x8x32xf32>
    %cst_20 = arith.constant 0.000000e+00 : f32
    %25 = vector.broadcast %cst_20 : f32 to vector<16x32xf32>
    %26 = vector.extract_strided_slice %22 {offsets = [0, 0, 0], sizes = [2, 8, 8], strides = [1, 1, 1]} : vector<2x8x32xf32> to vector<2x8x8xf32>
    %27 = vector.extract_strided_slice %23 {offsets = [0, 0, 0], sizes = [2, 8, 8], strides = [1, 1, 1]} : vector<2x8x32xf32> to vector<2x8x8xf32>
    %28 = vector.extract_strided_slice %24 {offsets = [0, 0, 0], sizes = [2, 8, 8], strides = [1, 1, 1]} : vector<2x8x32xf32> to vector<2x8x8xf32>
    "tpu.trace_start"() <{level = 10 : i32, message = "bqd,bkd->bqk"}> : () -> ()
    %cst_21 = arith.constant dense<0.000000e+00> : vector<2x8x8xf32>
    %29 = tpu.matmul %26, %27, %cst_21 {dimension_numbers = #tpu.dot_dimension_numbers<[2], [2], [1], [1], [0, 0, 0, 1, 1, 1], [0], [0]>} : vector<2x8x8xf32>, vector<2x8x8xf32>, vector<2x8x8xf32> -> vector<2x8x8xf32>
    "tpu.trace_stop"() : () -> ()
    %cst_22 = arith.constant dense<0xFF800000> : vector<2x8xf32>
    %30 = vector.multi_reduction <maximumf>, %29, %cst_22 [2] : vector<2x8x8xf32> to vector<2x8xf32>
    %31 = vector.shape_cast %30 : vector<2x8xf32> to vector<2x8x1xf32>
    %32 = vector.broadcast %31 : vector<2x8x1xf32> to vector<2x8x8xf32>
    %33 = arith.subf %29, %32 : vector<2x8x8xf32>
    %34 = math.exp %33 : vector<2x8x8xf32>
    "tpu.trace_start"() <{level = 10 : i32, message = "bqk,bkd->bqd"}> : () -> ()
    %cst_23 = arith.constant dense<0.000000e+00> : vector<2x8x8xf32>
    %35 = tpu.matmul %34, %28, %cst_23 {dimension_numbers = #tpu.dot_dimension_numbers<[2], [1], [1], [2], [0, 0, 0, 1, 1, 2], [0], [0]>} : vector<2x8x8xf32>, vector<2x8x8xf32>, vector<2x8x8xf32> -> vector<2x8x8xf32>
    "tpu.trace_stop"() : () -> ()
    %cst_24 = arith.constant dense<0.000000e+00> : vector<2x8xf32>
    %36 = vector.multi_reduction <add>, %34, %cst_24 [2] : vector<2x8x8xf32> to vector<2x8xf32>
    %37 = vector.shape_cast %36 : vector<2x8xf32> to vector<2x8x1xf32>
    %38 = tpu.reciprocal %37 {approx = true} : vector<2x8x1xf32> -> vector<2x8x1xf32>
    %39 = vector.broadcast %38 : vector<2x8x1xf32> to vector<2x8x8xf32>
    %40 = arith.mulf %35, %39 : vector<2x8x8xf32>
    %41 = vector.shape_cast %40 : vector<2x8x8xf32> to vector<16x8xf32>
    %42 = vector.extract_strided_slice %9 {offsets = [0, 0], sizes = [8, 32], strides = [1, 1]} : vector<32x32xf32> to vector<8x32xf32>
    %cst_25 = arith.constant dense<0.000000e+00> : vector<16x32xf32>
    %43 = tpu.matmul %41, %42, %cst_25 {dimension_numbers = #tpu.dot_dimension_numbers<[1], [0], [0], [1], [0, 0, 1, 1], [], []>} : vector<16x8xf32>, vector<8x32xf32>, vector<16x32xf32> -> vector<16x32xf32>
    %44 = arith.addf %25, %43 : vector<16x32xf32>
    %45 = vector.extract_strided_slice %22 {offsets = [0, 0, 8], sizes = [2, 8, 8], strides = [1, 1, 1]} : vector<2x8x32xf32> to vector<2x8x8xf32>
    %46 = vector.extract_strided_slice %23 {offsets = [0, 0, 8], sizes = [2, 8, 8], strides = [1, 1, 1]} : vector<2x8x32xf32> to vector<2x8x8xf32>
    %47 = vector.extract_strided_slice %24 {offsets = [0, 0, 8], sizes = [2, 8, 8], strides = [1, 1, 1]} : vector<2x8x32xf32> to vector<2x8x8xf32>
    "tpu.trace_start"() <{level = 10 : i32, message = "bqd,bkd->bqk"}> : () -> ()
    %cst_26 = arith.constant dense<0.000000e+00> : vector<2x8x8xf32>
    %48 = tpu.matmul %45, %46, %cst_26 {dimension_numbers = #tpu.dot_dimension_numbers<[2], [2], [1], [1], [0, 0, 0, 1, 1, 1], [0], [0]>} : vector<2x8x8xf32>, vector<2x8x8xf32>, vector<2x8x8xf32> -> vector<2x8x8xf32>
    "tpu.trace_stop"() : () -> ()
    %cst_27 = arith.constant dense<0xFF800000> : vector<2x8xf32>
    %49 = vector.multi_reduction <maximumf>, %48, %cst_27 [2] : vector<2x8x8xf32> to vector<2x8xf32>
    %50 = vector.shape_cast %49 : vector<2x8xf32> to vector<2x8x1xf32>
    %51 = vector.broadcast %50 : vector<2x8x1xf32> to vector<2x8x8xf32>
    %52 = arith.subf %48, %51 : vector<2x8x8xf32>
    %53 = math.exp %52 : vector<2x8x8xf32>
    "tpu.trace_start"() <{level = 10 : i32, message = "bqk,bkd->bqd"}> : () -> ()
    %cst_28 = arith.constant dense<0.000000e+00> : vector<2x8x8xf32>
    %54 = tpu.matmul %53, %47, %cst_28 {dimension_numbers = #tpu.dot_dimension_numbers<[2], [1], [1], [2], [0, 0, 0, 1, 1, 2], [0], [0]>} : vector<2x8x8xf32>, vector<2x8x8xf32>, vector<2x8x8xf32> -> vector<2x8x8xf32>
    "tpu.trace_stop"() : () -> ()
    %cst_29 = arith.constant dense<0.000000e+00> : vector<2x8xf32>
    %55 = vector.multi_reduction <add>, %53, %cst_29 [2] : vector<2x8x8xf32> to vector<2x8xf32>
    %56 = vector.shape_cast %55 : vector<2x8xf32> to vector<2x8x1xf32>
    %57 = tpu.reciprocal %56 {approx = true} : vector<2x8x1xf32> -> vector<2x8x1xf32>
    %58 = vector.broadcast %57 : vector<2x8x1xf32> to vector<2x8x8xf32>
    %59 = arith.mulf %54, %58 : vector<2x8x8xf32>
    %60 = vector.shape_cast %59 : vector<2x8x8xf32> to vector<16x8xf32>
    %61 = vector.extract_strided_slice %9 {offsets = [8, 0], sizes = [8, 32], strides = [1, 1]} : vector<32x32xf32> to vector<8x32xf32>
    %cst_30 = arith.constant dense<0.000000e+00> : vector<16x32xf32>
    %62 = tpu.matmul %60, %61, %cst_30 {dimension_numbers = #tpu.dot_dimension_numbers<[1], [0], [0], [1], [0, 0, 1, 1], [], []>} : vector<16x8xf32>, vector<8x32xf32>, vector<16x32xf32> -> vector<16x32xf32>
    %63 = arith.addf %44, %62 : vector<16x32xf32>
    %64 = vector.extract_strided_slice %22 {offsets = [0, 0, 16], sizes = [2, 8, 8], strides = [1, 1, 1]} : vector<2x8x32xf32> to vector<2x8x8xf32>
    %65 = vector.extract_strided_slice %23 {offsets = [0, 0, 16], sizes = [2, 8, 8], strides = [1, 1, 1]} : vector<2x8x32xf32> to vector<2x8x8xf32>
    %66 = vector.extract_strided_slice %24 {offsets = [0, 0, 16], sizes = [2, 8, 8], strides = [1, 1, 1]} : vector<2x8x32xf32> to vector<2x8x8xf32>
    "tpu.trace_start"() <{level = 10 : i32, message = "bqd,bkd->bqk"}> : () -> ()
    %cst_31 = arith.constant dense<0.000000e+00> : vector<2x8x8xf32>
    %67 = tpu.matmul %64, %65, %cst_31 {dimension_numbers = #tpu.dot_dimension_numbers<[2], [2], [1], [1], [0, 0, 0, 1, 1, 1], [0], [0]>} : vector<2x8x8xf32>, vector<2x8x8xf32>, vector<2x8x8xf32> -> vector<2x8x8xf32>
    "tpu.trace_stop"() : () -> ()
    %cst_32 = arith.constant dense<0xFF800000> : vector<2x8xf32>
    %68 = vector.multi_reduction <maximumf>, %67, %cst_32 [2] : vector<2x8x8xf32> to vector<2x8xf32>
    %69 = vector.shape_cast %68 : vector<2x8xf32> to vector<2x8x1xf32>
    %70 = vector.broadcast %69 : vector<2x8x1xf32> to vector<2x8x8xf32>
    %71 = arith.subf %67, %70 : vector<2x8x8xf32>
    %72 = math.exp %71 : vector<2x8x8xf32>
    "tpu.trace_start"() <{level = 10 : i32, message = "bqk,bkd->bqd"}> : () -> ()
    %cst_33 = arith.constant dense<0.000000e+00> : vector<2x8x8xf32>
    %73 = tpu.matmul %72, %66, %cst_33 {dimension_numbers = #tpu.dot_dimension_numbers<[2], [1], [1], [2], [0, 0, 0, 1, 1, 2], [0], [0]>} : vector<2x8x8xf32>, vector<2x8x8xf32>, vector<2x8x8xf32> -> vector<2x8x8xf32>
    "tpu.trace_stop"() : () -> ()
    %cst_34 = arith.constant dense<0.000000e+00> : vector<2x8xf32>
    %74 = vector.multi_reduction <add>, %72, %cst_34 [2] : vector<2x8x8xf32> to vector<2x8xf32>
    %75 = vector.shape_cast %74 : vector<2x8xf32> to vector<2x8x1xf32>
    %76 = tpu.reciprocal %75 {approx = true} : vector<2x8x1xf32> -> vector<2x8x1xf32>
    %77 = vector.broadcast %76 : vector<2x8x1xf32> to vector<2x8x8xf32>
    %78 = arith.mulf %73, %77 : vector<2x8x8xf32>
    %79 = vector.shape_cast %78 : vector<2x8x8xf32> to vector<16x8xf32>
    %80 = vector.extract_strided_slice %9 {offsets = [16, 0], sizes = [8, 32], strides = [1, 1]} : vector<32x32xf32> to vector<8x32xf32>
    %cst_35 = arith.constant dense<0.000000e+00> : vector<16x32xf32>
    %81 = tpu.matmul %79, %80, %cst_35 {dimension_numbers = #tpu.dot_dimension_numbers<[1], [0], [0], [1], [0, 0, 1, 1], [], []>} : vector<16x8xf32>, vector<8x32xf32>, vector<16x32xf32> -> vector<16x32xf32>
    %82 = arith.addf %63, %81 : vector<16x32xf32>
    %83 = vector.extract_strided_slice %22 {offsets = [0, 0, 24], sizes = [2, 8, 8], strides = [1, 1, 1]} : vector<2x8x32xf32> to vector<2x8x8xf32>
    %84 = vector.extract_strided_slice %23 {offsets = [0, 0, 24], sizes = [2, 8, 8], strides = [1, 1, 1]} : vector<2x8x32xf32> to vector<2x8x8xf32>
    %85 = vector.extract_strided_slice %24 {offsets = [0, 0, 24], sizes = [2, 8, 8], strides = [1, 1, 1]} : vector<2x8x32xf32> to vector<2x8x8xf32>
    "tpu.trace_start"() <{level = 10 : i32, message = "bqd,bkd->bqk"}> : () -> ()
    %cst_36 = arith.constant dense<0.000000e+00> : vector<2x8x8xf32>
    %86 = tpu.matmul %83, %84, %cst_36 {dimension_numbers = #tpu.dot_dimension_numbers<[2], [2], [1], [1], [0, 0, 0, 1, 1, 1], [0], [0]>} : vector<2x8x8xf32>, vector<2x8x8xf32>, vector<2x8x8xf32> -> vector<2x8x8xf32>
    "tpu.trace_stop"() : () -> ()
    %cst_37 = arith.constant dense<0xFF800000> : vector<2x8xf32>
    %87 = vector.multi_reduction <maximumf>, %86, %cst_37 [2] : vector<2x8x8xf32> to vector<2x8xf32>
    %88 = vector.shape_cast %87 : vector<2x8xf32> to vector<2x8x1xf32>
    %89 = vector.broadcast %88 : vector<2x8x1xf32> to vector<2x8x8xf32>
    %90 = arith.subf %86, %89 : vector<2x8x8xf32>
    %91 = math.exp %90 : vector<2x8x8xf32>
    "tpu.trace_start"() <{level = 10 : i32, message = "bqk,bkd->bqd"}> : () -> ()
    %cst_38 = arith.constant dense<0.000000e+00> : vector<2x8x8xf32>
    %92 = tpu.matmul %91, %85, %cst_38 {dimension_numbers = #tpu.dot_dimension_numbers<[2], [1], [1], [2], [0, 0, 0, 1, 1, 2], [0], [0]>} : vector<2x8x8xf32>, vector<2x8x8xf32>, vector<2x8x8xf32> -> vector<2x8x8xf32>
    "tpu.trace_stop"() : () -> ()
    %cst_39 = arith.constant dense<0.000000e+00> : vector<2x8xf32>
    %93 = vector.multi_reduction <add>, %91, %cst_39 [2] : vector<2x8x8xf32> to vector<2x8xf32>
    %94 = vector.shape_cast %93 : vector<2x8xf32> to vector<2x8x1xf32>
    %95 = tpu.reciprocal %94 {approx = true} : vector<2x8x1xf32> -> vector<2x8x1xf32>
    %96 = vector.broadcast %95 : vector<2x8x1xf32> to vector<2x8x8xf32>
    %97 = arith.mulf %92, %96 : vector<2x8x8xf32>
    %98 = vector.shape_cast %97 : vector<2x8x8xf32> to vector<16x8xf32>
    %99 = vector.extract_strided_slice %9 {offsets = [24, 0], sizes = [8, 32], strides = [1, 1]} : vector<32x32xf32> to vector<8x32xf32>
    %cst_40 = arith.constant dense<0.000000e+00> : vector<16x32xf32>
    %100 = tpu.matmul %98, %99, %cst_40 {dimension_numbers = #tpu.dot_dimension_numbers<[1], [0], [0], [1], [0, 0, 1, 1], [], []>} : vector<16x8xf32>, vector<8x32xf32>, vector<16x32xf32> -> vector<16x32xf32>
    %101 = arith.addf %82, %100 : vector<16x32xf32>
    %102 = vector.broadcast %11 : vector<1x32xf32> to vector<16x32xf32>
    %103 = arith.addf %101, %102 : vector<16x32xf32>
    %104 = arith.addf %103, %3 : vector<16x32xf32>
    %cst_41 = arith.constant dense<0.000000e+00> : vector<16xf32>
    %105 = vector.multi_reduction <add>, %104, %cst_41 [1] : vector<16x32xf32> to vector<16xf32>
    %106 = vector.shape_cast %105 : vector<16xf32> to vector<16x1xf32>
    %cst_42 = arith.constant 3.200000e+01 : f32
    %107 = vector.broadcast %cst_42 : f32 to vector<16x1xf32>
    %108 = arith.divf %106, %107 : vector<16x1xf32>
    %109 = vector.broadcast %108 : vector<16x1xf32> to vector<16x32xf32>
    %110 = arith.subf %104, %109 : vector<16x32xf32>
    %111 = arith.mulf %110, %110 : vector<16x32xf32>
    %cst_43 = arith.constant dense<0.000000e+00> : vector<16xf32>
    %112 = vector.multi_reduction <add>, %111, %cst_43 [1] : vector<16x32xf32> to vector<16xf32>
    %113 = vector.shape_cast %112 : vector<16xf32> to vector<16x1xf32>
    %cst_44 = arith.constant 3.200000e+01 : f32
    %114 = vector.broadcast %cst_44 : f32 to vector<16x1xf32>
    %115 = arith.divf %113, %114 : vector<16x1xf32>
    %116 = vector.broadcast %108 : vector<16x1xf32> to vector<16x32xf32>
    %117 = arith.subf %104, %116 : vector<16x32xf32>
    %cst_45 = arith.constant 9.99999974E-6 : f32
    %118 = vector.broadcast %cst_45 : f32 to vector<16x1xf32>
    %119 = arith.addf %115, %118 : vector<16x1xf32>
    %120 = math.rsqrt %119 : vector<16x1xf32>
    %121 = vector.broadcast %120 : vector<16x1xf32> to vector<16x32xf32>
    %122 = arith.mulf %117, %121 : vector<16x32xf32>
    %123 = vector.broadcast %13 : vector<1x32xf32> to vector<16x32xf32>
    %124 = arith.mulf %122, %123 : vector<16x32xf32>
    %125 = vector.broadcast %15 : vector<1x32xf32> to vector<16x32xf32>
    %126 = arith.addf %124, %125 : vector<16x32xf32>
    %127 = arith.addf %126, %3 : vector<16x32xf32>
    %c0_46 = arith.constant 0 : index
    %c0_47 = arith.constant 0 : index
    %c0_48 = arith.constant 0 : index
    %128 = vector.load %arg9[%c0_46, %c0_47, %c0_48] : memref<1x1x32xf32, #tpu.memory_space<vmem>>, vector<1x1x32xf32>
    %129 = vector.shape_cast %128 : vector<1x1x32xf32> to vector<1x32xf32>
    %c0_49 = arith.constant 0 : index
    %c0_50 = arith.constant 0 : index
    %c0_51 = arith.constant 0 : index
    %130 = vector.load %arg10[%c0_49, %c0_50, %c0_51] : memref<1x1x32xf32, #tpu.memory_space<vmem>>, vector<1x1x32xf32>
    %131 = vector.shape_cast %130 : vector<1x1x32xf32> to vector<1x32xf32>
    %cst_52 = arith.constant dense<0.000000e+00> : vector<16xf32>
    %132 = vector.multi_reduction <add>, %127, %cst_52 [1] : vector<16x32xf32> to vector<16xf32>
    %133 = vector.shape_cast %132 : vector<16xf32> to vector<16x1xf32>
    %cst_53 = arith.constant 3.200000e+01 : f32
    %134 = vector.broadcast %cst_53 : f32 to vector<16x1xf32>
    %135 = arith.divf %133, %134 : vector<16x1xf32>
    %136 = vector.broadcast %135 : vector<16x1xf32> to vector<16x32xf32>
    %137 = arith.subf %127, %136 : vector<16x32xf32>
    %138 = arith.mulf %137, %137 : vector<16x32xf32>
    %cst_54 = arith.constant dense<0.000000e+00> : vector<16xf32>
    %139 = vector.multi_reduction <add>, %138, %cst_54 [1] : vector<16x32xf32> to vector<16xf32>
    %140 = vector.shape_cast %139 : vector<16xf32> to vector<16x1xf32>
    %cst_55 = arith.constant 3.200000e+01 : f32
    %141 = vector.broadcast %cst_55 : f32 to vector<16x1xf32>
    %142 = arith.divf %140, %141 : vector<16x1xf32>
    %143 = vector.broadcast %135 : vector<16x1xf32> to vector<16x32xf32>
    %144 = arith.subf %127, %143 : vector<16x32xf32>
    %cst_56 = arith.constant 9.99999974E-6 : f32
    %145 = vector.broadcast %cst_56 : f32 to vector<16x1xf32>
    %146 = arith.addf %142, %145 : vector<16x1xf32>
    %147 = math.rsqrt %146 : vector<16x1xf32>
    %148 = vector.broadcast %147 : vector<16x1xf32> to vector<16x32xf32>
    %149 = arith.mulf %144, %148 : vector<16x32xf32>
    %150 = vector.broadcast %129 : vector<1x32xf32> to vector<16x32xf32>
    %151 = arith.mulf %149, %150 : vector<16x32xf32>
    %152 = vector.broadcast %131 : vector<1x32xf32> to vector<16x32xf32>
    %153 = arith.addf %151, %152 : vector<16x32xf32>
    %c0_57 = arith.constant 0 : index
    %c0_58 = arith.constant 0 : index
    %c0_59 = arith.constant 0 : index
    %154 = vector.load %arg11[%c0_57, %c0_58, %c0_59] : memref<1x32x64xf32, #tpu.memory_space<vmem>>, vector<1x32x64xf32>
    %155 = vector.shape_cast %154 : vector<1x32x64xf32> to vector<32x64xf32>
    %c0_60 = arith.constant 0 : index
    %c0_61 = arith.constant 0 : index
    %c0_62 = arith.constant 0 : index
    %156 = vector.load %arg12[%c0_60, %c0_61, %c0_62] : memref<1x1x64xf32, #tpu.memory_space<vmem>>, vector<1x1x64xf32>
    %157 = vector.shape_cast %156 : vector<1x1x64xf32> to vector<1x64xf32>
    %c0_63 = arith.constant 0 : index
    %c0_64 = arith.constant 0 : index
    %c0_65 = arith.constant 0 : index
    %158 = vector.load %arg13[%c0_63, %c0_64, %c0_65] : memref<1x64x32xf32, #tpu.memory_space<vmem>>, vector<1x64x32xf32>
    %159 = vector.shape_cast %158 : vector<1x64x32xf32> to vector<64x32xf32>
    %c0_66 = arith.constant 0 : index
    %c0_67 = arith.constant 0 : index
    %c0_68 = arith.constant 0 : index
    %160 = vector.load %arg14[%c0_66, %c0_67, %c0_68] : memref<1x1x32xf32, #tpu.memory_space<vmem>>, vector<1x1x32xf32>
    %161 = vector.shape_cast %160 : vector<1x1x32xf32> to vector<1x32xf32>
    %c0_69 = arith.constant 0 : index
    %c0_70 = arith.constant 0 : index
    %c0_71 = arith.constant 0 : index
    %162 = vector.load %arg15[%c0_69, %c0_70, %c0_71] : memref<1x1x32xf32, #tpu.memory_space<vmem>>, vector<1x1x32xf32>
    %163 = vector.shape_cast %162 : vector<1x1x32xf32> to vector<1x32xf32>
    %c0_72 = arith.constant 0 : index
    %c0_73 = arith.constant 0 : index
    %c0_74 = arith.constant 0 : index
    %164 = vector.load %arg16[%c0_72, %c0_73, %c0_74] : memref<1x1x32xf32, #tpu.memory_space<vmem>>, vector<1x1x32xf32>
    %165 = vector.shape_cast %164 : vector<1x1x32xf32> to vector<1x32xf32>
    %cst_75 = arith.constant dense<0.000000e+00> : vector<16x64xf32>
    %166 = tpu.matmul %153, %155, %cst_75 {dimension_numbers = #tpu.dot_dimension_numbers<[1], [0], [0], [1], [0, 0, 1, 1], [], []>} : vector<16x32xf32>, vector<32x64xf32>, vector<16x64xf32> -> vector<16x64xf32>
    %167 = vector.broadcast %157 : vector<1x64xf32> to vector<16x64xf32>
    %168 = arith.addf %166, %167 : vector<16x64xf32>
    %cst_76 = arith.constant 5.000000e-01 : f32
    %169 = vector.broadcast %cst_76 : f32 to vector<16x64xf32>
    %170 = arith.mulf %169, %168 : vector<16x64xf32>
    %cst_77 = arith.constant 4.471500e-02 : f32
    %171 = vector.broadcast %cst_77 : f32 to vector<16x64xf32>
    %172 = arith.mulf %171, %168 : vector<16x64xf32>
    %173 = arith.mulf %172, %168 : vector<16x64xf32>
    %174 = arith.mulf %173, %168 : vector<16x64xf32>
    %175 = arith.addf %168, %174 : vector<16x64xf32>
    %cst_78 = arith.constant 0.797884583 : f32
    %176 = vector.broadcast %cst_78 : f32 to vector<16x64xf32>
    %177 = arith.mulf %176, %175 : vector<16x64xf32>
    %178 = math.tanh %177 : vector<16x64xf32>
    %cst_79 = arith.constant 1.000000e+00 : f32
    %179 = vector.broadcast %cst_79 : f32 to vector<16x64xf32>
    %180 = arith.addf %179, %178 : vector<16x64xf32>
    %181 = arith.mulf %170, %180 : vector<16x64xf32>
    %cst_80 = arith.constant dense<0.000000e+00> : vector<16x32xf32>
    %182 = tpu.matmul %181, %159, %cst_80 {dimension_numbers = #tpu.dot_dimension_numbers<[1], [0], [0], [1], [0, 0, 1, 1], [], []>} : vector<16x64xf32>, vector<64x32xf32>, vector<16x32xf32> -> vector<16x32xf32>
    %183 = vector.broadcast %161 : vector<1x32xf32> to vector<16x32xf32>
    %184 = arith.addf %182, %183 : vector<16x32xf32>
    %185 = arith.addf %184, %153 : vector<16x32xf32>
    %cst_81 = arith.constant dense<0.000000e+00> : vector<16xf32>
    %186 = vector.multi_reduction <add>, %185, %cst_81 [1] : vector<16x32xf32> to vector<16xf32>
    %187 = vector.shape_cast %186 : vector<16xf32> to vector<16x1xf32>
    %cst_82 = arith.constant 3.200000e+01 : f32
    %188 = vector.broadcast %cst_82 : f32 to vector<16x1xf32>
    %189 = arith.divf %187, %188 : vector<16x1xf32>
    %190 = vector.broadcast %189 : vector<16x1xf32> to vector<16x32xf32>
    %191 = arith.subf %185, %190 : vector<16x32xf32>
    %192 = arith.mulf %191, %191 : vector<16x32xf32>
    %cst_83 = arith.constant dense<0.000000e+00> : vector<16xf32>
    %193 = vector.multi_reduction <add>, %192, %cst_83 [1] : vector<16x32xf32> to vector<16xf32>
    %194 = vector.shape_cast %193 : vector<16xf32> to vector<16x1xf32>
    %cst_84 = arith.constant 3.200000e+01 : f32
    %195 = vector.broadcast %cst_84 : f32 to vector<16x1xf32>
    %196 = arith.divf %194, %195 : vector<16x1xf32>
    %197 = vector.broadcast %189 : vector<16x1xf32> to vector<16x32xf32>
    %198 = arith.subf %185, %197 : vector<16x32xf32>
    %cst_85 = arith.constant 9.99999974E-6 : f32
    %199 = vector.broadcast %cst_85 : f32 to vector<16x1xf32>
    %200 = arith.addf %196, %199 : vector<16x1xf32>
    %201 = math.rsqrt %200 : vector<16x1xf32>
    %202 = vector.broadcast %201 : vector<16x1xf32> to vector<16x32xf32>
    %203 = arith.mulf %198, %202 : vector<16x32xf32>
    %204 = vector.broadcast %163 : vector<1x32xf32> to vector<16x32xf32>
    %205 = arith.mulf %203, %204 : vector<16x32xf32>
    %206 = vector.broadcast %165 : vector<1x32xf32> to vector<16x32xf32>
    %207 = arith.addf %205, %206 : vector<16x32xf32>
    %208 = arith.addf %207, %153 : vector<16x32xf32>
    %c0_86 = arith.constant 0 : index
    %c0_87 = arith.constant 0 : index
    %c0_88 = arith.constant 0 : index
    %209 = vector.load %arg17[%c0_86, %c0_87, %c0_88] : memref<1x1x32xf32, #tpu.memory_space<vmem>>, vector<1x1x32xf32>
    %210 = vector.shape_cast %209 : vector<1x1x32xf32> to vector<1x32xf32>
    %c0_89 = arith.constant 0 : index
    %c0_90 = arith.constant 0 : index
    %c0_91 = arith.constant 0 : index
    %211 = vector.load %arg18[%c0_89, %c0_90, %c0_91] : memref<1x1x32xf32, #tpu.memory_space<vmem>>, vector<1x1x32xf32>
    %212 = vector.shape_cast %211 : vector<1x1x32xf32> to vector<1x32xf32>
    %cst_92 = arith.constant dense<0.000000e+00> : vector<16xf32>
    %213 = vector.multi_reduction <add>, %208, %cst_92 [1] : vector<16x32xf32> to vector<16xf32>
    %214 = vector.shape_cast %213 : vector<16xf32> to vector<16x1xf32>
    %cst_93 = arith.constant 3.200000e+01 : f32
    %215 = vector.broadcast %cst_93 : f32 to vector<16x1xf32>
    %216 = arith.divf %214, %215 : vector<16x1xf32>
    %217 = vector.broadcast %216 : vector<16x1xf32> to vector<16x32xf32>
    %218 = arith.subf %208, %217 : vector<16x32xf32>
    %219 = arith.mulf %218, %218 : vector<16x32xf32>
    %cst_94 = arith.constant dense<0.000000e+00> : vector<16xf32>
    %220 = vector.multi_reduction <add>, %219, %cst_94 [1] : vector<16x32xf32> to vector<16xf32>
    %221 = vector.shape_cast %220 : vector<16xf32> to vector<16x1xf32>
    %cst_95 = arith.constant 3.200000e+01 : f32
    %222 = vector.broadcast %cst_95 : f32 to vector<16x1xf32>
    %223 = arith.divf %221, %222 : vector<16x1xf32>
    %224 = vector.broadcast %216 : vector<16x1xf32> to vector<16x32xf32>
    %225 = arith.subf %208, %224 : vector<16x32xf32>
    %cst_96 = arith.constant 9.99999974E-6 : f32
    %226 = vector.broadcast %cst_96 : f32 to vector<16x1xf32>
    %227 = arith.addf %223, %226 : vector<16x1xf32>
    %228 = math.rsqrt %227 : vector<16x1xf32>
    %229 = vector.broadcast %228 : vector<16x1xf32> to vector<16x32xf32>
    %230 = arith.mulf %225, %229 : vector<16x32xf32>
    %231 = vector.broadcast %210 : vector<1x32xf32> to vector<16x32xf32>
    %232 = arith.mulf %230, %231 : vector<16x32xf32>
    %233 = vector.broadcast %212 : vector<1x32xf32> to vector<16x32xf32>
    %234 = arith.addf %232, %233 : vector<16x32xf32>
    %c0_97 = arith.constant 0 : index
    %c0_98 = arith.constant 0 : index
    %235 = vector.load %arg19[%c0_97, %c0_98] : memref<16x32xf32, #tpu.memory_space<vmem>>, vector<16x32xf32>
    tpu.vector_store %arg19[%c0_97, %c0_98], %234 {strides = array<i32>} : memref<16x32xf32, #tpu.memory_space<vmem>>, vector<16x32xf32>,
    return
  }
  func.func @transform_0(%arg0: i32, %arg1: i32) -> (i32, i32) {
    %c0_i32 = arith.constant 0 : i32
    %c0_i32_0 = arith.constant 0 : i32
    return %arg0, %c0_i32 : i32, i32
  }
  func.func @transform_1(%arg0: i32, %arg1: i32) -> (i32, i32, i32) {
    %c0_i32 = arith.constant 0 : i32
    %c0_i32_0 = arith.constant 0 : i32
    %c0_i32_1 = arith.constant 0 : i32
    return %arg1, %c0_i32, %c0_i32_0 : i32, i32, i32
  }
  func.func @transform_2(%arg0: i32, %arg1: i32) -> (i32, i32, i32) {
    %c0_i32 = arith.constant 0 : i32
    %c0_i32_0 = arith.constant 0 : i32
    %c0_i32_1 = arith.constant 0 : i32
    return %arg1, %c0_i32, %c0_i32_0 : i32, i32, i32
  }
  func.func @transform_3(%arg0: i32, %arg1: i32) -> (i32, i32, i32) {
    %c0_i32 = arith.constant 0 : i32
    %c0_i32_0 = arith.constant 0 : i32
    %c0_i32_1 = arith.constant 0 : i32
    return %arg1, %c0_i32, %c0_i32_0 : i32, i32, i32
  }
  func.func @transform_4(%arg0: i32, %arg1: i32) -> (i32, i32, i32) {
    %c0_i32 = arith.constant 0 : i32
    %c0_i32_0 = arith.constant 0 : i32
    %c0_i32_1 = arith.constant 0 : i32
    return %arg1, %c0_i32, %c0_i32_0 : i32, i32, i32
  }
  func.func @transform_5(%arg0: i32, %arg1: i32) -> (i32, i32, i32) {
    %c0_i32 = arith.constant 0 : i32
    %c0_i32_0 = arith.constant 0 : i32
    %c0_i32_1 = arith.constant 0 : i32
    return %arg1, %c0_i32, %c0_i32_0 : i32, i32, i32
  }
  func.func @transform_6(%arg0: i32, %arg1: i32) -> (i32, i32, i32) {
    %c0_i32 = arith.constant 0 : i32
    %c0_i32_0 = arith.constant 0 : i32
    %c0_i32_1 = arith.constant 0 : i32
    return %arg1, %c0_i32, %c0_i32_0 : i32, i32, i32
  }
  func.func @transform_7(%arg0: i32, %arg1: i32) -> (i32, i32, i32) {
    %c0_i32 = arith.constant 0 : i32
    %c0_i32_0 = arith.constant 0 : i32
    %c0_i32_1 = arith.constant 0 : i32
    return %arg1, %c0_i32, %c0_i32_0 : i32, i32, i32
  }
  func.func @transform_8(%arg0: i32, %arg1: i32) -> (i32, i32, i32) {
    %c0_i32 = arith.constant 0 : i32
    %c0_i32_0 = arith.constant 0 : i32
    %c0_i32_1 = arith.constant 0 : i32
    return %arg1, %c0_i32, %c0_i32_0 : i32, i32, i32
  }
  func.func @transform_9(%arg0: i32, %arg1: i32) -> (i32, i32, i32) {
    %c0_i32 = arith.constant 0 : i32
    %c0_i32_0 = arith.constant 0 : i32
    %c0_i32_1 = arith.constant 0 : i32
    return %arg1, %c0_i32, %c0_i32_0 : i32, i32, i32
  }
  func.func @transform_10(%arg0: i32, %arg1: i32) -> (i32, i32, i32) {
    %c0_i32 = arith.constant 0 : i32
    %c0_i32_0 = arith.constant 0 : i32
    %c0_i32_1 = arith.constant 0 : i32
    return %arg1, %c0_i32, %c0_i32_0 : i32, i32, i32
  }
  func.func @transform_11(%arg0: i32, %arg1: i32) -> (i32, i32, i32) {
    %c0_i32 = arith.constant 0 : i32
    %c0_i32_0 = arith.constant 0 : i32
    %c0_i32_1 = arith.constant 0 : i32
    return %arg1, %c0_i32, %c0_i32_0 : i32, i32, i32
  }
  func.func @transform_12(%arg0: i32, %arg1: i32) -> (i32, i32, i32) {
    %c0_i32 = arith.constant 0 : i32
    %c0_i32_0 = arith.constant 0 : i32
    %c0_i32_1 = arith.constant 0 : i32
    return %arg1, %c0_i32, %c0_i32_0 : i32, i32, i32
  }
  func.func @transform_13(%arg0: i32, %arg1: i32) -> (i32, i32, i32) {
    %c0_i32 = arith.constant 0 : i32
    %c0_i32_0 = arith.constant 0 : i32
    %c0_i32_1 = arith.constant 0 : i32
    return %arg1, %c0_i32, %c0_i32_0 : i32, i32, i32
  }
  func.func @transform_14(%arg0: i32, %arg1: i32) -> (i32, i32, i32) {
    %c0_i32 = arith.constant 0 : i32
    %c0_i32_0 = arith.constant 0 : i32
    %c0_i32_1 = arith.constant 0 : i32
    return %arg1, %c0_i32, %c0_i32_0 : i32, i32, i32
  }
  func.func @transform_15(%arg0: i32, %arg1: i32) -> (i32, i32, i32) {
    %c0_i32 = arith.constant 0 : i32
    %c0_i32_0 = arith.constant 0 : i32
    %c0_i32_1 = arith.constant 0 : i32
    return %arg1, %c0_i32, %c0_i32_0 : i32, i32, i32
  }
  func.func @transform_16(%arg0: i32, %arg1: i32) -> (i32, i32, i32) {
    %c0_i32 = arith.constant 0 : i32
    %c0_i32_0 = arith.constant 0 : i32
    %c0_i32_1 = arith.constant 0 : i32
    return %arg1, %c0_i32, %c0_i32_0 : i32, i32, i32
  }
  func.func @transform_17(%arg0: i32, %arg1: i32) -> (i32, i32) {
    %c0_i32 = arith.constant 0 : i32
    %c0_i32_0 = arith.constant 0 : i32
    return %arg0, %c0_i32 : i32, i32
  }
}

module attributes {stable_mosaic.version = 11 : i64} {
  func.func @_decoder_stack_kernel(%arg0: i32, %arg1: i32, %arg2: memref<16x32xf32, #tpu.memory_space<vmem>>, %arg3: memref<16x32xf32, #tpu.memory_space<vmem>>, %arg4: memref<1x32x96xf32, #tpu.memory_space<vmem>>, %arg5: memref<1x1x96xf32, #tpu.memory_space<vmem>>, %arg6: memref<1x32x32xf32, #tpu.memory_space<vmem>>, %arg7: memref<1x1x32xf32, #tpu.memory_space<vmem>>, %arg8: memref<1x1x32xf32, #tpu.memory_space<vmem>>, %arg9: memref<1x1x32xf32, #tpu.memory_space<vmem>>, %arg10: memref<1x1x32xf32, #tpu.memory_space<vmem>>, %arg11: memref<1x1x32xf32, #tpu.memory_space<vmem>>, %arg12: memref<1x32x96xf32, #tpu.memory_space<vmem>>, %arg13: memref<1x1x96xf32, #tpu.memory_space<vmem>>, %arg14: memref<1x32x32xf32, #tpu.memory_space<vmem>>, %arg15: memref<1x1x32xf32, #tpu.memory_space<vmem>>, %arg16: memref<1x1x32xf32, #tpu.memory_space<vmem>>, %arg17: memref<1x1x32xf32, #tpu.memory_space<vmem>>, %arg18: memref<1x1x32xf32, #tpu.memory_space<vmem>>, %arg19: memref<1x1x32xf32, #tpu.memory_space<vmem>>, %arg20: memref<1x32x64xf32, #tpu.memory_space<vmem>>, %arg21: memref<1x1x64xf32, #tpu.memory_space<vmem>>, %arg22: memref<1x64x32xf32, #tpu.memory_space<vmem>>, %arg23: memref<1x1x32xf32, #tpu.memory_space<vmem>>, %arg24: memref<1x1x32xf32, #tpu.memory_space<vmem>>, %arg25: memref<1x1x32xf32, #tpu.memory_space<vmem>>, %arg26: memref<1x1x32xf32, #tpu.memory_space<vmem>>, %arg27: memref<1x1x32xf32, #tpu.memory_space<vmem>>, %arg28: memref<16x32xf32, #tpu.memory_space<vmem>>) attributes {dimension_semantics = [#tpu.dimension_semantics<parallel>, #tpu.dimension_semantics<arbitrary>], iteration_bounds = array<i64: 1, 2>, scalar_prefetch = 0 : i64, scratch_operands = 0 : i64, tpu.core_type = #tpu.core_type<tc>, window_params = [{transform_indices = @transform_0, window_bounds = array<i64: 16, 32>}, {transform_indices = @transform_1, window_bounds = array<i64: 16, 32>}, {transform_indices = @transform_2, window_bounds = array<i64: 1, 32, 96>}, {transform_indices = @transform_3, window_bounds = array<i64: 1, 1, 96>}, {transform_indices = @transform_4, window_bounds = array<i64: 1, 32, 32>}, {transform_indices = @transform_5, window_bounds = array<i64: 1, 1, 32>}, {transform_indices = @transform_6, window_bounds = array<i64: 1, 1, 32>}, {transform_indices = @transform_7, window_bounds = array<i64: 1, 1, 32>}, {transform_indices = @transform_8, window_bounds = array<i64: 1, 1, 32>}, {transform_indices = @transform_9, window_bounds = array<i64: 1, 1, 32>}, {transform_indices = @transform_10, window_bounds = array<i64: 1, 32, 96>}, {transform_indices = @transform_11, window_bounds = array<i64: 1, 1, 96>}, {transform_indices = @transform_12, window_bounds = array<i64: 1, 32, 32>}, {transform_indices = @transform_13, window_bounds = array<i64: 1, 1, 32>}, {transform_indices = @transform_14, window_bounds = array<i64: 1, 1, 32>}, {transform_indices = @transform_15, window_bounds = array<i64: 1, 1, 32>}, {transform_indices = @transform_16, window_bounds = array<i64: 1, 1, 32>}, {transform_indices = @transform_17, window_bounds = array<i64: 1, 1, 32>}, {transform_indices = @transform_18, window_bounds = array<i64: 1, 32, 64>}, {transform_indices = @transform_19, window_bounds = array<i64: 1, 1, 64>}, {transform_indices = @transform_20, window_bounds = array<i64: 1, 64, 32>}, {transform_indices = @transform_21, window_bounds = array<i64: 1, 1, 32>}, {transform_indices = @transform_22, window_bounds = array<i64: 1, 1, 32>}, {transform_indices = @transform_23, window_bounds = array<i64: 1, 1, 32>}, {transform_indices = @transform_24, window_bounds = array<i64: 1, 1, 32>}, {transform_indices = @transform_25, window_bounds = array<i64: 1, 1, 32>}, {transform_indices = @transform_26, window_bounds = array<i64: 16, 32>}]} {
    %c0_i32 = arith.constant 0 : i32
    %0 = arith.cmpi eq, %arg1, %c0_i32 : i32
    %1 = arith.extui %0 : i1 to i32
    %c0_i32_0 = arith.constant 0 : i32
    %2 = arith.cmpi ne, %1, %c0_i32_0 : i32
    scf.if %2 {
      %c0_158 = arith.constant 0 : index
      %c0_159 = arith.constant 0 : index
      %393 = vector.load %arg2[%c0_158, %c0_159] : memref<16x32xf32, #tpu.memory_space<vmem>>, vector<16x32xf32>
      %c0_160 = arith.constant 0 : index
      %c0_161 = arith.constant 0 : index
      %394 = vector.load %arg28[%c0_160, %c0_161] : memref<16x32xf32, #tpu.memory_space<vmem>>, vector<16x32xf32>
      tpu.vector_store %arg28[%c0_160, %c0_161], %393 {strides = array<i32>} : memref<16x32xf32, #tpu.memory_space<vmem>>, vector<16x32xf32>,
    } else {
    }
    %c0 = arith.constant 0 : index
    %c0_1 = arith.constant 0 : index
    %3 = vector.load %arg28[%c0, %c0_1] : memref<16x32xf32, #tpu.memory_space<vmem>>, vector<16x32xf32>
    %c0_2 = arith.constant 0 : index
    %c0_3 = arith.constant 0 : index
    %4 = vector.load %arg3[%c0_2, %c0_3] : memref<16x32xf32, #tpu.memory_space<vmem>>, vector<16x32xf32>
    %c0_4 = arith.constant 0 : index
    %c0_5 = arith.constant 0 : index
    %c0_6 = arith.constant 0 : index
    %5 = vector.load %arg4[%c0_4, %c0_5, %c0_6] : memref<1x32x96xf32, #tpu.memory_space<vmem>>, vector<1x32x96xf32>
    %6 = vector.shape_cast %5 : vector<1x32x96xf32> to vector<32x96xf32>
    %c0_7 = arith.constant 0 : index
    %c0_8 = arith.constant 0 : index
    %c0_9 = arith.constant 0 : index
    %7 = vector.load %arg5[%c0_7, %c0_8, %c0_9] : memref<1x1x96xf32, #tpu.memory_space<vmem>>, vector<1x1x96xf32>
    %8 = vector.shape_cast %7 : vector<1x1x96xf32> to vector<1x96xf32>
    %c0_10 = arith.constant 0 : index
    %c0_11 = arith.constant 0 : index
    %c0_12 = arith.constant 0 : index
    %9 = vector.load %arg6[%c0_10, %c0_11, %c0_12] : memref<1x32x32xf32, #tpu.memory_space<vmem>>, vector<1x32x32xf32>
    %10 = vector.shape_cast %9 : vector<1x32x32xf32> to vector<32x32xf32>
    %c0_13 = arith.constant 0 : index
    %c0_14 = arith.constant 0 : index
    %c0_15 = arith.constant 0 : index
    %11 = vector.load %arg7[%c0_13, %c0_14, %c0_15] : memref<1x1x32xf32, #tpu.memory_space<vmem>>, vector<1x1x32xf32>
    %12 = vector.shape_cast %11 : vector<1x1x32xf32> to vector<1x32xf32>
    %c0_16 = arith.constant 0 : index
    %c0_17 = arith.constant 0 : index
    %c0_18 = arith.constant 0 : index
    %13 = vector.load %arg8[%c0_16, %c0_17, %c0_18] : memref<1x1x32xf32, #tpu.memory_space<vmem>>, vector<1x1x32xf32>
    %14 = vector.shape_cast %13 : vector<1x1x32xf32> to vector<1x32xf32>
    %c0_19 = arith.constant 0 : index
    %c0_20 = arith.constant 0 : index
    %c0_21 = arith.constant 0 : index
    %15 = vector.load %arg9[%c0_19, %c0_20, %c0_21] : memref<1x1x32xf32, #tpu.memory_space<vmem>>, vector<1x1x32xf32>
    %16 = vector.shape_cast %15 : vector<1x1x32xf32> to vector<1x32xf32>
    %cst = arith.constant dense<0.000000e+00> : vector<16x96xf32>
    %17 = tpu.matmul %3, %6, %cst {dimension_numbers = #tpu.dot_dimension_numbers<[1], [0], [0], [1], [0, 0, 1, 1], [], []>} : vector<16x32xf32>, vector<32x96xf32>, vector<16x96xf32> -> vector<16x96xf32>
    %18 = vector.broadcast %8 : vector<1x96xf32> to vector<16x96xf32>
    %19 = arith.addf %17, %18 : vector<16x96xf32>
    %20 = vector.extract_strided_slice %19 {offsets = [0, 0], sizes = [16, 32], strides = [1, 1]} : vector<16x96xf32> to vector<16x32xf32>
    %21 = vector.extract_strided_slice %19 {offsets = [0, 32], sizes = [16, 32], strides = [1, 1]} : vector<16x96xf32> to vector<16x32xf32>
    %22 = vector.extract_strided_slice %19 {offsets = [0, 64], sizes = [16, 32], strides = [1, 1]} : vector<16x96xf32> to vector<16x32xf32>
    %23 = vector.shape_cast %20 : vector<16x32xf32> to vector<2x8x32xf32>
    %24 = vector.shape_cast %21 : vector<16x32xf32> to vector<2x8x32xf32>
    %25 = vector.shape_cast %22 : vector<16x32xf32> to vector<2x8x32xf32>
    %cst_22 = arith.constant 0.000000e+00 : f32
    %26 = vector.broadcast %cst_22 : f32 to vector<16x32xf32>
    %27 = vector.extract_strided_slice %23 {offsets = [0, 0, 0], sizes = [2, 8, 8], strides = [1, 1, 1]} : vector<2x8x32xf32> to vector<2x8x8xf32>
    %28 = vector.extract_strided_slice %24 {offsets = [0, 0, 0], sizes = [2, 8, 8], strides = [1, 1, 1]} : vector<2x8x32xf32> to vector<2x8x8xf32>
    %29 = vector.extract_strided_slice %25 {offsets = [0, 0, 0], sizes = [2, 8, 8], strides = [1, 1, 1]} : vector<2x8x32xf32> to vector<2x8x8xf32>
    "tpu.trace_start"() <{level = 10 : i32, message = "bqd,bkd->bqk"}> : () -> ()
    %cst_23 = arith.constant dense<0.000000e+00> : vector<2x8x8xf32>
    %30 = tpu.matmul %27, %28, %cst_23 {dimension_numbers = #tpu.dot_dimension_numbers<[2], [2], [1], [1], [0, 0, 0, 1, 1, 1], [0], [0]>} : vector<2x8x8xf32>, vector<2x8x8xf32>, vector<2x8x8xf32> -> vector<2x8x8xf32>
    "tpu.trace_stop"() : () -> ()
    %cst_24 = arith.constant dense<0xFF800000> : vector<2x8xf32>
    %31 = vector.multi_reduction <maximumf>, %30, %cst_24 [2] : vector<2x8x8xf32> to vector<2x8xf32>
    %32 = vector.shape_cast %31 : vector<2x8xf32> to vector<2x8x1xf32>
    %33 = vector.broadcast %32 : vector<2x8x1xf32> to vector<2x8x8xf32>
    %34 = arith.subf %30, %33 : vector<2x8x8xf32>
    %35 = math.exp %34 : vector<2x8x8xf32>
    "tpu.trace_start"() <{level = 10 : i32, message = "bqk,bkd->bqd"}> : () -> ()
    %cst_25 = arith.constant dense<0.000000e+00> : vector<2x8x8xf32>
    %36 = tpu.matmul %35, %29, %cst_25 {dimension_numbers = #tpu.dot_dimension_numbers<[2], [1], [1], [2], [0, 0, 0, 1, 1, 2], [0], [0]>} : vector<2x8x8xf32>, vector<2x8x8xf32>, vector<2x8x8xf32> -> vector<2x8x8xf32>
    "tpu.trace_stop"() : () -> ()
    %cst_26 = arith.constant dense<0.000000e+00> : vector<2x8xf32>
    %37 = vector.multi_reduction <add>, %35, %cst_26 [2] : vector<2x8x8xf32> to vector<2x8xf32>
    %38 = vector.shape_cast %37 : vector<2x8xf32> to vector<2x8x1xf32>
    %39 = tpu.reciprocal %38 {approx = true} : vector<2x8x1xf32> -> vector<2x8x1xf32>
    %40 = vector.broadcast %39 : vector<2x8x1xf32> to vector<2x8x8xf32>
    %41 = arith.mulf %36, %40 : vector<2x8x8xf32>
    %42 = vector.shape_cast %41 : vector<2x8x8xf32> to vector<16x8xf32>
    %43 = vector.extract_strided_slice %10 {offsets = [0, 0], sizes = [8, 32], strides = [1, 1]} : vector<32x32xf32> to vector<8x32xf32>
    %cst_27 = arith.constant dense<0.000000e+00> : vector<16x32xf32>
    %44 = tpu.matmul %42, %43, %cst_27 {dimension_numbers = #tpu.dot_dimension_numbers<[1], [0], [0], [1], [0, 0, 1, 1], [], []>} : vector<16x8xf32>, vector<8x32xf32>, vector<16x32xf32> -> vector<16x32xf32>
    %45 = arith.addf %26, %44 : vector<16x32xf32>
    %46 = vector.extract_strided_slice %23 {offsets = [0, 0, 8], sizes = [2, 8, 8], strides = [1, 1, 1]} : vector<2x8x32xf32> to vector<2x8x8xf32>
    %47 = vector.extract_strided_slice %24 {offsets = [0, 0, 8], sizes = [2, 8, 8], strides = [1, 1, 1]} : vector<2x8x32xf32> to vector<2x8x8xf32>
    %48 = vector.extract_strided_slice %25 {offsets = [0, 0, 8], sizes = [2, 8, 8], strides = [1, 1, 1]} : vector<2x8x32xf32> to vector<2x8x8xf32>
    "tpu.trace_start"() <{level = 10 : i32, message = "bqd,bkd->bqk"}> : () -> ()
    %cst_28 = arith.constant dense<0.000000e+00> : vector<2x8x8xf32>
    %49 = tpu.matmul %46, %47, %cst_28 {dimension_numbers = #tpu.dot_dimension_numbers<[2], [2], [1], [1], [0, 0, 0, 1, 1, 1], [0], [0]>} : vector<2x8x8xf32>, vector<2x8x8xf32>, vector<2x8x8xf32> -> vector<2x8x8xf32>
    "tpu.trace_stop"() : () -> ()
    %cst_29 = arith.constant dense<0xFF800000> : vector<2x8xf32>
    %50 = vector.multi_reduction <maximumf>, %49, %cst_29 [2] : vector<2x8x8xf32> to vector<2x8xf32>
    %51 = vector.shape_cast %50 : vector<2x8xf32> to vector<2x8x1xf32>
    %52 = vector.broadcast %51 : vector<2x8x1xf32> to vector<2x8x8xf32>
    %53 = arith.subf %49, %52 : vector<2x8x8xf32>
    %54 = math.exp %53 : vector<2x8x8xf32>
    "tpu.trace_start"() <{level = 10 : i32, message = "bqk,bkd->bqd"}> : () -> ()
    %cst_30 = arith.constant dense<0.000000e+00> : vector<2x8x8xf32>
    %55 = tpu.matmul %54, %48, %cst_30 {dimension_numbers = #tpu.dot_dimension_numbers<[2], [1], [1], [2], [0, 0, 0, 1, 1, 2], [0], [0]>} : vector<2x8x8xf32>, vector<2x8x8xf32>, vector<2x8x8xf32> -> vector<2x8x8xf32>
    "tpu.trace_stop"() : () -> ()
    %cst_31 = arith.constant dense<0.000000e+00> : vector<2x8xf32>
    %56 = vector.multi_reduction <add>, %54, %cst_31 [2] : vector<2x8x8xf32> to vector<2x8xf32>
    %57 = vector.shape_cast %56 : vector<2x8xf32> to vector<2x8x1xf32>
    %58 = tpu.reciprocal %57 {approx = true} : vector<2x8x1xf32> -> vector<2x8x1xf32>
    %59 = vector.broadcast %58 : vector<2x8x1xf32> to vector<2x8x8xf32>
    %60 = arith.mulf %55, %59 : vector<2x8x8xf32>
    %61 = vector.shape_cast %60 : vector<2x8x8xf32> to vector<16x8xf32>
    %62 = vector.extract_strided_slice %10 {offsets = [8, 0], sizes = [8, 32], strides = [1, 1]} : vector<32x32xf32> to vector<8x32xf32>
    %cst_32 = arith.constant dense<0.000000e+00> : vector<16x32xf32>
    %63 = tpu.matmul %61, %62, %cst_32 {dimension_numbers = #tpu.dot_dimension_numbers<[1], [0], [0], [1], [0, 0, 1, 1], [], []>} : vector<16x8xf32>, vector<8x32xf32>, vector<16x32xf32> -> vector<16x32xf32>
    %64 = arith.addf %45, %63 : vector<16x32xf32>
    %65 = vector.extract_strided_slice %23 {offsets = [0, 0, 16], sizes = [2, 8, 8], strides = [1, 1, 1]} : vector<2x8x32xf32> to vector<2x8x8xf32>
    %66 = vector.extract_strided_slice %24 {offsets = [0, 0, 16], sizes = [2, 8, 8], strides = [1, 1, 1]} : vector<2x8x32xf32> to vector<2x8x8xf32>
    %67 = vector.extract_strided_slice %25 {offsets = [0, 0, 16], sizes = [2, 8, 8], strides = [1, 1, 1]} : vector<2x8x32xf32> to vector<2x8x8xf32>
    "tpu.trace_start"() <{level = 10 : i32, message = "bqd,bkd->bqk"}> : () -> ()
    %cst_33 = arith.constant dense<0.000000e+00> : vector<2x8x8xf32>
    %68 = tpu.matmul %65, %66, %cst_33 {dimension_numbers = #tpu.dot_dimension_numbers<[2], [2], [1], [1], [0, 0, 0, 1, 1, 1], [0], [0]>} : vector<2x8x8xf32>, vector<2x8x8xf32>, vector<2x8x8xf32> -> vector<2x8x8xf32>
    "tpu.trace_stop"() : () -> ()
    %cst_34 = arith.constant dense<0xFF800000> : vector<2x8xf32>
    %69 = vector.multi_reduction <maximumf>, %68, %cst_34 [2] : vector<2x8x8xf32> to vector<2x8xf32>
    %70 = vector.shape_cast %69 : vector<2x8xf32> to vector<2x8x1xf32>
    %71 = vector.broadcast %70 : vector<2x8x1xf32> to vector<2x8x8xf32>
    %72 = arith.subf %68, %71 : vector<2x8x8xf32>
    %73 = math.exp %72 : vector<2x8x8xf32>
    "tpu.trace_start"() <{level = 10 : i32, message = "bqk,bkd->bqd"}> : () -> ()
    %cst_35 = arith.constant dense<0.000000e+00> : vector<2x8x8xf32>
    %74 = tpu.matmul %73, %67, %cst_35 {dimension_numbers = #tpu.dot_dimension_numbers<[2], [1], [1], [2], [0, 0, 0, 1, 1, 2], [0], [0]>} : vector<2x8x8xf32>, vector<2x8x8xf32>, vector<2x8x8xf32> -> vector<2x8x8xf32>
    "tpu.trace_stop"() : () -> ()
    %cst_36 = arith.constant dense<0.000000e+00> : vector<2x8xf32>
    %75 = vector.multi_reduction <add>, %73, %cst_36 [2] : vector<2x8x8xf32> to vector<2x8xf32>
    %76 = vector.shape_cast %75 : vector<2x8xf32> to vector<2x8x1xf32>
    %77 = tpu.reciprocal %76 {approx = true} : vector<2x8x1xf32> -> vector<2x8x1xf32>
    %78 = vector.broadcast %77 : vector<2x8x1xf32> to vector<2x8x8xf32>
    %79 = arith.mulf %74, %78 : vector<2x8x8xf32>
    %80 = vector.shape_cast %79 : vector<2x8x8xf32> to vector<16x8xf32>
    %81 = vector.extract_strided_slice %10 {offsets = [16, 0], sizes = [8, 32], strides = [1, 1]} : vector<32x32xf32> to vector<8x32xf32>
    %cst_37 = arith.constant dense<0.000000e+00> : vector<16x32xf32>
    %82 = tpu.matmul %80, %81, %cst_37 {dimension_numbers = #tpu.dot_dimension_numbers<[1], [0], [0], [1], [0, 0, 1, 1], [], []>} : vector<16x8xf32>, vector<8x32xf32>, vector<16x32xf32> -> vector<16x32xf32>
    %83 = arith.addf %64, %82 : vector<16x32xf32>
    %84 = vector.extract_strided_slice %23 {offsets = [0, 0, 24], sizes = [2, 8, 8], strides = [1, 1, 1]} : vector<2x8x32xf32> to vector<2x8x8xf32>
    %85 = vector.extract_strided_slice %24 {offsets = [0, 0, 24], sizes = [2, 8, 8], strides = [1, 1, 1]} : vector<2x8x32xf32> to vector<2x8x8xf32>
    %86 = vector.extract_strided_slice %25 {offsets = [0, 0, 24], sizes = [2, 8, 8], strides = [1, 1, 1]} : vector<2x8x32xf32> to vector<2x8x8xf32>
    "tpu.trace_start"() <{level = 10 : i32, message = "bqd,bkd->bqk"}> : () -> ()
    %cst_38 = arith.constant dense<0.000000e+00> : vector<2x8x8xf32>
    %87 = tpu.matmul %84, %85, %cst_38 {dimension_numbers = #tpu.dot_dimension_numbers<[2], [2], [1], [1], [0, 0, 0, 1, 1, 1], [0], [0]>} : vector<2x8x8xf32>, vector<2x8x8xf32>, vector<2x8x8xf32> -> vector<2x8x8xf32>
    "tpu.trace_stop"() : () -> ()
    %cst_39 = arith.constant dense<0xFF800000> : vector<2x8xf32>
    %88 = vector.multi_reduction <maximumf>, %87, %cst_39 [2] : vector<2x8x8xf32> to vector<2x8xf32>
    %89 = vector.shape_cast %88 : vector<2x8xf32> to vector<2x8x1xf32>
    %90 = vector.broadcast %89 : vector<2x8x1xf32> to vector<2x8x8xf32>
    %91 = arith.subf %87, %90 : vector<2x8x8xf32>
    %92 = math.exp %91 : vector<2x8x8xf32>
    "tpu.trace_start"() <{level = 10 : i32, message = "bqk,bkd->bqd"}> : () -> ()
    %cst_40 = arith.constant dense<0.000000e+00> : vector<2x8x8xf32>
    %93 = tpu.matmul %92, %86, %cst_40 {dimension_numbers = #tpu.dot_dimension_numbers<[2], [1], [1], [2], [0, 0, 0, 1, 1, 2], [0], [0]>} : vector<2x8x8xf32>, vector<2x8x8xf32>, vector<2x8x8xf32> -> vector<2x8x8xf32>
    "tpu.trace_stop"() : () -> ()
    %cst_41 = arith.constant dense<0.000000e+00> : vector<2x8xf32>
    %94 = vector.multi_reduction <add>, %92, %cst_41 [2] : vector<2x8x8xf32> to vector<2x8xf32>
    %95 = vector.shape_cast %94 : vector<2x8xf32> to vector<2x8x1xf32>
    %96 = tpu.reciprocal %95 {approx = true} : vector<2x8x1xf32> -> vector<2x8x1xf32>
    %97 = vector.broadcast %96 : vector<2x8x1xf32> to vector<2x8x8xf32>
    %98 = arith.mulf %93, %97 : vector<2x8x8xf32>
    %99 = vector.shape_cast %98 : vector<2x8x8xf32> to vector<16x8xf32>
    %100 = vector.extract_strided_slice %10 {offsets = [24, 0], sizes = [8, 32], strides = [1, 1]} : vector<32x32xf32> to vector<8x32xf32>
    %cst_42 = arith.constant dense<0.000000e+00> : vector<16x32xf32>
    %101 = tpu.matmul %99, %100, %cst_42 {dimension_numbers = #tpu.dot_dimension_numbers<[1], [0], [0], [1], [0, 0, 1, 1], [], []>} : vector<16x8xf32>, vector<8x32xf32>, vector<16x32xf32> -> vector<16x32xf32>
    %102 = arith.addf %83, %101 : vector<16x32xf32>
    %103 = vector.broadcast %12 : vector<1x32xf32> to vector<16x32xf32>
    %104 = arith.addf %102, %103 : vector<16x32xf32>
    %105 = arith.addf %104, %3 : vector<16x32xf32>
    %cst_43 = arith.constant dense<0.000000e+00> : vector<16xf32>
    %106 = vector.multi_reduction <add>, %105, %cst_43 [1] : vector<16x32xf32> to vector<16xf32>
    %107 = vector.shape_cast %106 : vector<16xf32> to vector<16x1xf32>
    %cst_44 = arith.constant 3.200000e+01 : f32
    %108 = vector.broadcast %cst_44 : f32 to vector<16x1xf32>
    %109 = arith.divf %107, %108 : vector<16x1xf32>
    %110 = vector.broadcast %109 : vector<16x1xf32> to vector<16x32xf32>
    %111 = arith.subf %105, %110 : vector<16x32xf32>
    %112 = arith.mulf %111, %111 : vector<16x32xf32>
    %cst_45 = arith.constant dense<0.000000e+00> : vector<16xf32>
    %113 = vector.multi_reduction <add>, %112, %cst_45 [1] : vector<16x32xf32> to vector<16xf32>
    %114 = vector.shape_cast %113 : vector<16xf32> to vector<16x1xf32>
    %cst_46 = arith.constant 3.200000e+01 : f32
    %115 = vector.broadcast %cst_46 : f32 to vector<16x1xf32>
    %116 = arith.divf %114, %115 : vector<16x1xf32>
    %117 = vector.broadcast %109 : vector<16x1xf32> to vector<16x32xf32>
    %118 = arith.subf %105, %117 : vector<16x32xf32>
    %cst_47 = arith.constant 9.99999974E-6 : f32
    %119 = vector.broadcast %cst_47 : f32 to vector<16x1xf32>
    %120 = arith.addf %116, %119 : vector<16x1xf32>
    %121 = math.rsqrt %120 : vector<16x1xf32>
    %122 = vector.broadcast %121 : vector<16x1xf32> to vector<16x32xf32>
    %123 = arith.mulf %118, %122 : vector<16x32xf32>
    %124 = vector.broadcast %14 : vector<1x32xf32> to vector<16x32xf32>
    %125 = arith.mulf %123, %124 : vector<16x32xf32>
    %126 = vector.broadcast %16 : vector<1x32xf32> to vector<16x32xf32>
    %127 = arith.addf %125, %126 : vector<16x32xf32>
    %128 = arith.addf %3, %127 : vector<16x32xf32>
    %c0_48 = arith.constant 0 : index
    %c0_49 = arith.constant 0 : index
    %c0_50 = arith.constant 0 : index
    %129 = vector.load %arg10[%c0_48, %c0_49, %c0_50] : memref<1x1x32xf32, #tpu.memory_space<vmem>>, vector<1x1x32xf32>
    %130 = vector.shape_cast %129 : vector<1x1x32xf32> to vector<1x32xf32>
    %c0_51 = arith.constant 0 : index
    %c0_52 = arith.constant 0 : index
    %c0_53 = arith.constant 0 : index
    %131 = vector.load %arg11[%c0_51, %c0_52, %c0_53] : memref<1x1x32xf32, #tpu.memory_space<vmem>>, vector<1x1x32xf32>
    %132 = vector.shape_cast %131 : vector<1x1x32xf32> to vector<1x32xf32>
    %cst_54 = arith.constant dense<0.000000e+00> : vector<16xf32>
    %133 = vector.multi_reduction <add>, %128, %cst_54 [1] : vector<16x32xf32> to vector<16xf32>
    %134 = vector.shape_cast %133 : vector<16xf32> to vector<16x1xf32>
    %cst_55 = arith.constant 3.200000e+01 : f32
    %135 = vector.broadcast %cst_55 : f32 to vector<16x1xf32>
    %136 = arith.divf %134, %135 : vector<16x1xf32>
    %137 = vector.broadcast %136 : vector<16x1xf32> to vector<16x32xf32>
    %138 = arith.subf %128, %137 : vector<16x32xf32>
    %139 = arith.mulf %138, %138 : vector<16x32xf32>
    %cst_56 = arith.constant dense<0.000000e+00> : vector<16xf32>
    %140 = vector.multi_reduction <add>, %139, %cst_56 [1] : vector<16x32xf32> to vector<16xf32>
    %141 = vector.shape_cast %140 : vector<16xf32> to vector<16x1xf32>
    %cst_57 = arith.constant 3.200000e+01 : f32
    %142 = vector.broadcast %cst_57 : f32 to vector<16x1xf32>
    %143 = arith.divf %141, %142 : vector<16x1xf32>
    %144 = vector.broadcast %136 : vector<16x1xf32> to vector<16x32xf32>
    %145 = arith.subf %128, %144 : vector<16x32xf32>
    %cst_58 = arith.constant 9.99999974E-6 : f32
    %146 = vector.broadcast %cst_58 : f32 to vector<16x1xf32>
    %147 = arith.addf %143, %146 : vector<16x1xf32>
    %148 = math.rsqrt %147 : vector<16x1xf32>
    %149 = vector.broadcast %148 : vector<16x1xf32> to vector<16x32xf32>
    %150 = arith.mulf %145, %149 : vector<16x32xf32>
    %151 = vector.broadcast %130 : vector<1x32xf32> to vector<16x32xf32>
    %152 = arith.mulf %150, %151 : vector<16x32xf32>
    %153 = vector.broadcast %132 : vector<1x32xf32> to vector<16x32xf32>
    %154 = arith.addf %152, %153 : vector<16x32xf32>
    %c0_59 = arith.constant 0 : index
    %c0_60 = arith.constant 0 : index
    %c0_61 = arith.constant 0 : index
    %155 = vector.load %arg12[%c0_59, %c0_60, %c0_61] : memref<1x32x96xf32, #tpu.memory_space<vmem>>, vector<1x32x96xf32>
    %156 = vector.shape_cast %155 : vector<1x32x96xf32> to vector<32x96xf32>
    %c0_62 = arith.constant 0 : index
    %c0_63 = arith.constant 0 : index
    %c0_64 = arith.constant 0 : index
    %157 = vector.load %arg13[%c0_62, %c0_63, %c0_64] : memref<1x1x96xf32, #tpu.memory_space<vmem>>, vector<1x1x96xf32>
    %158 = vector.shape_cast %157 : vector<1x1x96xf32> to vector<1x96xf32>
    %c0_65 = arith.constant 0 : index
    %c0_66 = arith.constant 0 : index
    %c0_67 = arith.constant 0 : index
    %159 = vector.load %arg14[%c0_65, %c0_66, %c0_67] : memref<1x32x32xf32, #tpu.memory_space<vmem>>, vector<1x32x32xf32>
    %160 = vector.shape_cast %159 : vector<1x32x32xf32> to vector<32x32xf32>
    %c0_68 = arith.constant 0 : index
    %c0_69 = arith.constant 0 : index
    %c0_70 = arith.constant 0 : index
    %161 = vector.load %arg15[%c0_68, %c0_69, %c0_70] : memref<1x1x32xf32, #tpu.memory_space<vmem>>, vector<1x1x32xf32>
    %162 = vector.shape_cast %161 : vector<1x1x32xf32> to vector<1x32xf32>
    %c0_71 = arith.constant 0 : index
    %c0_72 = arith.constant 0 : index
    %c0_73 = arith.constant 0 : index
    %163 = vector.load %arg16[%c0_71, %c0_72, %c0_73] : memref<1x1x32xf32, #tpu.memory_space<vmem>>, vector<1x1x32xf32>
    %164 = vector.shape_cast %163 : vector<1x1x32xf32> to vector<1x32xf32>
    %c0_74 = arith.constant 0 : index
    %c0_75 = arith.constant 0 : index
    %c0_76 = arith.constant 0 : index
    %165 = vector.load %arg17[%c0_74, %c0_75, %c0_76] : memref<1x1x32xf32, #tpu.memory_space<vmem>>, vector<1x1x32xf32>
    %166 = vector.shape_cast %165 : vector<1x1x32xf32> to vector<1x32xf32>
    %167 = vector.extract_strided_slice %156 {offsets = [0, 0], sizes = [32, 32], strides = [1, 1]} : vector<32x96xf32> to vector<32x32xf32>
    %cst_77 = arith.constant dense<0.000000e+00> : vector<16x32xf32>
    %168 = tpu.matmul %154, %167, %cst_77 {dimension_numbers = #tpu.dot_dimension_numbers<[1], [0], [0], [1], [0, 0, 1, 1], [], []>} : vector<16x32xf32>, vector<32x32xf32>, vector<16x32xf32> -> vector<16x32xf32>
    %169 = vector.extract_strided_slice %158 {offsets = [0, 0], sizes = [1, 32], strides = [1, 1]} : vector<1x96xf32> to vector<1x32xf32>
    %170 = vector.broadcast %169 : vector<1x32xf32> to vector<16x32xf32>
    %171 = arith.addf %168, %170 : vector<16x32xf32>
    %172 = vector.extract_strided_slice %156 {offsets = [0, 32], sizes = [32, 64], strides = [1, 1]} : vector<32x96xf32> to vector<32x64xf32>
    %cst_78 = arith.constant dense<0.000000e+00> : vector<16x64xf32>
    %173 = tpu.matmul %4, %172, %cst_78 {dimension_numbers = #tpu.dot_dimension_numbers<[1], [0], [0], [1], [0, 0, 1, 1], [], []>} : vector<16x32xf32>, vector<32x64xf32>, vector<16x64xf32> -> vector<16x64xf32>
    %174 = vector.extract_strided_slice %158 {offsets = [0, 32], sizes = [1, 64], strides = [1, 1]} : vector<1x96xf32> to vector<1x64xf32>
    %175 = vector.broadcast %174 : vector<1x64xf32> to vector<16x64xf32>
    %176 = arith.addf %173, %175 : vector<16x64xf32>
    %177 = vector.extract_strided_slice %176 {offsets = [0, 0], sizes = [16, 32], strides = [1, 1]} : vector<16x64xf32> to vector<16x32xf32>
    %178 = vector.extract_strided_slice %176 {offsets = [0, 32], sizes = [16, 32], strides = [1, 1]} : vector<16x64xf32> to vector<16x32xf32>
    %179 = vector.shape_cast %171 : vector<16x32xf32> to vector<2x8x32xf32>
    %180 = vector.shape_cast %177 : vector<16x32xf32> to vector<2x8x32xf32>
    %181 = vector.shape_cast %178 : vector<16x32xf32> to vector<2x8x32xf32>
    %cst_79 = arith.constant 0.000000e+00 : f32
    %182 = vector.broadcast %cst_79 : f32 to vector<16x32xf32>
    %183 = vector.extract_strided_slice %179 {offsets = [0, 0, 0], sizes = [2, 8, 8], strides = [1, 1, 1]} : vector<2x8x32xf32> to vector<2x8x8xf32>
    %184 = vector.extract_strided_slice %180 {offsets = [0, 0, 0], sizes = [2, 8, 8], strides = [1, 1, 1]} : vector<2x8x32xf32> to vector<2x8x8xf32>
    %185 = vector.extract_strided_slice %181 {offsets = [0, 0, 0], sizes = [2, 8, 8], strides = [1, 1, 1]} : vector<2x8x32xf32> to vector<2x8x8xf32>
    "tpu.trace_start"() <{level = 10 : i32, message = "bqd,bkd->bqk"}> : () -> ()
    %cst_80 = arith.constant dense<0.000000e+00> : vector<2x8x8xf32>
    %186 = tpu.matmul %183, %184, %cst_80 {dimension_numbers = #tpu.dot_dimension_numbers<[2], [2], [1], [1], [0, 0, 0, 1, 1, 1], [0], [0]>} : vector<2x8x8xf32>, vector<2x8x8xf32>, vector<2x8x8xf32> -> vector<2x8x8xf32>
    "tpu.trace_stop"() : () -> ()
    %cst_81 = arith.constant dense<0xFF800000> : vector<2x8xf32>
    %187 = vector.multi_reduction <maximumf>, %186, %cst_81 [2] : vector<2x8x8xf32> to vector<2x8xf32>
    %188 = vector.shape_cast %187 : vector<2x8xf32> to vector<2x8x1xf32>
    %189 = vector.broadcast %188 : vector<2x8x1xf32> to vector<2x8x8xf32>
    %190 = arith.subf %186, %189 : vector<2x8x8xf32>
    %191 = math.exp %190 : vector<2x8x8xf32>
    "tpu.trace_start"() <{level = 10 : i32, message = "bqk,bkd->bqd"}> : () -> ()
    %cst_82 = arith.constant dense<0.000000e+00> : vector<2x8x8xf32>
    %192 = tpu.matmul %191, %185, %cst_82 {dimension_numbers = #tpu.dot_dimension_numbers<[2], [1], [1], [2], [0, 0, 0, 1, 1, 2], [0], [0]>} : vector<2x8x8xf32>, vector<2x8x8xf32>, vector<2x8x8xf32> -> vector<2x8x8xf32>
    "tpu.trace_stop"() : () -> ()
    %cst_83 = arith.constant dense<0.000000e+00> : vector<2x8xf32>
    %193 = vector.multi_reduction <add>, %191, %cst_83 [2] : vector<2x8x8xf32> to vector<2x8xf32>
    %194 = vector.shape_cast %193 : vector<2x8xf32> to vector<2x8x1xf32>
    %195 = tpu.reciprocal %194 {approx = true} : vector<2x8x1xf32> -> vector<2x8x1xf32>
    %196 = vector.broadcast %195 : vector<2x8x1xf32> to vector<2x8x8xf32>
    %197 = arith.mulf %192, %196 : vector<2x8x8xf32>
    %198 = vector.shape_cast %197 : vector<2x8x8xf32> to vector<16x8xf32>
    %199 = vector.extract_strided_slice %160 {offsets = [0, 0], sizes = [8, 32], strides = [1, 1]} : vector<32x32xf32> to vector<8x32xf32>
    %cst_84 = arith.constant dense<0.000000e+00> : vector<16x32xf32>
    %200 = tpu.matmul %198, %199, %cst_84 {dimension_numbers = #tpu.dot_dimension_numbers<[1], [0], [0], [1], [0, 0, 1, 1], [], []>} : vector<16x8xf32>, vector<8x32xf32>, vector<16x32xf32> -> vector<16x32xf32>
    %201 = arith.addf %182, %200 : vector<16x32xf32>
    %202 = vector.extract_strided_slice %179 {offsets = [0, 0, 8], sizes = [2, 8, 8], strides = [1, 1, 1]} : vector<2x8x32xf32> to vector<2x8x8xf32>
    %203 = vector.extract_strided_slice %180 {offsets = [0, 0, 8], sizes = [2, 8, 8], strides = [1, 1, 1]} : vector<2x8x32xf32> to vector<2x8x8xf32>
    %204 = vector.extract_strided_slice %181 {offsets = [0, 0, 8], sizes = [2, 8, 8], strides = [1, 1, 1]} : vector<2x8x32xf32> to vector<2x8x8xf32>
    "tpu.trace_start"() <{level = 10 : i32, message = "bqd,bkd->bqk"}> : () -> ()
    %cst_85 = arith.constant dense<0.000000e+00> : vector<2x8x8xf32>
    %205 = tpu.matmul %202, %203, %cst_85 {dimension_numbers = #tpu.dot_dimension_numbers<[2], [2], [1], [1], [0, 0, 0, 1, 1, 1], [0], [0]>} : vector<2x8x8xf32>, vector<2x8x8xf32>, vector<2x8x8xf32> -> vector<2x8x8xf32>
    "tpu.trace_stop"() : () -> ()
    %cst_86 = arith.constant dense<0xFF800000> : vector<2x8xf32>
    %206 = vector.multi_reduction <maximumf>, %205, %cst_86 [2] : vector<2x8x8xf32> to vector<2x8xf32>
    %207 = vector.shape_cast %206 : vector<2x8xf32> to vector<2x8x1xf32>
    %208 = vector.broadcast %207 : vector<2x8x1xf32> to vector<2x8x8xf32>
    %209 = arith.subf %205, %208 : vector<2x8x8xf32>
    %210 = math.exp %209 : vector<2x8x8xf32>
    "tpu.trace_start"() <{level = 10 : i32, message = "bqk,bkd->bqd"}> : () -> ()
    %cst_87 = arith.constant dense<0.000000e+00> : vector<2x8x8xf32>
    %211 = tpu.matmul %210, %204, %cst_87 {dimension_numbers = #tpu.dot_dimension_numbers<[2], [1], [1], [2], [0, 0, 0, 1, 1, 2], [0], [0]>} : vector<2x8x8xf32>, vector<2x8x8xf32>, vector<2x8x8xf32> -> vector<2x8x8xf32>
    "tpu.trace_stop"() : () -> ()
    %cst_88 = arith.constant dense<0.000000e+00> : vector<2x8xf32>
    %212 = vector.multi_reduction <add>, %210, %cst_88 [2] : vector<2x8x8xf32> to vector<2x8xf32>
    %213 = vector.shape_cast %212 : vector<2x8xf32> to vector<2x8x1xf32>
    %214 = tpu.reciprocal %213 {approx = true} : vector<2x8x1xf32> -> vector<2x8x1xf32>
    %215 = vector.broadcast %214 : vector<2x8x1xf32> to vector<2x8x8xf32>
    %216 = arith.mulf %211, %215 : vector<2x8x8xf32>
    %217 = vector.shape_cast %216 : vector<2x8x8xf32> to vector<16x8xf32>
    %218 = vector.extract_strided_slice %160 {offsets = [8, 0], sizes = [8, 32], strides = [1, 1]} : vector<32x32xf32> to vector<8x32xf32>
    %cst_89 = arith.constant dense<0.000000e+00> : vector<16x32xf32>
    %219 = tpu.matmul %217, %218, %cst_89 {dimension_numbers = #tpu.dot_dimension_numbers<[1], [0], [0], [1], [0, 0, 1, 1], [], []>} : vector<16x8xf32>, vector<8x32xf32>, vector<16x32xf32> -> vector<16x32xf32>
    %220 = arith.addf %201, %219 : vector<16x32xf32>
    %221 = vector.extract_strided_slice %179 {offsets = [0, 0, 16], sizes = [2, 8, 8], strides = [1, 1, 1]} : vector<2x8x32xf32> to vector<2x8x8xf32>
    %222 = vector.extract_strided_slice %180 {offsets = [0, 0, 16], sizes = [2, 8, 8], strides = [1, 1, 1]} : vector<2x8x32xf32> to vector<2x8x8xf32>
    %223 = vector.extract_strided_slice %181 {offsets = [0, 0, 16], sizes = [2, 8, 8], strides = [1, 1, 1]} : vector<2x8x32xf32> to vector<2x8x8xf32>
    "tpu.trace_start"() <{level = 10 : i32, message = "bqd,bkd->bqk"}> : () -> ()
    %cst_90 = arith.constant dense<0.000000e+00> : vector<2x8x8xf32>
    %224 = tpu.matmul %221, %222, %cst_90 {dimension_numbers = #tpu.dot_dimension_numbers<[2], [2], [1], [1], [0, 0, 0, 1, 1, 1], [0], [0]>} : vector<2x8x8xf32>, vector<2x8x8xf32>, vector<2x8x8xf32> -> vector<2x8x8xf32>
    "tpu.trace_stop"() : () -> ()
    %cst_91 = arith.constant dense<0xFF800000> : vector<2x8xf32>
    %225 = vector.multi_reduction <maximumf>, %224, %cst_91 [2] : vector<2x8x8xf32> to vector<2x8xf32>
    %226 = vector.shape_cast %225 : vector<2x8xf32> to vector<2x8x1xf32>
    %227 = vector.broadcast %226 : vector<2x8x1xf32> to vector<2x8x8xf32>
    %228 = arith.subf %224, %227 : vector<2x8x8xf32>
    %229 = math.exp %228 : vector<2x8x8xf32>
    "tpu.trace_start"() <{level = 10 : i32, message = "bqk,bkd->bqd"}> : () -> ()
    %cst_92 = arith.constant dense<0.000000e+00> : vector<2x8x8xf32>
    %230 = tpu.matmul %229, %223, %cst_92 {dimension_numbers = #tpu.dot_dimension_numbers<[2], [1], [1], [2], [0, 0, 0, 1, 1, 2], [0], [0]>} : vector<2x8x8xf32>, vector<2x8x8xf32>, vector<2x8x8xf32> -> vector<2x8x8xf32>
    "tpu.trace_stop"() : () -> ()
    %cst_93 = arith.constant dense<0.000000e+00> : vector<2x8xf32>
    %231 = vector.multi_reduction <add>, %229, %cst_93 [2] : vector<2x8x8xf32> to vector<2x8xf32>
    %232 = vector.shape_cast %231 : vector<2x8xf32> to vector<2x8x1xf32>
    %233 = tpu.reciprocal %232 {approx = true} : vector<2x8x1xf32> -> vector<2x8x1xf32>
    %234 = vector.broadcast %233 : vector<2x8x1xf32> to vector<2x8x8xf32>
    %235 = arith.mulf %230, %234 : vector<2x8x8xf32>
    %236 = vector.shape_cast %235 : vector<2x8x8xf32> to vector<16x8xf32>
    %237 = vector.extract_strided_slice %160 {offsets = [16, 0], sizes = [8, 32], strides = [1, 1]} : vector<32x32xf32> to vector<8x32xf32>
    %cst_94 = arith.constant dense<0.000000e+00> : vector<16x32xf32>
    %238 = tpu.matmul %236, %237, %cst_94 {dimension_numbers = #tpu.dot_dimension_numbers<[1], [0], [0], [1], [0, 0, 1, 1], [], []>} : vector<16x8xf32>, vector<8x32xf32>, vector<16x32xf32> -> vector<16x32xf32>
    %239 = arith.addf %220, %238 : vector<16x32xf32>
    %240 = vector.extract_strided_slice %179 {offsets = [0, 0, 24], sizes = [2, 8, 8], strides = [1, 1, 1]} : vector<2x8x32xf32> to vector<2x8x8xf32>
    %241 = vector.extract_strided_slice %180 {offsets = [0, 0, 24], sizes = [2, 8, 8], strides = [1, 1, 1]} : vector<2x8x32xf32> to vector<2x8x8xf32>
    %242 = vector.extract_strided_slice %181 {offsets = [0, 0, 24], sizes = [2, 8, 8], strides = [1, 1, 1]} : vector<2x8x32xf32> to vector<2x8x8xf32>
    "tpu.trace_start"() <{level = 10 : i32, message = "bqd,bkd->bqk"}> : () -> ()
    %cst_95 = arith.constant dense<0.000000e+00> : vector<2x8x8xf32>
    %243 = tpu.matmul %240, %241, %cst_95 {dimension_numbers = #tpu.dot_dimension_numbers<[2], [2], [1], [1], [0, 0, 0, 1, 1, 1], [0], [0]>} : vector<2x8x8xf32>, vector<2x8x8xf32>, vector<2x8x8xf32> -> vector<2x8x8xf32>
    "tpu.trace_stop"() : () -> ()
    %cst_96 = arith.constant dense<0xFF800000> : vector<2x8xf32>
    %244 = vector.multi_reduction <maximumf>, %243, %cst_96 [2] : vector<2x8x8xf32> to vector<2x8xf32>
    %245 = vector.shape_cast %244 : vector<2x8xf32> to vector<2x8x1xf32>
    %246 = vector.broadcast %245 : vector<2x8x1xf32> to vector<2x8x8xf32>
    %247 = arith.subf %243, %246 : vector<2x8x8xf32>
    %248 = math.exp %247 : vector<2x8x8xf32>
    "tpu.trace_start"() <{level = 10 : i32, message = "bqk,bkd->bqd"}> : () -> ()
    %cst_97 = arith.constant dense<0.000000e+00> : vector<2x8x8xf32>
    %249 = tpu.matmul %248, %242, %cst_97 {dimension_numbers = #tpu.dot_dimension_numbers<[2], [1], [1], [2], [0, 0, 0, 1, 1, 2], [0], [0]>} : vector<2x8x8xf32>, vector<2x8x8xf32>, vector<2x8x8xf32> -> vector<2x8x8xf32>
    "tpu.trace_stop"() : () -> ()
    %cst_98 = arith.constant dense<0.000000e+00> : vector<2x8xf32>
    %250 = vector.multi_reduction <add>, %248, %cst_98 [2] : vector<2x8x8xf32> to vector<2x8xf32>
    %251 = vector.shape_cast %250 : vector<2x8xf32> to vector<2x8x1xf32>
    %252 = tpu.reciprocal %251 {approx = true} : vector<2x8x1xf32> -> vector<2x8x1xf32>
    %253 = vector.broadcast %252 : vector<2x8x1xf32> to vector<2x8x8xf32>
    %254 = arith.mulf %249, %253 : vector<2x8x8xf32>
    %255 = vector.shape_cast %254 : vector<2x8x8xf32> to vector<16x8xf32>
    %256 = vector.extract_strided_slice %160 {offsets = [24, 0], sizes = [8, 32], strides = [1, 1]} : vector<32x32xf32> to vector<8x32xf32>
    %cst_99 = arith.constant dense<0.000000e+00> : vector<16x32xf32>
    %257 = tpu.matmul %255, %256, %cst_99 {dimension_numbers = #tpu.dot_dimension_numbers<[1], [0], [0], [1], [0, 0, 1, 1], [], []>} : vector<16x8xf32>, vector<8x32xf32>, vector<16x32xf32> -> vector<16x32xf32>
    %258 = arith.addf %239, %257 : vector<16x32xf32>
    %259 = vector.broadcast %162 : vector<1x32xf32> to vector<16x32xf32>
    %260 = arith.addf %258, %259 : vector<16x32xf32>
    %261 = arith.addf %260, %154 : vector<16x32xf32>
    %cst_100 = arith.constant dense<0.000000e+00> : vector<16xf32>
    %262 = vector.multi_reduction <add>, %261, %cst_100 [1] : vector<16x32xf32> to vector<16xf32>
    %263 = vector.shape_cast %262 : vector<16xf32> to vector<16x1xf32>
    %cst_101 = arith.constant 3.200000e+01 : f32
    %264 = vector.broadcast %cst_101 : f32 to vector<16x1xf32>
    %265 = arith.divf %263, %264 : vector<16x1xf32>
    %266 = vector.broadcast %265 : vector<16x1xf32> to vector<16x32xf32>
    %267 = arith.subf %261, %266 : vector<16x32xf32>
    %268 = arith.mulf %267, %267 : vector<16x32xf32>
    %cst_102 = arith.constant dense<0.000000e+00> : vector<16xf32>
    %269 = vector.multi_reduction <add>, %268, %cst_102 [1] : vector<16x32xf32> to vector<16xf32>
    %270 = vector.shape_cast %269 : vector<16xf32> to vector<16x1xf32>
    %cst_103 = arith.constant 3.200000e+01 : f32
    %271 = vector.broadcast %cst_103 : f32 to vector<16x1xf32>
    %272 = arith.divf %270, %271 : vector<16x1xf32>
    %273 = vector.broadcast %265 : vector<16x1xf32> to vector<16x32xf32>
    %274 = arith.subf %261, %273 : vector<16x32xf32>
    %cst_104 = arith.constant 9.99999974E-6 : f32
    %275 = vector.broadcast %cst_104 : f32 to vector<16x1xf32>
    %276 = arith.addf %272, %275 : vector<16x1xf32>
    %277 = math.rsqrt %276 : vector<16x1xf32>
    %278 = vector.broadcast %277 : vector<16x1xf32> to vector<16x32xf32>
    %279 = arith.mulf %274, %278 : vector<16x32xf32>
    %280 = vector.broadcast %164 : vector<1x32xf32> to vector<16x32xf32>
    %281 = arith.mulf %279, %280 : vector<16x32xf32>
    %282 = vector.broadcast %166 : vector<1x32xf32> to vector<16x32xf32>
    %283 = arith.addf %281, %282 : vector<16x32xf32>
    %284 = arith.addf %154, %283 : vector<16x32xf32>
    %c0_105 = arith.constant 0 : index
    %c0_106 = arith.constant 0 : index
    %c0_107 = arith.constant 0 : index
    %285 = vector.load %arg18[%c0_105, %c0_106, %c0_107] : memref<1x1x32xf32, #tpu.memory_space<vmem>>, vector<1x1x32xf32>
    %286 = vector.shape_cast %285 : vector<1x1x32xf32> to vector<1x32xf32>
    %c0_108 = arith.constant 0 : index
    %c0_109 = arith.constant 0 : index
    %c0_110 = arith.constant 0 : index
    %287 = vector.load %arg19[%c0_108, %c0_109, %c0_110] : memref<1x1x32xf32, #tpu.memory_space<vmem>>, vector<1x1x32xf32>
    %288 = vector.shape_cast %287 : vector<1x1x32xf32> to vector<1x32xf32>
    %cst_111 = arith.constant dense<0.000000e+00> : vector<16xf32>
    %289 = vector.multi_reduction <add>, %284, %cst_111 [1] : vector<16x32xf32> to vector<16xf32>
    %290 = vector.shape_cast %289 : vector<16xf32> to vector<16x1xf32>
    %cst_112 = arith.constant 3.200000e+01 : f32
    %291 = vector.broadcast %cst_112 : f32 to vector<16x1xf32>
    %292 = arith.divf %290, %291 : vector<16x1xf32>
    %293 = vector.broadcast %292 : vector<16x1xf32> to vector<16x32xf32>
    %294 = arith.subf %284, %293 : vector<16x32xf32>
    %295 = arith.mulf %294, %294 : vector<16x32xf32>
    %cst_113 = arith.constant dense<0.000000e+00> : vector<16xf32>
    %296 = vector.multi_reduction <add>, %295, %cst_113 [1] : vector<16x32xf32> to vector<16xf32>
    %297 = vector.shape_cast %296 : vector<16xf32> to vector<16x1xf32>
    %cst_114 = arith.constant 3.200000e+01 : f32
    %298 = vector.broadcast %cst_114 : f32 to vector<16x1xf32>
    %299 = arith.divf %297, %298 : vector<16x1xf32>
    %300 = vector.broadcast %292 : vector<16x1xf32> to vector<16x32xf32>
    %301 = arith.subf %284, %300 : vector<16x32xf32>
    %cst_115 = arith.constant 9.99999974E-6 : f32
    %302 = vector.broadcast %cst_115 : f32 to vector<16x1xf32>
    %303 = arith.addf %299, %302 : vector<16x1xf32>
    %304 = math.rsqrt %303 : vector<16x1xf32>
    %305 = vector.broadcast %304 : vector<16x1xf32> to vector<16x32xf32>
    %306 = arith.mulf %301, %305 : vector<16x32xf32>
    %307 = vector.broadcast %286 : vector<1x32xf32> to vector<16x32xf32>
    %308 = arith.mulf %306, %307 : vector<16x32xf32>
    %309 = vector.broadcast %288 : vector<1x32xf32> to vector<16x32xf32>
    %310 = arith.addf %308, %309 : vector<16x32xf32>
    %c0_116 = arith.constant 0 : index
    %c0_117 = arith.constant 0 : index
    %c0_118 = arith.constant 0 : index
    %311 = vector.load %arg20[%c0_116, %c0_117, %c0_118] : memref<1x32x64xf32, #tpu.memory_space<vmem>>, vector<1x32x64xf32>
    %312 = vector.shape_cast %311 : vector<1x32x64xf32> to vector<32x64xf32>
    %c0_119 = arith.constant 0 : index
    %c0_120 = arith.constant 0 : index
    %c0_121 = arith.constant 0 : index
    %313 = vector.load %arg21[%c0_119, %c0_120, %c0_121] : memref<1x1x64xf32, #tpu.memory_space<vmem>>, vector<1x1x64xf32>
    %314 = vector.shape_cast %313 : vector<1x1x64xf32> to vector<1x64xf32>
    %c0_122 = arith.constant 0 : index
    %c0_123 = arith.constant 0 : index
    %c0_124 = arith.constant 0 : index
    %315 = vector.load %arg22[%c0_122, %c0_123, %c0_124] : memref<1x64x32xf32, #tpu.memory_space<vmem>>, vector<1x64x32xf32>
    %316 = vector.shape_cast %315 : vector<1x64x32xf32> to vector<64x32xf32>
    %c0_125 = arith.constant 0 : index
    %c0_126 = arith.constant 0 : index
    %c0_127 = arith.constant 0 : index
    %317 = vector.load %arg23[%c0_125, %c0_126, %c0_127] : memref<1x1x32xf32, #tpu.memory_space<vmem>>, vector<1x1x32xf32>
    %318 = vector.shape_cast %317 : vector<1x1x32xf32> to vector<1x32xf32>
    %c0_128 = arith.constant 0 : index
    %c0_129 = arith.constant 0 : index
    %c0_130 = arith.constant 0 : index
    %319 = vector.load %arg24[%c0_128, %c0_129, %c0_130] : memref<1x1x32xf32, #tpu.memory_space<vmem>>, vector<1x1x32xf32>
    %320 = vector.shape_cast %319 : vector<1x1x32xf32> to vector<1x32xf32>
    %c0_131 = arith.constant 0 : index
    %c0_132 = arith.constant 0 : index
    %c0_133 = arith.constant 0 : index
    %321 = vector.load %arg25[%c0_131, %c0_132, %c0_133] : memref<1x1x32xf32, #tpu.memory_space<vmem>>, vector<1x1x32xf32>
    %322 = vector.shape_cast %321 : vector<1x1x32xf32> to vector<1x32xf32>
    %cst_134 = arith.constant dense<0.000000e+00> : vector<16x64xf32>
    %323 = tpu.matmul %310, %312, %cst_134 {dimension_numbers = #tpu.dot_dimension_numbers<[1], [0], [0], [1], [0, 0, 1, 1], [], []>} : vector<16x32xf32>, vector<32x64xf32>, vector<16x64xf32> -> vector<16x64xf32>
    %324 = vector.broadcast %314 : vector<1x64xf32> to vector<16x64xf32>
    %325 = arith.addf %323, %324 : vector<16x64xf32>
    %cst_135 = arith.constant 5.000000e-01 : f32
    %326 = vector.broadcast %cst_135 : f32 to vector<16x64xf32>
    %327 = arith.mulf %326, %325 : vector<16x64xf32>
    %cst_136 = arith.constant 4.471500e-02 : f32
    %328 = vector.broadcast %cst_136 : f32 to vector<16x64xf32>
    %329 = arith.mulf %328, %325 : vector<16x64xf32>
    %330 = arith.mulf %329, %325 : vector<16x64xf32>
    %331 = arith.mulf %330, %325 : vector<16x64xf32>
    %332 = arith.addf %325, %331 : vector<16x64xf32>
    %cst_137 = arith.constant 0.797884583 : f32
    %333 = vector.broadcast %cst_137 : f32 to vector<16x64xf32>
    %334 = arith.mulf %333, %332 : vector<16x64xf32>
    %335 = math.tanh %334 : vector<16x64xf32>
    %cst_138 = arith.constant 1.000000e+00 : f32
    %336 = vector.broadcast %cst_138 : f32 to vector<16x64xf32>
    %337 = arith.addf %336, %335 : vector<16x64xf32>
    %338 = arith.mulf %327, %337 : vector<16x64xf32>
    %cst_139 = arith.constant dense<0.000000e+00> : vector<16x32xf32>
    %339 = tpu.matmul %338, %316, %cst_139 {dimension_numbers = #tpu.dot_dimension_numbers<[1], [0], [0], [1], [0, 0, 1, 1], [], []>} : vector<16x64xf32>, vector<64x32xf32>, vector<16x32xf32> -> vector<16x32xf32>
    %340 = vector.broadcast %318 : vector<1x32xf32> to vector<16x32xf32>
    %341 = arith.addf %339, %340 : vector<16x32xf32>
    %342 = arith.addf %341, %310 : vector<16x32xf32>
    %cst_140 = arith.constant dense<0.000000e+00> : vector<16xf32>
    %343 = vector.multi_reduction <add>, %342, %cst_140 [1] : vector<16x32xf32> to vector<16xf32>
    %344 = vector.shape_cast %343 : vector<16xf32> to vector<16x1xf32>
    %cst_141 = arith.constant 3.200000e+01 : f32
    %345 = vector.broadcast %cst_141 : f32 to vector<16x1xf32>
    %346 = arith.divf %344, %345 : vector<16x1xf32>
    %347 = vector.broadcast %346 : vector<16x1xf32> to vector<16x32xf32>
    %348 = arith.subf %342, %347 : vector<16x32xf32>
    %349 = arith.mulf %348, %348 : vector<16x32xf32>
    %cst_142 = arith.constant dense<0.000000e+00> : vector<16xf32>
    %350 = vector.multi_reduction <add>, %349, %cst_142 [1] : vector<16x32xf32> to vector<16xf32>
    %351 = vector.shape_cast %350 : vector<16xf32> to vector<16x1xf32>
    %cst_143 = arith.constant 3.200000e+01 : f32
    %352 = vector.broadcast %cst_143 : f32 to vector<16x1xf32>
    %353 = arith.divf %351, %352 : vector<16x1xf32>
    %354 = vector.broadcast %346 : vector<16x1xf32> to vector<16x32xf32>
    %355 = arith.subf %342, %354 : vector<16x32xf32>
    %cst_144 = arith.constant 9.99999974E-6 : f32
    %356 = vector.broadcast %cst_144 : f32 to vector<16x1xf32>
    %357 = arith.addf %353, %356 : vector<16x1xf32>
    %358 = math.rsqrt %357 : vector<16x1xf32>
    %359 = vector.broadcast %358 : vector<16x1xf32> to vector<16x32xf32>
    %360 = arith.mulf %355, %359 : vector<16x32xf32>
    %361 = vector.broadcast %320 : vector<1x32xf32> to vector<16x32xf32>
    %362 = arith.mulf %360, %361 : vector<16x32xf32>
    %363 = vector.broadcast %322 : vector<1x32xf32> to vector<16x32xf32>
    %364 = arith.addf %362, %363 : vector<16x32xf32>
    %365 = arith.addf %310, %364 : vector<16x32xf32>
    %c0_145 = arith.constant 0 : index
    %c0_146 = arith.constant 0 : index
    %c0_147 = arith.constant 0 : index
    %366 = vector.load %arg26[%c0_145, %c0_146, %c0_147] : memref<1x1x32xf32, #tpu.memory_space<vmem>>, vector<1x1x32xf32>
    %367 = vector.shape_cast %366 : vector<1x1x32xf32> to vector<1x32xf32>
    %c0_148 = arith.constant 0 : index
    %c0_149 = arith.constant 0 : index
    %c0_150 = arith.constant 0 : index
    %368 = vector.load %arg27[%c0_148, %c0_149, %c0_150] : memref<1x1x32xf32, #tpu.memory_space<vmem>>, vector<1x1x32xf32>
    %369 = vector.shape_cast %368 : vector<1x1x32xf32> to vector<1x32xf32>
    %cst_151 = arith.constant dense<0.000000e+00> : vector<16xf32>
    %370 = vector.multi_reduction <add>, %365, %cst_151 [1] : vector<16x32xf32> to vector<16xf32>
    %371 = vector.shape_cast %370 : vector<16xf32> to vector<16x1xf32>
    %cst_152 = arith.constant 3.200000e+01 : f32
    %372 = vector.broadcast %cst_152 : f32 to vector<16x1xf32>
    %373 = arith.divf %371, %372 : vector<16x1xf32>
    %374 = vector.broadcast %373 : vector<16x1xf32> to vector<16x32xf32>
    %375 = arith.subf %365, %374 : vector<16x32xf32>
    %376 = arith.mulf %375, %375 : vector<16x32xf32>
    %cst_153 = arith.constant dense<0.000000e+00> : vector<16xf32>
    %377 = vector.multi_reduction <add>, %376, %cst_153 [1] : vector<16x32xf32> to vector<16xf32>
    %378 = vector.shape_cast %377 : vector<16xf32> to vector<16x1xf32>
    %cst_154 = arith.constant 3.200000e+01 : f32
    %379 = vector.broadcast %cst_154 : f32 to vector<16x1xf32>
    %380 = arith.divf %378, %379 : vector<16x1xf32>
    %381 = vector.broadcast %373 : vector<16x1xf32> to vector<16x32xf32>
    %382 = arith.subf %365, %381 : vector<16x32xf32>
    %cst_155 = arith.constant 9.99999974E-6 : f32
    %383 = vector.broadcast %cst_155 : f32 to vector<16x1xf32>
    %384 = arith.addf %380, %383 : vector<16x1xf32>
    %385 = math.rsqrt %384 : vector<16x1xf32>
    %386 = vector.broadcast %385 : vector<16x1xf32> to vector<16x32xf32>
    %387 = arith.mulf %382, %386 : vector<16x32xf32>
    %388 = vector.broadcast %367 : vector<1x32xf32> to vector<16x32xf32>
    %389 = arith.mulf %387, %388 : vector<16x32xf32>
    %390 = vector.broadcast %369 : vector<1x32xf32> to vector<16x32xf32>
    %391 = arith.addf %389, %390 : vector<16x32xf32>
    %c0_156 = arith.constant 0 : index
    %c0_157 = arith.constant 0 : index
    %392 = vector.load %arg28[%c0_156, %c0_157] : memref<16x32xf32, #tpu.memory_space<vmem>>, vector<16x32xf32>
    tpu.vector_store %arg28[%c0_156, %c0_157], %391 {strides = array<i32>} : memref<16x32xf32, #tpu.memory_space<vmem>>, vector<16x32xf32>,
    return
  }
  func.func @transform_0(%arg0: i32, %arg1: i32) -> (i32, i32) {
    %c0_i32 = arith.constant 0 : i32
    %c0_i32_0 = arith.constant 0 : i32
    return %arg0, %c0_i32 : i32, i32
  }
  func.func @transform_1(%arg0: i32, %arg1: i32) -> (i32, i32) {
    %c0_i32 = arith.constant 0 : i32
    %c0_i32_0 = arith.constant 0 : i32
    return %arg0, %c0_i32 : i32, i32
  }
  func.func @transform_2(%arg0: i32, %arg1: i32) -> (i32, i32, i32) {
    %c0_i32 = arith.constant 0 : i32
    %c0_i32_0 = arith.constant 0 : i32
    %c0_i32_1 = arith.constant 0 : i32
    return %arg1, %c0_i32, %c0_i32_0 : i32, i32, i32
  }
  func.func @transform_3(%arg0: i32, %arg1: i32) -> (i32, i32, i32) {
    %c0_i32 = arith.constant 0 : i32
    %c0_i32_0 = arith.constant 0 : i32
    %c0_i32_1 = arith.constant 0 : i32
    return %arg1, %c0_i32, %c0_i32_0 : i32, i32, i32
  }
  func.func @transform_4(%arg0: i32, %arg1: i32) -> (i32, i32, i32) {
    %c0_i32 = arith.constant 0 : i32
    %c0_i32_0 = arith.constant 0 : i32
    %c0_i32_1 = arith.constant 0 : i32
    return %arg1, %c0_i32, %c0_i32_0 : i32, i32, i32
  }
  func.func @transform_5(%arg0: i32, %arg1: i32) -> (i32, i32, i32) {
    %c0_i32 = arith.constant 0 : i32
    %c0_i32_0 = arith.constant 0 : i32
    %c0_i32_1 = arith.constant 0 : i32
    return %arg1, %c0_i32, %c0_i32_0 : i32, i32, i32
  }
  func.func @transform_6(%arg0: i32, %arg1: i32) -> (i32, i32, i32) {
    %c0_i32 = arith.constant 0 : i32
    %c0_i32_0 = arith.constant 0 : i32
    %c0_i32_1 = arith.constant 0 : i32
    return %arg1, %c0_i32, %c0_i32_0 : i32, i32, i32
  }
  func.func @transform_7(%arg0: i32, %arg1: i32) -> (i32, i32, i32) {
    %c0_i32 = arith.constant 0 : i32
    %c0_i32_0 = arith.constant 0 : i32
    %c0_i32_1 = arith.constant 0 : i32
    return %arg1, %c0_i32, %c0_i32_0 : i32, i32, i32
  }
  func.func @transform_8(%arg0: i32, %arg1: i32) -> (i32, i32, i32) {
    %c0_i32 = arith.constant 0 : i32
    %c0_i32_0 = arith.constant 0 : i32
    %c0_i32_1 = arith.constant 0 : i32
    return %arg1, %c0_i32, %c0_i32_0 : i32, i32, i32
  }
  func.func @transform_9(%arg0: i32, %arg1: i32) -> (i32, i32, i32) {
    %c0_i32 = arith.constant 0 : i32
    %c0_i32_0 = arith.constant 0 : i32
    %c0_i32_1 = arith.constant 0 : i32
    return %arg1, %c0_i32, %c0_i32_0 : i32, i32, i32
  }
  func.func @transform_10(%arg0: i32, %arg1: i32) -> (i32, i32, i32) {
    %c0_i32 = arith.constant 0 : i32
    %c0_i32_0 = arith.constant 0 : i32
    %c0_i32_1 = arith.constant 0 : i32
    return %arg1, %c0_i32, %c0_i32_0 : i32, i32, i32
  }
  func.func @transform_11(%arg0: i32, %arg1: i32) -> (i32, i32, i32) {
    %c0_i32 = arith.constant 0 : i32
    %c0_i32_0 = arith.constant 0 : i32
    %c0_i32_1 = arith.constant 0 : i32
    return %arg1, %c0_i32, %c0_i32_0 : i32, i32, i32
  }
  func.func @transform_12(%arg0: i32, %arg1: i32) -> (i32, i32, i32) {
    %c0_i32 = arith.constant 0 : i32
    %c0_i32_0 = arith.constant 0 : i32
    %c0_i32_1 = arith.constant 0 : i32
    return %arg1, %c0_i32, %c0_i32_0 : i32, i32, i32
  }
  func.func @transform_13(%arg0: i32, %arg1: i32) -> (i32, i32, i32) {
    %c0_i32 = arith.constant 0 : i32
    %c0_i32_0 = arith.constant 0 : i32
    %c0_i32_1 = arith.constant 0 : i32
    return %arg1, %c0_i32, %c0_i32_0 : i32, i32, i32
  }
  func.func @transform_14(%arg0: i32, %arg1: i32) -> (i32, i32, i32) {
    %c0_i32 = arith.constant 0 : i32
    %c0_i32_0 = arith.constant 0 : i32
    %c0_i32_1 = arith.constant 0 : i32
    return %arg1, %c0_i32, %c0_i32_0 : i32, i32, i32
  }
  func.func @transform_15(%arg0: i32, %arg1: i32) -> (i32, i32, i32) {
    %c0_i32 = arith.constant 0 : i32
    %c0_i32_0 = arith.constant 0 : i32
    %c0_i32_1 = arith.constant 0 : i32
    return %arg1, %c0_i32, %c0_i32_0 : i32, i32, i32
  }
  func.func @transform_16(%arg0: i32, %arg1: i32) -> (i32, i32, i32) {
    %c0_i32 = arith.constant 0 : i32
    %c0_i32_0 = arith.constant 0 : i32
    %c0_i32_1 = arith.constant 0 : i32
    return %arg1, %c0_i32, %c0_i32_0 : i32, i32, i32
  }
  func.func @transform_17(%arg0: i32, %arg1: i32) -> (i32, i32, i32) {
    %c0_i32 = arith.constant 0 : i32
    %c0_i32_0 = arith.constant 0 : i32
    %c0_i32_1 = arith.constant 0 : i32
    return %arg1, %c0_i32, %c0_i32_0 : i32, i32, i32
  }
  func.func @transform_18(%arg0: i32, %arg1: i32) -> (i32, i32, i32) {
    %c0_i32 = arith.constant 0 : i32
    %c0_i32_0 = arith.constant 0 : i32
    %c0_i32_1 = arith.constant 0 : i32
    return %arg1, %c0_i32, %c0_i32_0 : i32, i32, i32
  }
  func.func @transform_19(%arg0: i32, %arg1: i32) -> (i32, i32, i32) {
    %c0_i32 = arith.constant 0 : i32
    %c0_i32_0 = arith.constant 0 : i32
    %c0_i32_1 = arith.constant 0 : i32
    return %arg1, %c0_i32, %c0_i32_0 : i32, i32, i32
  }
  func.func @transform_20(%arg0: i32, %arg1: i32) -> (i32, i32, i32) {
    %c0_i32 = arith.constant 0 : i32
    %c0_i32_0 = arith.constant 0 : i32
    %c0_i32_1 = arith.constant 0 : i32
    return %arg1, %c0_i32, %c0_i32_0 : i32, i32, i32
  }
  func.func @transform_21(%arg0: i32, %arg1: i32) -> (i32, i32, i32) {
    %c0_i32 = arith.constant 0 : i32
    %c0_i32_0 = arith.constant 0 : i32
    %c0_i32_1 = arith.constant 0 : i32
    return %arg1, %c0_i32, %c0_i32_0 : i32, i32, i32
  }
  func.func @transform_22(%arg0: i32, %arg1: i32) -> (i32, i32, i32) {
    %c0_i32 = arith.constant 0 : i32
    %c0_i32_0 = arith.constant 0 : i32
    %c0_i32_1 = arith.constant 0 : i32
    return %arg1, %c0_i32, %c0_i32_0 : i32, i32, i32
  }
  func.func @transform_23(%arg0: i32, %arg1: i32) -> (i32, i32, i32) {
    %c0_i32 = arith.constant 0 : i32
    %c0_i32_0 = arith.constant 0 : i32
    %c0_i32_1 = arith.constant 0 : i32
    return %arg1, %c0_i32, %c0_i32_0 : i32, i32, i32
  }
  func.func @transform_24(%arg0: i32, %arg1: i32) -> (i32, i32, i32) {
    %c0_i32 = arith.constant 0 : i32
    %c0_i32_0 = arith.constant 0 : i32
    %c0_i32_1 = arith.constant 0 : i32
    return %arg1, %c0_i32, %c0_i32_0 : i32, i32, i32
  }
  func.func @transform_25(%arg0: i32, %arg1: i32) -> (i32, i32, i32) {
    %c0_i32 = arith.constant 0 : i32
    %c0_i32_0 = arith.constant 0 : i32
    %c0_i32_1 = arith.constant 0 : i32
    return %arg1, %c0_i32, %c0_i32_0 : i32, i32, i32
  }
  func.func @transform_26(%arg0: i32, %arg1: i32) -> (i32, i32) {
    %c0_i32 = arith.constant 0 : i32
    %c0_i32_0 = arith.constant 0 : i32
    return %arg0, %c0_i32 : i32, i32
  }
}

</mosaic_0001>

<bundles_post_ra>
// kernel: transformer_forward.2
= control target key start
LH: loop header
LB: loop body
LE: loop exit
PB: predicated region body
PF: predicated region fallthrough
CT: control target
= control target key end

     0   :  { %s3724_s24 = smov 0   ;;  %s3726_s25 = smov 0   ;;  %s4106_s0 = inlined_call_operand.vmem [shape: f32[16,32], index: 0, kind: input, shape index: {}]   ;;  %s4107_s1 = inlined_call_operand.vmem [shape: f32[2,32,96], index: 1, kind: input, shape index: {}]   ;;  %s4108_s2 = inlined_call_operand.vmem [shape: f32[2,1,96], index: 2, kind: input, shape index: {}]   ;;  %s4109_s3 = inlined_call_operand.vmem [shape: f32[2,32,32], index: 3, kind: input, shape index: {}]   ;;  %s4110_s4 = inlined_call_operand.vmem [shape: f32[2,1,32], index: 4, kind: input, shape index: {}]   ;;  %s4111_s5 = inlined_call_operand.vmem [shape: f32[2,1,32], index: 5, kind: input, shape index: {}]   ;;  %s4112_s6 = inlined_call_operand.vmem [shape: f32[2,1,32], index: 6, kind: input, shape index: {}]   ;;  %s4113_s7 = inlined_call_operand.vmem [shape: f32[2,1,32], index: 7, kind: input, shape index: {}]   ;;  %s4114_s8 = inlined_call_operand.vmem [shape: f32[2,1,32], index: 8, kind: input, shape index: {}]   ;;  %s4115_s9 = inlined_call_operand.vmem [shape: f32[2,32,64], index: 9, kind: input, shape index: {}]   ;;  %s4116_s10 = inlined_call_operand.vmem [shape: f32[2,1,64], index: 10, kind: input, shape index: {}]   ;;  %s4117_s11 = inlined_call_operand.vmem [shape: f32[2,64,32], index: 11, kind: input, shape index: {}]   ;;  %s4118_s12 = inlined_call_operand.vmem [shape: f32[2,1,32], index: 12, kind: input, shape index: {}]   ;;  %s4119_s13 = inlined_call_operand.vmem [shape: f32[2,1,32], index: 13, kind: input, shape index: {}]   ;;  %s4120_s14 = inlined_call_operand.vmem [shape: f32[2,1,32], index: 14, kind: input, shape index: {}]   ;;  %s4121_s15 = inlined_call_operand.vmem [shape: f32[2,1,32], index: 15, kind: input, shape index: {}]   ;;  %s4122_s16 = inlined_call_operand.vmem [shape: f32[2,1,32], index: 16, kind: input, shape index: {}]   ;;  %s4123_s17 = inlined_call_operand.vmem [shape: f32[16,32], index: 17, kind: output, shape index: {}]  }
   0x1   :  { %4131 = sst [smem:[#allocation7_spill]] %s4106_s0  ;;  %s3728_s26 = smov 0  }
   0x2   :  { %4132 = sst [smem:[#allocation8_spill]] %s4107_s1 }
   0x3   :  { %4133 = sst [smem:[#allocation9_spill]] %s4108_s2 }
   0x4   :  { %4134 = sst [smem:[#allocation10_spill]] %s4109_s3 }
   0x5   :  { %4135 = sst [smem:[#allocation11_spill]] %s4115_s9 }
   0x6   :  { %4136 = sst [smem:[#allocation12_spill]] %s4117_s11 }
   0x7   :  { %4137 = sst [smem:[#allocation13_spill]] %s4121_s15 }
   0x8   :  { %4138 = sst [smem:[#allocation14_spill]] %s4122_s16 }
   0x9   :  { %4139 = sst [smem:[#allocation15_spill]] %s4123_s17 }
   0xa LB: > { %4140 = sst [smem:[#allocation2_spill]] %s3611_s24  ;;  %s36_s27 = sadd.s32 1, %s3615_s25  ;;  %s3619_s26 = sphi %s3728_s26, %s27_s26   ;;  %s3615_s25 = sphi %s3726_s25, %s4170_s25   ;;  %s3611_s24 = sphi %s3724_s24, %s4169_s24  }
   0xb   : > { %4141 = sst [smem:[#allocation3_spill]] %s3615_s25  ;;  %p3195_p0 = scmp.ge.s32.totalorder %s3619_s26, 1 }
   0xc   : > { %4142 = sst [smem:[#allocation4_spill]] %s3619_s26  ;;  %p37_p1 = scmp.ge.s32.totalorder %s36_s27, 2 }
   0xd   : > { %p636_p2 = scmp.lt.s32.totalorder %s3619_s26, 3 }
   0xe   : > { %s4172_s27 = smov (%p37_p1, %s36_s27), 0 }
   0xf   : > { %4143 = sst [smem:[#allocation5_spill]] %s4172_s27  ;;  %p637_p3 = pnand %p3195_p0, %p636_p2 }
  0x11   : > { %640 = sbr.rel (%p637_p3) target bundleno = 4254 (0x109e), region = 88 }
  0x18   : > { %p750_p4 = scmp.lt.s32.totalorder %s3611_s24, 1  ;;  %s4145_s20 = sld [smem:[#allocation8_spill]] }
  0x19   : > { %s4146_s3 = sld [smem:[#allocation10_spill]]  ;;  %s4148_s9 = sld [smem:[#allocation11_spill]] }
  0x1a   : > { %s3746_s28 = scalar_select %p750_p4, %s3611_s24, 1 }
  0x1b   : > { %s4149_s11 = sld [smem:[#allocation12_spill]]  ;;  %s4150_s24 = sld [smem:[#allocation13_spill]] }
  0x1c   : > { %s3259_s29 = sshll.u32 %s3746_s28, 5  ;;  %s3262_s0 = sshll.u32 %s3746_s28, 6 }
  0x1e   : > { %s754_s21 = scalar_lea.vmem %s4145_s20, %s3259_s29  ;;  %s799_s20 = scalar_lea.vmem %s4120_s14, %s3746_s28 }
  0x1f   : > { %s3759_s27 = scalar_lea.vmem %s4146_s3, %s3259_s29  ;;  %s3784_s25 = scalar_lea.vmem %s4148_s9, %s3259_s29 }
  0x20   : > { %4147 = sst [smem:[#allocation6_spill]] %s3759_s27  ;;  %s796_s3 = scalar_lea.vmem %s4119_s13, %s3746_s28 }
  0x21   : > { %s3794_s2 = scalar_lea.vmem %s4149_s11, %s3262_s0  ;;  %s802_s17 = scalar_lea.vmem %s4150_s24, %s3746_s28 }
  0x22   : > { %s4151_s0 = sld [smem:[#allocation14_spill]]  ;;  %s4152_s11 = sld [smem:[#allocation2_spill]] }
  0x28   : > { %s805_s30 = scalar_lea.vmem %s4151_s0, %s3746_s28  ;;  %p3204_p5 = scmp.ne.s32.totalorder %s4152_s11, 0 }
  0x29   : > { %s4153_s15 = sld [smem:[#allocation7_spill]] (!%p3204_p5)  ;;  %vm818_vm0 = vcmask (!%p3204_p5), 261120  }
  0x2a   : > { %815 = sbr.rel (%p3204_p5) target bundleno = 49 (0x31), region = 92  ;;  %s4154_s26 = sld [smem:[#allocation15_spill]] (!%p3204_p5) }
  0x2f   : > { %v816_v0 = vld [vmem:[%s4153_s15] sm:$0xff] (!%p3204_p5)  ;;  %v817_v1 = vld [vmem:[%s4153_s15 + $0x8] sm:$0xff] (!%p3204_p5) }
  0x30   : > { %819 = vst.msk [vmem:[%s4154_s26] sm:$0xff] (!%p3204_p5), %vm818_vm0, %v816_v0  ;;  %820 = vst.msk [vmem:[%s4154_s26 + $0x8] sm:$0xff] (!%p3204_p5), %vm818_vm0, %v817_v1 }
  0x31 PF: > { %v823_v2 = vld [vmem:[%s754_s21] sm:$0xff]  ;;  %v824_v3 = vld [vmem:[%s754_s21 + $0x8] sm:$0xff]  ;;  %v825_v4 = vld [vmem:[%s754_s21 + $0x10] sm:$0xff]  ;;  %vm841_vm1 = vcmask 261120   ;;  %s4155_s18 = sld [smem:[#allocation15_spill]]  ;;  %v3621_v10 = vmov 0.0  }
  0x32   : > { %v3470_v5 = vpack.c.bf16 %v824_v3, %v823_v2  ;;  %v826_v6 = vld [vmem:[%s754_s21 + $0x18] sm:$0xff]  ;;  %3350 = vmatprep.subr.mxu0 %v3621_v10  ;;  %vm3622_vm2 = vmmov 0   ;;  %s4156_s23 = sld [smem:[#allocation9_spill]]  ;;  %s3623_s27 = smov 96   ;;  %vm926_vm3 = vcmask 64512   ;;  %vm2796_vm4 = vcmask 523264  }
  0x33   : > { %v3474_v8 = vpack.c.bf16 %v826_v6, %v825_v4  ;;  %3352 = vmatprep.mubr.msk.f32.mxu0 %vm3622_vm2, %v3621_v10  ;;  %s3624_s29 = smov 88   ;;  %s3625_s26 = smov 120  }
  0x34   : > { %3471 = vmatprep.subr.bf16.mxu1 %v3470_v5  ;;  %s3626_s24 = smov 64   ;;  %s3627_s16 = smov 56  }
  0x35   : > { %3473 = vmatpush3.bf16.msra.mxu1 %v3470_v5  ;;  %s3628_s9 = smov 80   ;;  %s3629_s11 = smov 112  }
  0x36   : > { %3475 = vmatprep.subr.bf16.mxu1 %v3474_v8  ;;  %s4158_s0 = sld [smem:[#allocation6_spill]]  ;;  %s3630_s19 = smov 48  }
  0x37   : > { %v3832_v7 = vld [vmem:[%s4155_s18] sm:$0xff]  ;;  %v3839_v9 = vld [vmem:[%s4155_s18 + $0x8] sm:$0xff]  ;;  %s3631_s21 = smov 72   ;;  %s3632_s1 = smov 104  }
  0x38   : > { %3337 = vmatprep.mubr.msk.f32.mxu1 %vm841_vm1, %v3832_v7  ;;  %s4157_s22 = scalar_lea.vmem %s4156_s23, %s3746_s28  ;;  %s3633_s23 = smov 40  }
  0x39   : > { %3477 = vmatpush3.bf16.msra.mxu1 %v3474_v8  ;;  %v3205_v11 = vld [vmem:[%s4157_s22] ss:$0 sm:$0xff]  ;;  %s4163_s22 = scalar_lea.vmem %s4114_s8, %s3746_s28 }
  0x3a   : > { %3340 = vmatprep.subr.mxu1 %v3621_v10 }
  0x3c   : > { %3338 = vmatmul.mubr.msk.f32.vlgmr.msra.gmra.mrb[0].mxu1 %vm841_vm1, %v3839_v9  ;;  %v829_v2 = vld [vmem:[%s4158_s0 + $0x8] sm:$0xff]  ;;  %v828_v3 = vld [vmem:[%s4158_s0] sm:$0xff] }
  0x3d   : > { %3342 = vmatprep.mubr.msk.f32.mxu1 %vm3622_vm2, %v3621_v10 }
 0x10f   : > { %v3339_v12 = vpop.f32.mrb[0].mxu1 }
 0x110   : > { %v914_v13 = vpop.f32.mrb[1].mxu1  ;;  %v3857_v15 = vadd.f32 %v3339_v12, %v3205_v11 }
 0x111   : > { %v3854_v14 = vadd.f32 %v3205_v11, %v914_v13 }
 0x113   : > { %924 = vrot.lane.b32.xlu0 %v3854_v14, %s3623_s27 }
 0x117   : > { %1002 = vrot.lane.b32.xlu0 %v3857_v15, %s3623_s27 }
 0x11b   : > { %1332 = vrot.lane.b32.xlu0 %v3857_v15, %s3624_s29 }
 0x11f   : > { %1330 = vrot.lane.b32.xlu0 %v3857_v15, %s3625_s26 }
 0x185   : > { %v925_v16 = vpop.permute.xlu0 %924 }
 0x186   : > { %3341 = vmatpush3.xpose.msk.msra.mxu1 %vm926_vm3, %v925_v16 }
 0x187   : > { %3345 = vmatprep.subr.mxu1 %v3621_v10 }
 0x189   : > { %3343 = vmatmul.mubr.msk.f32.vlgmr.msra.gmra.mrb[2].mxu1 %vm926_vm3, %v3854_v14  ;;  %v1003_v17 = vpop.permute.xlu0 %1002 }
 0x18a   : > { %3346 = vmatpush3.xpose.msk.msra.mxu1 %vm926_vm3, %v1003_v17  ;;  %3347 = vmatprep.mubr.msk.f32.mxu1 %vm3622_vm2, %v3621_v10 }
 0x18b   : > { %3355 = vmatprep.subr.mxu1 %v3621_v10 }
 0x18d   : > { %3348 = vmatmul.mubr.msk.f32.vlgmr.msra.gmra.mrb[4].mxu1 %vm926_vm3, %v3857_v15  ;;  %v1333_v24 = vpop.permute.xlu0 %1332 }
 0x18e   : > { %3357 = vmatprep.mubr.msk.f32.mxu1 %vm3622_vm2, %v3621_v10 }
 0x191   : > { %v1331_v25 = vpop.permute.xlu0 %1330 }
 0x25c   : > { %v997_v18 = vpop.f32.mrb[2].mxu1 }
 0x25d   : > { %v3344_v19 = vpop.f32.mrb[3].mxu1  ;;  %v1078_v20 = vsel %vm926_vm3, %v997_v18, -inf }
 0x25e   : > { %1079 = vmax.xlane.f32.xlu0 %v1078_v20 }
 0x260   : > { %v1074_v21 = vpop.f32.mrb[4].mxu1 }
 0x261   : > { %v3349_v22 = vpop.f32.mrb[5].mxu1  ;;  %v1081_v23 = vsel %vm926_vm3, %v1074_v21, -inf }
 0x262   : > { %1082 = vmax.xlane.f32.xlu1 %v1081_v23 }
 0x273   : > { %1166 = vrot.lane.b32.xlu1 %v3857_v15, %s3626_s24 }
 0x274   : > { %1496 = vrot.lane.b32.xlu0 %v3857_v15, %s3627_s16 }
 0x277   : > { %1090 = vrot.lane.b32.xlu1 %v3854_v14, %s3626_s24 }
 0x278   : > { %1746 = vrot.lane.b32.xlu0 %v3854_v14, %s3628_s9 }
 0x27b   : > { %1254 = vrot.lane.b32.xlu1 %v3854_v14, %s3624_s29  ;;  %s4159_s29 = scalar_lea.vmem %s4110_s4, %s3746_s28 }
 0x27c   : > { %1824 = vrot.lane.b32.xlu0 %v3857_v15, %s3628_s9 }
 0x27f   : > { %1252 = vrot.lane.b32.xlu1 %v3854_v14, %s3625_s26  ;;  %s4164_s26 = scalar_lea.vmem %s4116_s10, %s3746_s28 }
 0x280   : > { %1822 = vrot.lane.b32.xlu0 %v3857_v15, %s3629_s11 }
 0x2eb   : > { %v1080_v26 = vpop.xlane.xlu0 %1079 }
 0x2ec   : > { %v1084_v27 = vsub.f32 %v997_v18, %v1080_v26 }
 0x2ee   : > { %v1086_v28 = vmul.f32 1.442695, %v1084_v27 }
 0x2ef   : > { %v1083_v29 = vpop.xlane.xlu1 %1082  ;;  %v1497_v38 = vpop.permute.xlu0 %1496 }
 0x2f0   : > { %3545 = vpow2.f32 %v1086_v28  ;;  %v1085_v30 = vsub.f32 %v1074_v21, %v1083_v29 }
 0x2f2   : > { %v1088_v31 = vmul.f32 1.442695, %v1085_v30 }
 0x2f3   : > { %v1167_v32 = vpop.permute.xlu1 %1166  ;;  %v1747_v50 = vpop.permute.xlu0 %1746 }
 0x2f4   : > { %3547 = vpow2.f32 %v1088_v31  ;;  %3356 = vmatpush3.msra.mxu1 %v1167_v32 }
 0x2f5   : > { %3365 = vmatprep.subr.mxu1 %v3621_v10 }
 0x2f7   : > { %v1091_v33 = vpop.permute.xlu1 %1090  ;;  %v1825_v51 = vpop.permute.xlu0 %1824 }
 0x2f8   : > { %3351 = vmatpush3.msra.mxu0 %v1091_v33 }
 0x2f9   : > { %3360 = vmatprep.subr.mxu0 %v3621_v10 }
 0x2fa   : > { %v3546_v34 = vpop.eup %3545 }
 0x2fb   : > { %v1255_v35 = vpop.permute.xlu1 %1254  ;;  %3353 = vmatmul.mubr.msk.f32.vlgmr.msra.gmra.mrb[0].mxu0 %vm926_vm3, %v3546_v34  ;;  %v1242_v49 = vsel %vm926_vm3, %v3546_v34, 0.0  ;;  %v1823_v52 = vpop.permute.xlu0 %1822 }
 0x2fc   : > { %3362 = vmatprep.mubr.msk.f32.mxu0 %vm3622_vm2, %v3621_v10 }
 0x2fe   : > { %v3548_v36 = vpop.eup %3547 }
 0x2ff   : > { %3358 = vmatmul.mubr.msk.f32.vlgmr.msra.gmra.mrb[6].mxu1 %vm926_vm3, %v3548_v36  ;;  %3361 = vmatpush3.xpose.msk.msra.mxu0 %vm926_vm3, %v1255_v35  ;;  %v1253_v37 = vpop.permute.xlu1 %1252  ;;  %v1245_v1 = vsel %vm926_vm3, %v3548_v36, 0.0 }
 0x300   : > { %3366 = vmatpush3.xpose.msk.msra.mxu1 %vm926_vm3, %v1333_v24  ;;  %3367 = vmatprep.mubr.msk.f32.mxu1 %vm3622_vm2, %v3621_v10 }
 0x301   : > { %3375 = vmatprep.subr.mxu1 %v3621_v10  ;;  %3370 = vmatprep.subr.mxu0 %v3621_v10 }
 0x302   : > { %3363 = vmatmul.mubr.msk.f32.vlgmr.msra.gmra.mrb[2].mxu0 %vm926_vm3, %v1253_v37 }
 0x303   : > { %3368 = vmatmul.mubr.msk.f32.vlgmr.msra.gmra.mrb[8].mxu1 %vm926_vm3, %v1331_v25  ;;  %3372 = vmatprep.mubr.msk.f32.mxu0 %vm3622_vm2, %v3621_v10 }
 0x304   : > { %3376 = vmatpush3.msra.mxu1 %v1497_v38  ;;  %3377 = vmatprep.mubr.msk.f32.mxu1 %vm3622_vm2, %v3621_v10 }
 0x305   : > { %3390 = vmatprep.subr.mxu1 %v3621_v10 }
 0x3ce   : > { %v3909_v39 = vpop.f32.mrb[0].mxu0 }
 0x3cf   : > { %v3354_v40 = vpop.f32.mrb[1].mxu0 }
 0x3d2   : > { %v3911_v41 = vpop.f32.mrb[6].mxu1 }
 0x3d3   : > { %v3359_v42 = vpop.f32.mrb[7].mxu1 }
 0x3d5   : > { %v1326_v43 = vpop.f32.mrb[2].mxu0 }
 0x3d6   : > { %v3364_v44 = vpop.f32.mrb[3].mxu0  ;;  %v1404_v45 = vpop.f32.mrb[8].mxu1  ;;  %v1408_v46 = vsel %vm926_vm3, %v1326_v43, -inf }
 0x3d7   : > { %v3369_v47 = vpop.f32.mrb[9].mxu1  ;;  %1409 = vmax.xlane.f32.xlu0 %v1408_v46  ;;  %v1411_v48 = vsel %vm926_vm3, %v1404_v45, -inf  ;;  %v830_v44 = vld [vmem:[%s4158_s0 + $0x10] sm:$0xff] }
 0x3d8   : > { %1412 = vmax.xlane.f32.xlu1 %v1411_v48 }
 0x3db   : > { %1243 = vadd.xlane.f32.xlu0 %v1242_v49 }
 0x3e9   : > { %1744 = vrot.lane.b32.xlu1 %v3854_v14, %s3629_s11 }
 0x3ed   : > { %1420 = vrot.lane.b32.xlu1 %v3854_v14, %s3627_s16  ;;  %s4160_s16 = scalar_lea.vmem %s4111_s5, %s3746_s28 }
 0x464   : > { %v1410_v53 = vpop.xlane.xlu0 %1409 }
 0x465   : > { %v1414_v54 = vsub.f32 %v1326_v43, %v1410_v53  ;;  %v1413_v55 = vpop.xlane.xlu1 %1412 }
 0x466   : > { %v1415_v56 = vsub.f32 %v1404_v45, %v1413_v55 }
 0x467   : > { %v1416_v57 = vmul.f32 1.442695, %v1414_v54 }
 0x468   : > { %v1418_v58 = vmul.f32 1.442695, %v1415_v56  ;;  %v1244_v4 = vpop.xlane.xlu0 %1243 }
 0x469   : > { %3549 = vpow2.f32 %v1416_v57  ;;  %v1745_v59 = vpop.permute.xlu1 %1744 }
 0x46a   : > { %3551 = vpow2.f32 %v1418_v58 }
 0x46b   : > { %3553 = vrcp.f32 %v1244_v4 }
 0x46d   : > { %v1421_v60 = vpop.permute.xlu1 %1420 }
 0x46e   : > { %3371 = vmatpush3.msra.mxu0 %v1421_v60 }
 0x46f   : > { %3380 = vmatprep.subr.mxu0 %v829_v2 }
 0x473   : > { %v3550_v61 = vpop.eup %3549 }
 0x474   : > { %v3552_v62 = vpop.eup %3551  ;;  %3373 = vmatmul.mubr.msk.f32.vlgmr.msra.gmra.mrb[4].mxu0 %vm926_vm3, %v3550_v61  ;;  %v1572_v63 = vsel %vm926_vm3, %v3550_v61, 0.0 }
 0x475   : > { %3378 = vmatmul.mubr.msk.f32.vlgmr.msra.gmra.mrb[10].mxu1 %vm926_vm3, %v3552_v62  ;;  %1573 = vadd.xlane.f32.xlu1 %v1572_v63  ;;  %v1575_v0 = vsel %vm926_vm3, %v3552_v62, 0.0  ;;  %v3554_v11 = vpop.eup %3553 }
 0x476   : > { %3391 = vmatpush3.xpose.msk.msra.mxu1 %vm926_vm3, %v1747_v50  ;;  %1576 = vadd.xlane.f32.xlu0 %v1575_v0  ;;  %v1250_v22 = vmul.f32 %v3554_v11, %v3909_v39 }
 0x477   : > { %3392 = vmatprep.mubr.msk.f32.mxu1 %vm3622_vm2, %v3621_v10  ;;  %3395 = vmatprep.subr.mxu1 %v3621_v10 }
 0x478   : > { %3381 = vmatpush3.msra.mxu0 %v829_v2 }
 0x479   : > { %3393 = vmatmul.mubr.msk.f32.vlgmr.msra.gmra.mrb[12].mxu1 %vm926_vm3, %v1745_v59  ;;  %3385 = vmatprep.subr.mxu0 %v828_v3 }
 0x47a   : > { %3396 = vmatpush3.xpose.msk.msra.mxu1 %vm926_vm3, %v1825_v51  ;;  %1246 = vadd.xlane.f32.xlu0 %v1245_v1 }
 0x47b   : > { %3397 = vmatprep.mubr.msk.f32.mxu1 %vm3622_vm2, %v3621_v10  ;;  %3405 = vmatprep.subr.mxu1 %v3621_v10 }
 0x47d   : > { %3398 = vmatmul.mubr.msk.f32.vlgmr.msra.gmra.mrb[14].mxu1 %vm926_vm3, %v1823_v52 }
 0x47e   : > { %3407 = vmatprep.mubr.msk.f32.mxu1 %vm3622_vm2, %v3621_v10 }
 0x502   : > { %v1574_v5 = vpop.xlane.xlu1 %1573 }
 0x503   : > { %v1577_v6 = vpop.xlane.xlu0 %1576  ;;  %3555 = vrcp.f32 %v1574_v5 }
 0x504   : > { %3557 = vrcp.f32 %v1577_v6 }
 0x507   : > { %v1247_v8 = vpop.xlane.xlu0 %1246 }
 0x508   : > { %3559 = vrcp.f32 %v1247_v8 }
 0x50d   : > { %v3556_v12 = vpop.eup %3555 }
 0x50e   : > { %v3558_v16 = vpop.eup %3557 }
 0x512   : > { %v3560_v26 = vpop.eup %3559 }
 0x513   : > { %v1251_v28 = vmul.f32 %v3560_v26, %v3911_v41 }
 0x547   : > { %v1492_v13 = vpop.f32.mrb[4].mxu0 }
 0x548   : > { %v1580_v17 = vmul.f32 %v3556_v12, %v1492_v13  ;;  %v3374_v18 = vpop.f32.mrb[5].mxu0  ;;  %v1568_v19 = vpop.f32.mrb[10].mxu1  ;;  %v831_v12 = vld [vmem:[%s4158_s0 + $0x18] sm:$0xff]  ;;  %s4161_s0 = scalar_lea.vmem %s4112_s6, %s3746_s28 }
 0x549   : > { %v1581_v20 = vmul.f32 %v3558_v16, %v1568_v19  ;;  %v3379_v21 = vpop.f32.mrb[11].mxu1 }
 0x54a   : > { %3382 = vmatprep.mubr.msk.f32.mxu0 %vm926_vm3, %v1580_v17 }
 0x54b   : > { %3383 = vmatmul.mubr.msk.f32.vlgmr.msra.gmra.mrb[6].mxu0 %vm926_vm3, %v1581_v20 }
 0x54c   : > { %3387 = vmatprep.mubr.msk.f32.mxu0 %vm926_vm3, %v1250_v22  ;;  %v1818_v23 = vpop.f32.mrb[12].mxu1  ;;  %3386 = vmatpush3.msra.mxu0 %v828_v3 }
 0x54d   : > { %v3394_v24 = vpop.f32.mrb[13].mxu1  ;;  %v1900_v25 = vsel %vm926_vm3, %v1818_v23, -inf  ;;  %3400 = vmatprep.subr.mxu0 %v3621_v10 }
 0x54e   : > { %1901 = vmax.xlane.f32.xlu0 %v1900_v25  ;;  %v3240_v25 = vld [vmem:[%s4159_s29] ss:$0 sm:$0xff] }
 0x550   : > { %v1896_v27 = vpop.f32.mrb[14].mxu1 }
 0x551   : > { %v3399_v29 = vpop.f32.mrb[15].mxu1  ;;  %v1903_v30 = vsel %vm926_vm3, %v1896_v27, -inf }
 0x552   : > { %1904 = vmax.xlane.f32.xlu1 %v1903_v30 }
 0x553   : > { %3388 = vmatmul.mubr.msk.f32.vlgmr.msra.gmra.mrb[6].mxu0 %vm926_vm3, %v1251_v28 }
 0x554   : > { %3402 = vmatprep.mubr.msk.f32.mxu0 %vm3622_vm2, %v3621_v10 }
 0x563   : > { %1988 = vrot.lane.b32.xlu1 %v3857_v15, %s3630_s19 }
 0x564   : > { %1912 = vrot.lane.b32.xlu0 %v3854_v14, %s3630_s19 }
 0x567   : > { %2237 = vrot.lane.b32.xlu1 %v3857_v15, %s3631_s21 }
 0x568   : > { %2159 = vrot.lane.b32.xlu0 %v3854_v14, %s3631_s21  ;;  %s4162_s21 = scalar_lea.vmem %s4113_s7, %s3746_s28 }
 0x5db   : > { %v1902_v31 = vpop.xlane.xlu0 %1901 }
 0x5dc   : > { %v1906_v32 = vsub.f32 %v1818_v23, %v1902_v31 }
 0x5de   : > { %v1908_v33 = vmul.f32 1.442695, %v1906_v32 }
 0x5df   : > { %v1905_v34 = vpop.xlane.xlu1 %1904  ;;  %v1913_v35 = vpop.permute.xlu0 %1912 }
 0x5e0   : > { %3561 = vpow2.f32 %v1908_v33  ;;  %v1907_v36 = vsub.f32 %v1896_v27, %v1905_v34  ;;  %3401 = vmatpush3.msra.mxu0 %v1913_v35 }
 0x5e1   : > { %3410 = vmatprep.subr.mxu0 %v830_v44 }
 0x5e2   : > { %v1910_v37 = vmul.f32 1.442695, %v1907_v36 }
 0x5e3   : > { %v1989_v38 = vpop.permute.xlu1 %1988  ;;  %v2160_v42 = vpop.permute.xlu0 %2159 }
 0x5e4   : > { %3563 = vpow2.f32 %v1910_v37  ;;  %3406 = vmatpush3.msra.mxu1 %v1989_v38 }
 0x5e5   : > { %3415 = vmatprep.subr.mxu1 %v3621_v10 }
 0x5e7   : > { %v2238_v45 = vpop.permute.xlu1 %2237 }
 0x5ea   : > { %v3562_v39 = vpop.eup %3561 }
 0x5eb   : > { %3403 = vmatmul.mubr.msk.f32.vlgmr.msra.gmra.mrb[8].mxu0 %vm926_vm3, %v3562_v39  ;;  %v2064_v40 = vsel %vm926_vm3, %v3562_v39, 0.0 }
 0x5ec   : > { %2065 = vadd.xlane.f32.xlu1 %v2064_v40  ;;  %3411 = vmatpush3.msra.mxu0 %v830_v44 }
 0x5ed   : > { %3420 = vmatprep.subr.mxu0 %v3621_v10 }
 0x5ee   : > { %v3564_v41 = vpop.eup %3563 }
 0x5ef   : > { %3408 = vmatmul.mubr.msk.f32.vlgmr.msra.gmra.mrb[16].mxu1 %vm926_vm3, %v3564_v41  ;;  %v2067_v43 = vsel %vm926_vm3, %v3564_v41, 0.0 }
 0x5f0   : > { %3416 = vmatpush3.xpose.msk.msra.mxu1 %vm926_vm3, %v2160_v42  ;;  %2068 = vadd.xlane.f32.xlu0 %v2067_v43 }
 0x5f1   : > { %3417 = vmatprep.mubr.msk.f32.mxu1 %vm3622_vm2, %v3621_v10  ;;  %3425 = vmatprep.subr.mxu1 %v3621_v10 }
 0x5fd   : > { %2157 = vrot.lane.b32.xlu1 %v3854_v14, %s3632_s1 }
 0x606   : > { %2235 = vrot.lane.b32.xlu0 %v3857_v15, %s3632_s1 }
 0x679   : > { %v2066_v46 = vpop.xlane.xlu1 %2065 }
 0x67a   : > { %3565 = vrcp.f32 %v2066_v46 }
 0x67d   : > { %v2158_v47 = vpop.permute.xlu1 %2157  ;;  %v2069_v48 = vpop.xlane.xlu0 %2068 }
 0x67e   : > { %3418 = vmatmul.mubr.msk.f32.vlgmr.msra.gmra.mrb[18].mxu1 %vm926_vm3, %v2158_v47  ;;  %3567 = vrcp.f32 %v2069_v48 }
 0x67f   : > { %3427 = vmatprep.mubr.msk.f32.mxu1 %vm3622_vm2, %v3621_v10 }
 0x681   : > { %v2236_v57 = vpop.permute.xlu0 %2235 }
 0x684   : > { %v3566_v49 = vpop.eup %3565 }
 0x688   : > { %v3568_v53 = vpop.eup %3567 }
 0x6be   : > { %v1984_v50 = vpop.f32.mrb[8].mxu0 }
 0x6bf   : > { %v2072_v51 = vmul.f32 %v3566_v49, %v1984_v50  ;;  %v3404_v52 = vpop.f32.mrb[9].mxu0 }
 0x6c1   : > { %3412 = vmatprep.mubr.msk.f32.mxu0 %vm926_vm3, %v2072_v51  ;;  %v3241_v51 = vld [vmem:[%s4160_s16] ss:$0 sm:$0xff]  ;;  %s4165_s16 = scalar_lea.vmem %s4118_s12, %s3746_s28 }
 0x6c2   : > { %v2060_v54 = vpop.f32.mrb[16].mxu1 }
 0x6c3   : > { %v2073_v55 = vmul.f32 %v3568_v53, %v2060_v54  ;;  %v3409_v56 = vpop.f32.mrb[17].mxu1  ;;  %v3242_v54 = vld [vmem:[%s4161_s0] ss:$0 sm:$0xff] }
 0x6c5   : > { %3413 = vmatmul.mubr.msk.f32.vlgmr.msra.gmra.mrb[6].mxu0 %vm926_vm3, %v2073_v55 }
 0x6c6   : > { %3421 = vmatpush3.xpose.msk.msra.mxu0 %vm926_vm3, %v2238_v45  ;;  %3422 = vmatprep.mubr.msk.f32.mxu0 %vm3622_vm2, %v3621_v10 }
 0x6c7   : > { %3430 = vmatprep.subr.mxu0 %v3621_v10 }
 0x6c9   : > { %3423 = vmatmul.mubr.msk.f32.vlgmr.msra.gmra.mrb[10].mxu0 %vm926_vm3, %v2236_v57 }
 0x6ca   : > { %3432 = vmatprep.mubr.msk.f32.mxu0 %vm3622_vm2, %v3621_v10 }
 0x751   : > { %v2231_v58 = vpop.f32.mrb[18].mxu1 }
 0x752   : > { %v3419_v59 = vpop.f32.mrb[19].mxu1  ;;  %v2313_v60 = vsel %vm926_vm3, %v2231_v58, -inf }
 0x753   : > { %2314 = vmax.xlane.f32.xlu1 %v2313_v60 }
 0x764   : > { %2401 = vrot.lane.b32.xlu1 %v3857_v15, %s3633_s23 }
 0x79c   : > { %v2309_v61 = vpop.f32.mrb[10].mxu0 }
 0x79d   : > { %v3424_v62 = vpop.f32.mrb[11].mxu0  ;;  %v2316_v63 = vsel %vm926_vm3, %v2309_v61, -inf }
 0x79e   : > { %2317 = vmax.xlane.f32.xlu0 %v2316_v63 }
 0x7b4   : > { %2325 = vrot.lane.b32.xlu0 %v3854_v14, %s3633_s23 }
 0x7e0   : > { %v2315_v0 = vpop.xlane.xlu1 %2314 }
 0x7e1   : > { %v2319_v1 = vsub.f32 %v2231_v58, %v2315_v0 }
 0x7e3   : > { %v2321_v2 = vmul.f32 1.442695, %v2319_v1 }
 0x7e4   : > { %v2402_v3 = vpop.permute.xlu1 %2401 }
 0x7e5   : > { %3569 = vpow2.f32 %v2321_v2  ;;  %3431 = vmatpush3.msra.mxu0 %v2402_v3 }
 0x7e6   : > { %3435 = vmatprep.subr.mxu0 %v831_v12 }
 0x7ef   : > { %v3570_v10 = vpop.eup %3569 }
 0x7f0   : > { %v2477_v4 = vsel %vm926_vm3, %v3570_v10, 0.0 }
 0x7f1   : > { %2478 = vadd.xlane.f32.xlu1 %v2477_v4 }
 0x82b   : > { %v2318_v5 = vpop.xlane.xlu0 %2317 }
 0x82c   : > { %v2320_v15 = vsub.f32 %v2309_v61, %v2318_v5 }
 0x82e   : > { %v2323_v6 = vmul.f32 1.442695, %v2320_v15 }
 0x82f   : > { %v2326_v8 = vpop.permute.xlu0 %2325 }
 0x830   : > { %3571 = vpow2.f32 %v2323_v6  ;;  %3426 = vmatpush3.msra.mxu1 %v2326_v8  ;;  %v2669_v6 = vld [vmem:[%s3784_s25] sm:$0xff]  ;;  %v2670_v8 = vld [vmem:[%s3784_s25 + $0x8] sm:$0xff] }
 0x831   : > { %3428 = vmatmul.mubr.msk.f32.vlgmr.msra.gmra.mrb[20].mxu1 %vm926_vm3, %v3570_v10 }
 0x83a   : > { %v3572_v14 = vpop.eup %3571 }
 0x83b   : > { %3433 = vmatmul.mubr.msk.f32.vlgmr.msra.gmra.mrb[12].mxu0 %vm926_vm3, %v3572_v14  ;;  %v2480_v11 = vsel %vm926_vm3, %v3572_v14, 0.0  ;;  %v3478_v14 = vpack.c.bf16 %v2670_v8, %v2669_v6 }
 0x83c   : > { %2481 = vadd.xlane.f32.xlu0 %v2480_v11  ;;  %3436 = vmatpush3.msra.mxu0 %v831_v12  ;;  %v2671_v11 = vld [vmem:[%s3784_s25 + $0x10] sm:$0xff]  ;;  %v2672_v12 = vld [vmem:[%s3784_s25 + $0x18] sm:$0xff] }
 0x83d   : > { %3479 = vmatprep.subr.bf16.mxu1 %v3478_v14 }
 0x83e   : > { %3481 = vmatpush3.bf16.msra.mxu1 %v3478_v14 }
 0x87e   : > { %v2479_v13 = vpop.xlane.xlu1 %2478 }
 0x87f   : > { %3573 = vrcp.f32 %v2479_v13  ;;  %v3482_v13 = vpack.c.bf16 %v2672_v12, %v2671_v11 }
 0x881   : > { %3483 = vmatprep.subr.bf16.mxu1 %v3482_v13 }
 0x882   : > { %3485 = vmatpush3.bf16.msra.mxu1 %v3482_v13 }
 0x889   : > { %v3574_v17 = vpop.eup %3573 }
 0x8c9   : > { %v2482_v16 = vpop.xlane.xlu0 %2481 }
 0x8ca   : > { %3575 = vrcp.f32 %v2482_v16 }
 0x8d4   : > { %v3576_v21 = vpop.eup %3575 }
 0x904   : > { %v2397_v18 = vpop.f32.mrb[20].mxu1 }
 0x905   : > { %v2485_v19 = vmul.f32 %v3574_v17, %v2397_v18  ;;  %v3429_v20 = vpop.f32.mrb[21].mxu1 }
 0x907   : > { %3437 = vmatprep.mubr.msk.f32.mxu0 %vm926_vm3, %v2485_v19 }
 0x90e   : > { %v2473_v22 = vpop.f32.mrb[12].mxu0 }
 0x90f   : > { %v2486_v23 = vmul.f32 %v3576_v21, %v2473_v22  ;;  %v3434_v24 = vpop.f32.mrb[13].mxu0 }
 0x911   : > { %3438 = vmatmul.mubr.msk.f32.vlgmr.msra.gmra.mrb[6].mxu0 %vm926_vm3, %v2486_v23  ;;  %v3243_v23 = vld [vmem:[%s4162_s21] ss:$0 sm:$0xff] }
 0x9e4   : > { %v3439_v26 = vpop.f32.mrb[6].mxu0 }
 0x9e5   : > { %v2577_v27 = vadd.f32 %v3439_v26, %v3240_v25  ;;  %v2559_v28 = vpop.f32.mrb[7].mxu0 }
 0x9e6   : > { %v2576_v29 = vadd.f32 %v3240_v25, %v2559_v28 }
 0x9e7   : > { %v2579_v30 = vadd.f32 %v2577_v27, %v3839_v9  ;;  %v3244_v27 = vld [vmem:[%s4163_s22] ss:$0 sm:$0xff] }
 0x9e8   : > { %v2578_v31 = vadd.f32 %v2576_v29, %v3832_v7 }
 0x9e9   : > { %v2583_v32 = vsel %vm841_vm1, %v2579_v30, 0.0 }
 0x9ea   : > { %2584 = vadd.xlane.f32.xlu1 %v2583_v32  ;;  %v2580_v33 = vsel %vm841_vm1, %v2578_v31, 0.0  ;;  %v2674_v32 = vld [vmem:[%s3794_s2] sm:$0xff] }
 0x9eb   : > { %2581 = vadd.xlane.f32.xlu0 %v2580_v33  ;;  %v2675_v33 = vld [vmem:[%s3794_s2 + $0x8] sm:$0xff] }
 0xa77   : > { %v2585_v34 = vpop.xlane.xlu1 %2584 }
 0xa78   : > { %v2588_v35 = vmul.f32 0.03125, %v2585_v34  ;;  %v2582_v36 = vpop.xlane.xlu0 %2581  ;;  %v2676_v34 = vld [vmem:[%s3794_s2 + $0x10] sm:$0xff] }
 0xa79   : > { %v2587_v37 = vmul.f32 0.03125, %v2582_v36  ;;  %v2677_v36 = vld [vmem:[%s3794_s2 + $0x18] sm:$0xff] }
 0xa7a   : > { %v2590_v38 = vsub.f32 %v2579_v30, %v2588_v35  ;;  %v3486_v35 = vpack.c.bf16 %v2675_v33, %v2674_v32 }
 0xa7b   : > { %v2589_v39 = vsub.f32 %v2578_v31, %v2587_v37  ;;  %v3490_v37 = vpack.c.bf16 %v2677_v36, %v2676_v34  ;;  %v3252_v34 = vld [vmem:[%s799_s20] ss:$0 sm:$0xff] }
 0xa7c   : > { %v2592_v40 = vmul.f32 %v2590_v38, %v2590_v38  ;;  %3487 = vmatprep.subr.bf16.mxu0 %v3486_v35 }
 0xa7d   : > { %v2591_v41 = vmul.f32 %v2589_v39, %v2589_v39  ;;  %3489 = vmatpush3.bf16.msra.mxu0 %v3486_v35 }
 0xa7e   : > { %v2596_v42 = vsel %vm841_vm1, %v2592_v40, 0.0  ;;  %3491 = vmatprep.subr.bf16.mxu0 %v3490_v37 }
 0xa7f   : > { %2597 = vadd.xlane.f32.xlu1 %v2596_v42  ;;  %v2593_v43 = vsel %vm841_vm1, %v2591_v41, 0.0  ;;  %v2680_v41 = vld [vmem:[%s3794_s2 + $0x30] sm:$0xff]  ;;  %v2681_v42 = vld [vmem:[%s3794_s2 + $0x38] sm:$0xff] }
 0xa80   : > { %2594 = vadd.xlane.f32.xlu0 %v2593_v43  ;;  %v3498_v43 = vpack.c.bf16 %v2681_v42, %v2680_v41 }
 0xa81   : > { %3493 = vmatpush3.bf16.msra.mxu0 %v3490_v37 }
 0xb0c   : > { %v2598_v44 = vpop.xlane.xlu1 %2597 }
 0xb0d   : > { %v2600_v45 = vmul.f32 0.03125, %v2598_v44  ;;  %v2595_v46 = vpop.xlane.xlu0 %2594  ;;  %v3245_v44 = vld [vmem:[%s4164_s26] ss:$0 sm:$0xff] }
 0xb0e   : > { %v2599_v47 = vmul.f32 0.03125, %v2595_v46 }
 0xb0f   : > { %v2602_v48 = vadd.f32 1e-05, %v2600_v45 }
 0xb10   : > { %v2601_v49 = vadd.f32 1e-05, %v2599_v47 }
 0xb11   : > { %3577 = vrsqrt.f32 %v2602_v48 }
 0xb12   : > { %3579 = vrsqrt.f32 %v2601_v49 }
 0xb1b   : > { %v3578_v50 = vpop.eup %3577 }
 0xb1c   : > { %v3580_v52 = vpop.eup %3579  ;;  %v2606_v53 = vmul.f32 %v3578_v50, %v2590_v38  ;;  %v2678_v38 = vld [vmem:[%s3794_s2 + $0x20] sm:$0xff] }
 0xb1d   : > { %v2605_v55 = vmul.f32 %v3580_v52, %v2589_v39  ;;  %v2679_v39 = vld [vmem:[%s3794_s2 + $0x28] sm:$0xff] }
 0xb1e   : > { %v2614_v56 = vmul.f32 %v3241_v51, %v2606_v53  ;;  %v3494_v40 = vpack.c.bf16 %v2679_v39, %v2678_v38 }
 0xb1f   : > { %v2613_v57 = vmul.f32 %v3241_v51, %v2605_v55 }
 0xb20   : > { %v2622_v58 = vadd.f32 %v3242_v54, %v2614_v56  ;;  %3495 = vmatprep.subr.bf16.mxu0 %v3494_v40 }
 0xb21   : > { %v2621_v59 = vadd.f32 %v3242_v54, %v2613_v57  ;;  %3497 = vmatpush3.bf16.msra.mxu0 %v3494_v40 }
 0xb22   : > { %v2624_v60 = vadd.f32 %v2622_v58, %v3839_v9  ;;  %3499 = vmatprep.subr.bf16.mxu0 %v3498_v43 }
 0xb23   : > { %v2623_v61 = vadd.f32 %v2621_v59, %v3832_v7 }
 0xb24   : > { %v2630_v62 = vsel %vm841_vm1, %v2624_v60, 0.0 }
 0xb25   : > { %2631 = vadd.xlane.f32.xlu1 %v2630_v62  ;;  %v2627_v63 = vsel %vm841_vm1, %v2623_v61, 0.0  ;;  %3501 = vmatpush3.bf16.msra.mxu0 %v3498_v43 }
 0xb26   : > { %2628 = vadd.xlane.f32.xlu0 %v2627_v63 }
 0xbb2   : > { %v2632_v0 = vpop.xlane.xlu1 %2631 }
 0xbb3   : > { %v2634_v1 = vmul.f32 0.03125, %v2632_v0  ;;  %v2629_v2 = vpop.xlane.xlu0 %2628 }
 0xbb4   : > { %v2633_v3 = vmul.f32 0.03125, %v2629_v2 }
 0xbb5   : > { %v2636_v10 = vsub.f32 %v2624_v60, %v2634_v1 }
 0xbb6   : > { %v2635_v4 = vsub.f32 %v2623_v61, %v2633_v3  ;;  %v3248_v3 = vld [vmem:[%s4165_s16] ss:$0 sm:$0xff] }
 0xbb7   : > { %v2638_v5 = vmul.f32 %v2636_v10, %v2636_v10 }
 0xbb8   : > { %v2637_v9 = vmul.f32 %v2635_v4, %v2635_v4 }
 0xbb9   : > { %v2642_v7 = vsel %vm841_vm1, %v2638_v5, 0.0 }
 0xbba   : > { %2643 = vadd.xlane.f32.xlu1 %v2642_v7  ;;  %v2639_v15 = vsel %vm841_vm1, %v2637_v9, 0.0 }
 0xbbb   : > { %2640 = vadd.xlane.f32.xlu0 %v2639_v15 }
 0xc47   : > { %v2644_v16 = vpop.xlane.xlu1 %2643 }
 0xc48   : > { %v2646_v17 = vmul.f32 0.03125, %v2644_v16  ;;  %v2641_v18 = vpop.xlane.xlu0 %2640 }
 0xc49   : > { %v2645_v19 = vmul.f32 0.03125, %v2641_v18 }
 0xc4a   : > { %v2648_v20 = vadd.f32 1e-05, %v2646_v17 }
 0xc4b   : > { %v2647_v21 = vadd.f32 1e-05, %v2645_v19 }
 0xc4c   : > { %3581 = vrsqrt.f32 %v2648_v20 }
 0xc4d   : > { %3583 = vrsqrt.f32 %v2647_v21 }
 0xc56   : > { %v3582_v22 = vpop.eup %3581 }
 0xc57   : > { %v3584_v24 = vpop.eup %3583  ;;  %v2652_v25 = vmul.f32 %v3582_v22, %v2636_v10 }
 0xc58   : > { %v2651_v26 = vmul.f32 %v3584_v24, %v2635_v4 }
 0xc59   : > { %v2660_v28 = vmul.f32 %v3243_v23, %v2652_v25 }
 0xc5a   : > { %v2659_v29 = vmul.f32 %v3243_v23, %v2651_v26 }
 0xc5b   : > { %v4033_v31 = vadd.f32 %v3244_v27, %v2660_v28 }
 0xc5c   : > { %v4031_v30 = vadd.f32 %v3244_v27, %v2659_v29  ;;  %v3251_v29 = vld [vmem:[%s796_s3] ss:$0 sm:$0xff] }
 0xc5e   : > { %3448 = vmatprep.mubr.msk.f32.mxu1 %vm841_vm1, %v4031_v30 }
 0xc5f   : > { %3449 = vmatmul.mubr.msk.f32.vlgmr.msra.gmra.mrb[22].mxu1 %vm841_vm1, %v4033_v31 }
 0xd32   : > { %v3450_v45 = vpop.f32.mrb[22].mxu1 }
 0xd33   : > { %v2769_v46 = vadd.f32 %v3450_v45, %v3245_v44  ;;  %v2763_v47 = vpop.f32.mrb[23].mxu1 }
 0xd34   : > { %v2764_v48 = vadd.f32 %v3245_v44, %v2763_v47 }
 0xd35   : > { %v2775_v49 = vmul.f32 0.044715, %v2769_v46  ;;  %v2773_v0 = vmul.f32 0.5, %v2769_v46 }
 0xd36   : > { %v2774_v50 = vmul.f32 0.044715, %v2764_v48  ;;  %v2772_v62 = vmul.f32 0.5, %v2764_v48 }
 0xd37   : > { %v2777_v51 = vmul.f32 %v2775_v49, %v2769_v46 }
 0xd38   : > { %v2776_v52 = vmul.f32 %v2774_v50, %v2764_v48 }
 0xd39   : > { %v2779_v53 = vmul.f32 %v2777_v51, %v2769_v46 }
 0xd3a   : > { %v2778_v54 = vmul.f32 %v2776_v52, %v2764_v48 }
 0xd3b   : > { %v2781_v55 = vadd.f32 %v2779_v53, %v2769_v46 }
 0xd3c   : > { %v2780_v56 = vadd.f32 %v2778_v54, %v2764_v48 }
 0xd3d   : > { %v2783_v57 = vmul.f32 0.7978846, %v2781_v55 }
 0xd3e   : > { %v2782_v58 = vmul.f32 0.7978846, %v2780_v56 }
 0xd3f   : > { %3585 = vtanh.f32 %v2783_v57 }
 0xd40   : > { %3587 = vtanh.f32 %v2782_v58 }
 0xd49   : > { %v3586_v59 = vpop.eup %3585 }
 0xd4a   : > { %v3588_v60 = vpop.eup %3587  ;;  %v2787_v61 = vadd.f32 1.0, %v3586_v59  ;;  %v3253_v59 = vld [vmem:[%s802_s17] ss:$0 sm:$0xff] }
 0xd4b   : > { %v2786_v63 = vadd.f32 1.0, %v3588_v60 }
 0xd4c   : > { %v2789_v2 = vmul.f32 %v2787_v61, %v2773_v0 }
 0xd4d   : > { %v2788_v1 = vmul.f32 %v2786_v63, %v2772_v62  ;;  %v3254_v62 = vld [vmem:[%s805_s30] ss:$0 sm:$0xff] }
 0xd4f   : > { %3467 = vmatprep.mubr.msk.f32.mxu0 %vm2796_vm4, %v2788_v1 }
 0xd50   : > { %3468 = vmatmul.mubr.msk.f32.vlgmr.msra.gmra.mrb[14].mxu0 %vm2796_vm4, %v2789_v2 }
 0xe23   : > { %v3469_v10 = vpop.f32.mrb[14].mxu0 }
 0xe24   : > { %v2875_v4 = vadd.f32 %v3469_v10, %v3248_v3  ;;  %v2869_v5 = vpop.f32.mrb[15].mxu0 }
 0xe25   : > { %v2870_v9 = vadd.f32 %v3248_v3, %v2869_v5 }
 0xe26   : > { %v2879_v7 = vadd.f32 %v2875_v4, %v4033_v31 }
 0xe27   : > { %v2878_v15 = vadd.f32 %v2870_v9, %v4031_v30 }
 0xe28   : > { %v2883_v6 = vsel %vm841_vm1, %v2879_v7, 0.0 }
 0xe29   : > { %2884 = vadd.xlane.f32.xlu1 %v2883_v6  ;;  %v2880_v8 = vsel %vm841_vm1, %v2878_v15, 0.0 }
 0xe2a   : > { %2881 = vadd.xlane.f32.xlu0 %v2880_v8 }
 0xeb6   : > { %v2885_v14 = vpop.xlane.xlu1 %2884 }
 0xeb7   : > { %v2887_v11 = vmul.f32 0.03125, %v2885_v14  ;;  %v2882_v12 = vpop.xlane.xlu0 %2881 }
 0xeb8   : > { %v2886_v13 = vmul.f32 0.03125, %v2882_v12 }
 0xeb9   : > { %v2889_v16 = vsub.f32 %v2879_v7, %v2887_v11 }
 0xeba   : > { %v2888_v17 = vsub.f32 %v2878_v15, %v2886_v13 }
 0xebb   : > { %v2891_v18 = vmul.f32 %v2889_v16, %v2889_v16 }
 0xebc   : > { %v2890_v19 = vmul.f32 %v2888_v17, %v2888_v17 }
 0xebd   : > { %v2895_v20 = vsel %vm841_vm1, %v2891_v18, 0.0 }
 0xebe   : > { %2896 = vadd.xlane.f32.xlu1 %v2895_v20  ;;  %v2892_v21 = vsel %vm841_vm1, %v2890_v19, 0.0 }
 0xebf   : > { %2893 = vadd.xlane.f32.xlu0 %v2892_v21 }
 0xf4b   : > { %v2897_v22 = vpop.xlane.xlu1 %2896 }
 0xf4c   : > { %v2899_v23 = vmul.f32 0.03125, %v2897_v22  ;;  %v2894_v24 = vpop.xlane.xlu0 %2893 }
 0xf4d   : > { %v2898_v25 = vmul.f32 0.03125, %v2894_v24 }
 0xf4e   : > { %v2901_v26 = vadd.f32 1e-05, %v2899_v23 }
 0xf4f   : > { %v2900_v27 = vadd.f32 1e-05, %v2898_v25 }
 0xf50   : > { %3589 = vrsqrt.f32 %v2901_v26 }
 0xf51   : > { %3591 = vrsqrt.f32 %v2900_v27 }
 0xf5a   : > { %v3590_v28 = vpop.eup %3589 }
 0xf5b   : > { %v3592_v32 = vpop.eup %3591  ;;  %v2905_v33 = vmul.f32 %v3590_v28, %v2889_v16 }
 0xf5c   : > { %v2904_v35 = vmul.f32 %v3592_v32, %v2888_v17 }
 0xf5d   : > { %v2913_v36 = vmul.f32 %v3251_v29, %v2905_v33 }
 0xf5e   : > { %v2912_v37 = vmul.f32 %v3251_v29, %v2904_v35 }
 0xf5f   : > { %v2921_v38 = vadd.f32 %v3252_v34, %v2913_v36 }
 0xf60   : > { %v2920_v39 = vadd.f32 %v3252_v34, %v2912_v37 }
 0xf61   : > { %v2923_v40 = vadd.f32 %v2921_v38, %v4033_v31 }
 0xf62   : > { %v2922_v41 = vadd.f32 %v2920_v39, %v4031_v30 }
 0xf63   : > { %v2929_v42 = vsel %vm841_vm1, %v2923_v40, 0.0 }
 0xf64   : > { %2930 = vadd.xlane.f32.xlu1 %v2929_v42  ;;  %v2926_v43 = vsel %vm841_vm1, %v2922_v41, 0.0 }
 0xf65   : > { %2927 = vadd.xlane.f32.xlu0 %v2926_v43 }
 0xff1   : > { %v2931_v44 = vpop.xlane.xlu1 %2930 }
 0xff2   : > { %v2933_v45 = vmul.f32 0.03125, %v2931_v44  ;;  %v2928_v46 = vpop.xlane.xlu0 %2927 }
 0xff3   : > { %v2932_v47 = vmul.f32 0.03125, %v2928_v46 }
 0xff4   : > { %v2935_v48 = vsub.f32 %v2923_v40, %v2933_v45 }
 0xff5   : > { %v2934_v49 = vsub.f32 %v2922_v41, %v2932_v47 }
 0xff6   : > { %v2937_v50 = vmul.f32 %v2935_v48, %v2935_v48 }
 0xff7   : > { %v2936_v51 = vmul.f32 %v2934_v49, %v2934_v49 }
 0xff8   : > { %v2941_v52 = vsel %vm841_vm1, %v2937_v50, 0.0 }
 0xff9   : > { %2942 = vadd.xlane.f32.xlu1 %v2941_v52  ;;  %v2938_v30 = vsel %vm841_vm1, %v2936_v51, 0.0 }
 0xffa   : > { %2939 = vadd.xlane.f32.xlu0 %v2938_v30 }
0x1086   : > { %v2943_v31 = vpop.xlane.xlu1 %2942 }
0x1087   : > { %v2945_v53 = vmul.f32 0.03125, %v2943_v31  ;;  %v2940_v54 = vpop.xlane.xlu0 %2939 }
0x1088   : > { %v2944_v55 = vmul.f32 0.03125, %v2940_v54 }
0x1089   : > { %v2947_v56 = vadd.f32 1e-05, %v2945_v53 }
0x108a   : > { %v2946_v57 = vadd.f32 1e-05, %v2944_v55 }
0x108b   : > { %3593 = vrsqrt.f32 %v2947_v56 }
0x108c   : > { %3595 = vrsqrt.f32 %v2946_v57 }
0x1095   : > { %v3594_v58 = vpop.eup %3593 }
0x1096   : > { %v3596_v60 = vpop.eup %3595  ;;  %v2951_v61 = vmul.f32 %v3594_v58, %v2935_v48 }
0x1097   : > { %v2950_v63 = vmul.f32 %v3596_v60, %v2934_v49 }
0x1098   : > { %v2959_v0 = vmul.f32 %v3253_v59, %v2951_v61 }
0x1099   : > { %v2958_v1 = vmul.f32 %v3253_v59, %v2950_v63 }
0x109a   : > { %v2967_v2 = vadd.f32 %v3254_v62, %v2959_v0 }
0x109b   : > { %v2966_v3 = vadd.f32 %v3254_v62, %v2958_v1 }
0x109c   : > { %2969 = vst.msk [vmem:[%s4155_s18 + $0x8] sm:$0xff] %vm841_vm1, %v2967_v2 }
0x109d   : > { %2968 = vst.msk [vmem:[%s4155_s18] sm:$0xff] %vm841_vm1, %v2966_v3 }
0x109e PF: > { %s4168_s26 = sld [smem:[#allocation4_spill]]  ;;  %s4169_s24 = sld [smem:[#allocation3_spill]] }
0x109f   : > { %s4170_s25 = sld [smem:[#allocation5_spill]] }
0x10a4   : > { %s27_s26 = sadd.s32 1, %s4168_s26  }
0x10a5   : > { %p24_p6 = scmp.ge.s32.totalorder %s27_s26, 4  }
0x10a7   :  { %26 = sbr.rel (!%p24_p6) target bundleno = 10 (0xa), region = 170 }

// kernel: transformer_forward.3
= control target key start
LH: loop header
LB: loop body
LE: loop exit
PB: predicated region body
PF: predicated region fallthrough
CT: control target
= control target key end

     0   :  { %s6493_s27 = smov 0   ;;  %s7146_s0 = inlined_call_operand.vmem [shape: f32[16,32], index: 0, kind: input, shape index: {}]   ;;  %s7147_s1 = inlined_call_operand.vmem [shape: f32[16,32], index: 1, kind: input, shape index: {}]   ;;  %s7148_s2 = inlined_call_operand.vmem [shape: f32[2,32,96], index: 2, kind: input, shape index: {}]   ;;  %s7149_s3 = inlined_call_operand.vmem [shape: f32[2,1,96], index: 3, kind: input, shape index: {}]   ;;  %s7150_s4 = inlined_call_operand.vmem [shape: f32[2,32,32], index: 4, kind: input, shape index: {}]   ;;  %s7151_s5 = inlined_call_operand.vmem [shape: f32[2,1,32], index: 5, kind: input, shape index: {}]   ;;  %s7152_s6 = inlined_call_operand.vmem [shape: f32[2,1,32], index: 6, kind: input, shape index: {}]   ;;  %s7153_s7 = inlined_call_operand.vmem [shape: f32[2,1,32], index: 7, kind: input, shape index: {}]   ;;  %s7154_s8 = inlined_call_operand.vmem [shape: f32[2,1,32], index: 8, kind: input, shape index: {}]   ;;  %s7155_s9 = inlined_call_operand.vmem [shape: f32[2,1,32], index: 9, kind: input, shape index: {}]   ;;  %s7156_s10 = inlined_call_operand.vmem [shape: f32[2,32,96], index: 10, kind: input, shape index: {}]   ;;  %s7157_s11 = inlined_call_operand.vmem [shape: f32[2,1,96], index: 11, kind: input, shape index: {}]   ;;  %s7158_s12 = inlined_call_operand.vmem [shape: f32[2,32,32], index: 12, kind: input, shape index: {}]   ;;  %s7159_s13 = inlined_call_operand.vmem [shape: f32[2,1,32], index: 13, kind: input, shape index: {}]   ;;  %s7160_s14 = inlined_call_operand.vmem [shape: f32[2,1,32], index: 14, kind: input, shape index: {}]   ;;  %s7161_s15 = inlined_call_operand.vmem [shape: f32[2,1,32], index: 15, kind: input, shape index: {}]   ;;  %s7162_s16 = inlined_call_operand.vmem [shape: f32[2,1,32], index: 16, kind: input, shape index: {}]   ;;  %s7163_s17 = inlined_call_operand.vmem [shape: f32[2,1,32], index: 17, kind: input, shape index: {}]   ;;  %s7164_s18 = inlined_call_operand.vmem [shape: f32[2,32,64], index: 18, kind: input, shape index: {}]   ;;  %s7165_s19 = inlined_call_operand.vmem [shape: f32[2,1,64], index: 19, kind: input, shape index: {}]   ;;  %s7166_s20 = inlined_call_operand.vmem [shape: f32[2,64,32], index: 20, kind: input, shape index: {}]   ;;  %s7167_s21 = inlined_call_operand.vmem [shape: f32[2,1,32], index: 21, kind: input, shape index: {}]   ;;  %s7168_s22 = inlined_call_operand.vmem [shape: f32[2,1,32], index: 22, kind: input, shape index: {}]   ;;  %s7169_s23 = inlined_call_operand.vmem [shape: f32[2,1,32], index: 23, kind: input, shape index: {}]   ;;  %s7170_s24 = inlined_call_operand.vmem [shape: f32[2,1,32], index: 24, kind: input, shape index: {}]   ;;  %s7171_s25 = inlined_call_operand.vmem [shape: f32[2,1,32], index: 25, kind: input, shape index: {}]   ;;  %s7172_s26 = inlined_call_operand.vmem [shape: f32[16,32], index: 26, kind: output, shape index: {}]  }
   0x1   :  { %7182 = sst [smem:[#allocation8_spill]] %s7146_s0 }
   0x2   :  { %7183 = sst [smem:[#allocation9_spill]] %s7147_s1 }
   0x3   :  { %7184 = sst [smem:[#allocation10_spill]] %s7148_s2 }
   0x4   :  { %7185 = sst [smem:[#allocation11_spill]] %s7149_s3  ;;  %s6495_s3 = smov 0  }
   0x5   :  { %7186 = sst [smem:[#allocation12_spill]] %s7150_s4 }
   0x6   :  { %7187 = sst [smem:[#allocation13_spill]] %s7151_s5 }
   0x7   :  { %7188 = sst [smem:[#allocation14_spill]] %s7152_s6 }
   0x8   :  { %7189 = sst [smem:[#allocation15_spill]] %s7153_s7  ;;  %s6497_s7 = smov 0  }
   0x9   :  { %7190 = sst [smem:[#allocation16_spill]] %s7154_s8 }
   0xa   :  { %7191 = sst [smem:[#allocation17_spill]] %s7155_s9 }
   0xb   :  { %7192 = sst [smem:[#allocation18_spill]] %s7156_s10 }
   0xc   :  { %7193 = sst [smem:[#allocation19_spill]] %s7158_s12 }
   0xd   :  { %7194 = sst [smem:[#allocation20_spill]] %s7163_s17 }
   0xe   :  { %7195 = sst [smem:[#allocation21_spill]] %s7164_s18 }
   0xf   :  { %7196 = sst [smem:[#allocation22_spill]] %s7165_s19 }
  0x10   :  { %7197 = sst [smem:[#allocation23_spill]] %s7166_s20 }
  0x11   :  { %7198 = sst [smem:[#allocation24_spill]] %s7167_s21 }
  0x12   :  { %7199 = sst [smem:[#allocation25_spill]] %s7168_s22 }
  0x13   :  { %7200 = sst [smem:[#allocation26_spill]] %s7169_s23 }
  0x14   :  { %7201 = sst [smem:[#allocation27_spill]] %s7170_s24 }
  0x15   :  { %7202 = sst [smem:[#allocation28_spill]] %s7171_s25 }
  0x16   :  { %7203 = sst [smem:[#allocation29_spill]] %s7172_s26 }
  0x17 LB: > { %7204 = sst [smem:[#allocation2_spill]] %s6335_s27  ;;  %s45_s28 = sadd.s32 1, %s6339_s3  ;;  %s6343_s7 = sphi %s6497_s7, %s36_s7   ;;  %s6339_s3 = sphi %s6495_s3, %s7267_s3   ;;  %s6335_s27 = sphi %s6493_s27, %s7266_s27  }
  0x18   : > { %7205 = sst [smem:[#allocation3_spill]] %s6339_s3  ;;  %p5621_p0 = scmp.ge.s32.totalorder %s6343_s7, 1 }
  0x19   : > { %7206 = sst [smem:[#allocation4_spill]] %s6343_s7  ;;  %p46_p1 = scmp.ge.s32.totalorder %s45_s28, 2 }
  0x1a   : > { %p940_p2 = scmp.lt.s32.totalorder %s6343_s7, 3 }
  0x1b   : > { %s7269_s28 = smov (%p46_p1, %s45_s28), 0 }
  0x1c   : > { %7207 = sst [smem:[#allocation5_spill]] %s7269_s28  ;;  %p941_p3 = pnand %p5621_p0, %p940_p2 }
  0x1e   : > { %944 = sbr.rel (%p941_p3) target bundleno = 7264 (0x1c60), region = 124 }
  0x25   : > { %p1111_p4 = scmp.lt.s32.totalorder %s6335_s27, 1  ;;  %s7209_s10 = sld [smem:[#allocation10_spill]] }
  0x26   : > { %s7211_s3 = sld [smem:[#allocation12_spill]]  ;;  %s7218_s24 = sld [smem:[#allocation18_spill]] }
  0x27   : > { %s6515_s8 = scalar_select %p1111_p4, %s6335_s27, 1 }
  0x28   : > { %s7219_s12 = sld [smem:[#allocation19_spill]]  ;;  %s7221_s18 = sld [smem:[#allocation21_spill]] }
  0x29   : > { %s5731_s4 = sshll.u32 %s6515_s8, 5  ;;  %s5736_s25 = sshll.u32 %s6515_s8, 6 }
  0x2a   : > { %s7223_s20 = sld [smem:[#allocation23_spill]]  ;;  %s7225_s21 = sld [smem:[#allocation25_spill]] }
  0x2b   : > { %s6525_s6 = scalar_lea.vmem %s7209_s10, %s5731_s4 }
  0x2c   : > { %7210 = sst [smem:[#allocation6_spill]] %s6525_s6  ;;  %s6530_s7 = scalar_lea.vmem %s7211_s3, %s5731_s4 }
  0x2d   : > { %7212 = sst [smem:[#allocation7_spill]] %s6530_s7  ;;  %s6555_s23 = scalar_lea.vmem %s7218_s24, %s5731_s4 }
  0x2e   : > { %s6564_s2 = scalar_lea.vmem %s7219_s12, %s5731_s4  ;;  %s6589_s10 = scalar_lea.vmem %s7221_s18, %s5731_s4 }
  0x2f   : > { %s7224_s3 = sld [smem:[#allocation24_spill]] }
  0x30   : > { %s6599_s26 = scalar_lea.vmem %s7223_s20, %s5736_s25  ;;  %s1185_s9 = scalar_lea.vmem %s7225_s21, %s6515_s8 }
  0x31   : > { %s7229_s20 = sld [smem:[#allocation2_spill]] }
  0x35   : > { %s1182_s30 = scalar_lea.vmem %s7224_s3, %s6515_s8 }
  0x37   : > { %p5634_p5 = scmp.ne.s32.totalorder %s7229_s20, 0 }
  0x38   : > { %s7230_s22 = sld [smem:[#allocation8_spill]] (!%p5634_p5)  ;;  %vm1207_vm0 = vcmask (!%p5634_p5), 261120   ;;  %s7231_s4 = sld [smem:[#allocation29_spill]] (!%p5634_p5) }
  0x39   : > { %1204 = sbr.rel (%p5634_p5) target bundleno = 64 (0x40), region = 128 }
  0x3e   : > { %v1205_v0 = vld [vmem:[%s7230_s22] sm:$0xff] (!%p5634_p5)  ;;  %v1206_v1 = vld [vmem:[%s7230_s22 + $0x8] sm:$0xff] (!%p5634_p5) }
  0x3f   : > { %1208 = vst.msk [vmem:[%s7231_s4] sm:$0xff] (!%p5634_p5), %vm1207_vm0, %v1205_v0  ;;  %1209 = vst.msk [vmem:[%s7231_s4 + $0x8] sm:$0xff] (!%p5634_p5), %vm1207_vm0, %v1206_v1 }
  0x40 PF: > { %s7232_s17 = sld [smem:[#allocation6_spill]]  ;;  %vm1232_vm1 = vcmask 261120   ;;  %s7233_s28 = sld [smem:[#allocation29_spill]]  ;;  %v6345_v10 = vmov 0.0   ;;  %vm6346_vm2 = vmmov 0   ;;  %vm1317_vm3 = vcmask 64512  }
  0x41   : > { %5880 = vmatprep.subr.mxu0 %v6345_v10  ;;  %5882 = vmatprep.mubr.msk.f32.mxu0 %vm6346_vm2, %v6345_v10  ;;  %s7234_s21 = sld [smem:[#allocation11_spill]]  ;;  %s6347_s12 = smov 96   ;;  %vm5128_vm4 = vcmask 523264  }
  0x42   : > { %s6348_s0 = smov 88   ;;  %s6349_s4 = smov 120  }
  0x43   : > { %s6350_s1 = smov 64   ;;  %s6351_s5 = smov 56  }
  0x44   : > { %s6353_s20 = smov 112   ;;  %s7236_s7 = sld [smem:[#allocation7_spill]] }
  0x45   : > { %s6354_s24 = smov 48   ;;  %s6355_s25 = smov 72  }
  0x46   : > { %v1214_v2 = vld [vmem:[%s7232_s17] sm:$0xff]  ;;  %v1215_v3 = vld [vmem:[%s7232_s17 + $0x8] sm:$0xff]  ;;  %v1216_v4 = vld [vmem:[%s7232_s17 + $0x10] sm:$0xff]  ;;  %s6356_s3 = smov 104   ;;  %s6357_s29 = smov 40  }
  0x47   : > { %v6122_v5 = vpack.c.bf16 %v1215_v3, %v1214_v2  ;;  %v1217_v6 = vld [vmem:[%s7232_s17 + $0x18] sm:$0xff]  ;;  %v6641_v7 = vld [vmem:[%s7233_s28] sm:$0xff]  ;;  %v6648_v9 = vld [vmem:[%s7233_s28 + $0x8] sm:$0xff]  ;;  %s7235_s6 = scalar_lea.vmem %s7234_s21, %s6515_s8  ;;  %s6352_s17 = smov 80  }
  0x48   : > { %v6126_v8 = vpack.c.bf16 %v1217_v6, %v1216_v4  ;;  %5867 = vmatprep.mubr.msk.f32.mxu1 %vm1232_vm1, %v6641_v7  ;;  %v5635_v11 = vld [vmem:[%s7235_s6] ss:$0 sm:$0xff]  ;;  %s7247_s19 = sld [smem:[#allocation17_spill]]  ;;  %s7252_s6 = scalar_lea.vmem %s7162_s16, %s6515_s8 }
  0x49   : > { %6123 = vmatprep.subr.bf16.mxu1 %v6122_v5 }
  0x4a   : > { %6125 = vmatpush3.bf16.msra.mxu1 %v6122_v5  ;;  %v1220_v2 = vld [vmem:[%s7236_s7 + $0x8] sm:$0xff]  ;;  %v1219_v3 = vld [vmem:[%s7236_s7] sm:$0xff] }
  0x4b   : > { %6127 = vmatprep.subr.bf16.mxu1 %v6126_v8 }
  0x4e   : > { %6129 = vmatpush3.bf16.msra.mxu1 %v6126_v8  ;;  %s7248_s18 = scalar_lea.vmem %s7247_s19, %s6515_s8 }
  0x4f   : > { %5870 = vmatprep.subr.mxu1 %v6345_v10 }
  0x51   : > { %5868 = vmatmul.mubr.msk.f32.vlgmr.msra.gmra.mrb[0].mxu1 %vm1232_vm1, %v6648_v9 }
  0x52   : > { %5872 = vmatprep.mubr.msk.f32.mxu1 %vm6346_vm2, %v6345_v10 }
 0x124   : > { %v5869_v12 = vpop.f32.mrb[0].mxu1 }
 0x125   : > { %v1305_v13 = vpop.f32.mrb[1].mxu1  ;;  %v6667_v15 = vadd.f32 %v5869_v12, %v5635_v11 }
 0x126   : > { %v6663_v14 = vadd.f32 %v5635_v11, %v1305_v13 }
 0x128   : > { %1315 = vrot.lane.b32.xlu0 %v6663_v14, %s6347_s12 }
 0x12c   : > { %1393 = vrot.lane.b32.xlu0 %v6667_v15, %s6347_s12 }
 0x130   : > { %1723 = vrot.lane.b32.xlu0 %v6667_v15, %s6348_s0 }
 0x134   : > { %1721 = vrot.lane.b32.xlu0 %v6667_v15, %s6349_s4 }
 0x19a   : > { %v1316_v16 = vpop.permute.xlu0 %1315 }
 0x19b   : > { %5871 = vmatpush3.xpose.msk.msra.mxu1 %vm1317_vm3, %v1316_v16 }
 0x19c   : > { %5875 = vmatprep.subr.mxu1 %v6345_v10 }
 0x19e   : > { %5873 = vmatmul.mubr.msk.f32.vlgmr.msra.gmra.mrb[2].mxu1 %vm1317_vm3, %v6663_v14  ;;  %v1394_v17 = vpop.permute.xlu0 %1393 }
 0x19f   : > { %5876 = vmatpush3.xpose.msk.msra.mxu1 %vm1317_vm3, %v1394_v17  ;;  %5877 = vmatprep.mubr.msk.f32.mxu1 %vm6346_vm2, %v6345_v10 }
 0x1a0   : > { %5885 = vmatprep.subr.mxu1 %v6345_v10 }
 0x1a2   : > { %5878 = vmatmul.mubr.msk.f32.vlgmr.msra.gmra.mrb[4].mxu1 %vm1317_vm3, %v6667_v15  ;;  %v1724_v24 = vpop.permute.xlu0 %1723 }
 0x1a3   : > { %5887 = vmatprep.mubr.msk.f32.mxu1 %vm6346_vm2, %v6345_v10 }
 0x1a6   : > { %v1722_v25 = vpop.permute.xlu0 %1721 }
 0x271   : > { %v1388_v18 = vpop.f32.mrb[2].mxu1 }
 0x272   : > { %v5874_v19 = vpop.f32.mrb[3].mxu1  ;;  %v1469_v20 = vsel %vm1317_vm3, %v1388_v18, -inf }
 0x273   : > { %1470 = vmax.xlane.f32.xlu0 %v1469_v20 }
 0x275   : > { %v1465_v21 = vpop.f32.mrb[4].mxu1 }
 0x276   : > { %v5879_v22 = vpop.f32.mrb[5].mxu1  ;;  %v1472_v23 = vsel %vm1317_vm3, %v1465_v21, -inf }
 0x277   : > { %1473 = vmax.xlane.f32.xlu1 %v1472_v23 }
 0x288   : > { %1557 = vrot.lane.b32.xlu1 %v6667_v15, %s6350_s1 }
 0x289   : > { %1887 = vrot.lane.b32.xlu0 %v6667_v15, %s6351_s5 }
 0x28c   : > { %1481 = vrot.lane.b32.xlu1 %v6663_v14, %s6350_s1  ;;  %s7237_s1 = sld [smem:[#allocation13_spill]] }
 0x28d   : > { %2137 = vrot.lane.b32.xlu0 %v6663_v14, %s6352_s17 }
 0x290   : > { %1645 = vrot.lane.b32.xlu1 %v6663_v14, %s6348_s0 }
 0x291   : > { %2215 = vrot.lane.b32.xlu0 %v6667_v15, %s6352_s17 }
 0x294   : > { %1643 = vrot.lane.b32.xlu1 %v6663_v14, %s6349_s4 }
 0x295   : > { %2213 = vrot.lane.b32.xlu0 %v6667_v15, %s6353_s20 }
 0x300   : > { %v1471_v26 = vpop.xlane.xlu0 %1470 }
 0x301   : > { %v1475_v27 = vsub.f32 %v1388_v18, %v1471_v26 }
 0x303   : > { %v1477_v28 = vmul.f32 1.442695, %v1475_v27 }
 0x304   : > { %v1474_v29 = vpop.xlane.xlu1 %1473  ;;  %v1888_v38 = vpop.permute.xlu0 %1887 }
 0x305   : > { %6229 = vpow2.f32 %v1477_v28  ;;  %v1476_v30 = vsub.f32 %v1465_v21, %v1474_v29 }
 0x307   : > { %v1479_v31 = vmul.f32 1.442695, %v1476_v30 }
 0x308   : > { %v1558_v32 = vpop.permute.xlu1 %1557  ;;  %v2138_v50 = vpop.permute.xlu0 %2137 }
 0x309   : > { %6231 = vpow2.f32 %v1479_v31  ;;  %5886 = vmatpush3.msra.mxu1 %v1558_v32 }
 0x30a   : > { %5895 = vmatprep.subr.mxu1 %v6345_v10 }
 0x30c   : > { %v1482_v33 = vpop.permute.xlu1 %1481  ;;  %v2216_v51 = vpop.permute.xlu0 %2215 }
 0x30d   : > { %5881 = vmatpush3.msra.mxu0 %v1482_v33 }
 0x30e   : > { %5890 = vmatprep.subr.mxu0 %v6345_v10 }
 0x30f   : > { %v6230_v34 = vpop.eup %6229 }
 0x310   : > { %v1646_v35 = vpop.permute.xlu1 %1645  ;;  %5883 = vmatmul.mubr.msk.f32.vlgmr.msra.gmra.mrb[0].mxu0 %vm1317_vm3, %v6230_v34  ;;  %v1633_v49 = vsel %vm1317_vm3, %v6230_v34, 0.0  ;;  %v2214_v52 = vpop.permute.xlu0 %2213 }
 0x311   : > { %5892 = vmatprep.mubr.msk.f32.mxu0 %vm6346_vm2, %v6345_v10 }
 0x313   : > { %v6232_v36 = vpop.eup %6231 }
 0x314   : > { %5888 = vmatmul.mubr.msk.f32.vlgmr.msra.gmra.mrb[6].mxu1 %vm1317_vm3, %v6232_v36  ;;  %5891 = vmatpush3.xpose.msk.msra.mxu0 %vm1317_vm3, %v1646_v35  ;;  %v1644_v37 = vpop.permute.xlu1 %1643  ;;  %v1636_v1 = vsel %vm1317_vm3, %v6232_v36, 0.0 }
 0x315   : > { %5896 = vmatpush3.xpose.msk.msra.mxu1 %vm1317_vm3, %v1724_v24  ;;  %5897 = vmatprep.mubr.msk.f32.mxu1 %vm6346_vm2, %v6345_v10 }
 0x316   : > { %5905 = vmatprep.subr.mxu1 %v6345_v10  ;;  %5900 = vmatprep.subr.mxu0 %v6345_v10 }
 0x317   : > { %5893 = vmatmul.mubr.msk.f32.vlgmr.msra.gmra.mrb[2].mxu0 %vm1317_vm3, %v1644_v37 }
 0x318   : > { %5898 = vmatmul.mubr.msk.f32.vlgmr.msra.gmra.mrb[8].mxu1 %vm1317_vm3, %v1722_v25  ;;  %5902 = vmatprep.mubr.msk.f32.mxu0 %vm6346_vm2, %v6345_v10 }
 0x319   : > { %5906 = vmatpush3.msra.mxu1 %v1888_v38  ;;  %5907 = vmatprep.mubr.msk.f32.mxu1 %vm6346_vm2, %v6345_v10 }
 0x31a   : > { %5920 = vmatprep.subr.mxu1 %v6345_v10 }
 0x3e3   : > { %v6722_v39 = vpop.f32.mrb[0].mxu0 }
 0x3e4   : > { %v5884_v40 = vpop.f32.mrb[1].mxu0 }
 0x3e7   : > { %v6724_v41 = vpop.f32.mrb[6].mxu1 }
 0x3e8   : > { %v5889_v42 = vpop.f32.mrb[7].mxu1 }
 0x3ea   : > { %v1717_v43 = vpop.f32.mrb[2].mxu0 }
 0x3eb   : > { %v5894_v44 = vpop.f32.mrb[3].mxu0  ;;  %v1795_v45 = vpop.f32.mrb[8].mxu1  ;;  %v1799_v46 = vsel %vm1317_vm3, %v1717_v43, -inf }
 0x3ec   : > { %v5899_v47 = vpop.f32.mrb[9].mxu1  ;;  %1800 = vmax.xlane.f32.xlu0 %v1799_v46  ;;  %v1802_v48 = vsel %vm1317_vm3, %v1795_v45, -inf  ;;  %v1221_v44 = vld [vmem:[%s7236_s7 + $0x10] sm:$0xff] }
 0x3ed   : > { %1803 = vmax.xlane.f32.xlu1 %v1802_v48 }
 0x3f0   : > { %1634 = vadd.xlane.f32.xlu0 %v1633_v49 }
 0x3fe   : > { %2135 = vrot.lane.b32.xlu1 %v6663_v14, %s6353_s20 }
 0x402   : > { %1811 = vrot.lane.b32.xlu1 %v6663_v14, %s6351_s5  ;;  %s7238_s5 = scalar_lea.vmem %s7237_s1, %s6515_s8 }
 0x479   : > { %v1801_v53 = vpop.xlane.xlu0 %1800 }
 0x47a   : > { %v1805_v54 = vsub.f32 %v1717_v43, %v1801_v53  ;;  %v1804_v55 = vpop.xlane.xlu1 %1803 }
 0x47b   : > { %v1806_v56 = vsub.f32 %v1795_v45, %v1804_v55 }
 0x47c   : > { %v1807_v57 = vmul.f32 1.442695, %v1805_v54 }
 0x47d   : > { %v1809_v58 = vmul.f32 1.442695, %v1806_v56  ;;  %v1635_v4 = vpop.xlane.xlu0 %1634 }
 0x47e   : > { %6233 = vpow2.f32 %v1807_v57  ;;  %v2136_v59 = vpop.permute.xlu1 %2135 }
 0x47f   : > { %6235 = vpow2.f32 %v1809_v58 }
 0x480   : > { %6237 = vrcp.f32 %v1635_v4 }
 0x482   : > { %v1812_v60 = vpop.permute.xlu1 %1811 }
 0x483   : > { %5901 = vmatpush3.msra.mxu0 %v1812_v60 }
 0x484   : > { %5910 = vmatprep.subr.mxu0 %v1220_v2 }
 0x488   : > { %v6234_v61 = vpop.eup %6233 }
 0x489   : > { %v6236_v62 = vpop.eup %6235  ;;  %5903 = vmatmul.mubr.msk.f32.vlgmr.msra.gmra.mrb[4].mxu0 %vm1317_vm3, %v6234_v61  ;;  %v1963_v63 = vsel %vm1317_vm3, %v6234_v61, 0.0 }
 0x48a   : > { %5908 = vmatmul.mubr.msk.f32.vlgmr.msra.gmra.mrb[10].mxu1 %vm1317_vm3, %v6236_v62  ;;  %1964 = vadd.xlane.f32.xlu1 %v1963_v63  ;;  %v1966_v0 = vsel %vm1317_vm3, %v6236_v62, 0.0  ;;  %v6238_v11 = vpop.eup %6237 }
 0x48b   : > { %5921 = vmatpush3.xpose.msk.msra.mxu1 %vm1317_vm3, %v2138_v50  ;;  %1967 = vadd.xlane.f32.xlu0 %v1966_v0  ;;  %v1641_v22 = vmul.f32 %v6238_v11, %v6722_v39 }
 0x48c   : > { %5922 = vmatprep.mubr.msk.f32.mxu1 %vm6346_vm2, %v6345_v10  ;;  %5925 = vmatprep.subr.mxu1 %v6345_v10 }
 0x48d   : > { %5911 = vmatpush3.msra.mxu0 %v1220_v2 }
 0x48e   : > { %5923 = vmatmul.mubr.msk.f32.vlgmr.msra.gmra.mrb[12].mxu1 %vm1317_vm3, %v2136_v59  ;;  %5915 = vmatprep.subr.mxu0 %v1219_v3 }
 0x48f   : > { %5926 = vmatpush3.xpose.msk.msra.mxu1 %vm1317_vm3, %v2216_v51  ;;  %1637 = vadd.xlane.f32.xlu0 %v1636_v1 }
 0x490   : > { %5927 = vmatprep.mubr.msk.f32.mxu1 %vm6346_vm2, %v6345_v10  ;;  %5935 = vmatprep.subr.mxu1 %v6345_v10 }
 0x492   : > { %5928 = vmatmul.mubr.msk.f32.vlgmr.msra.gmra.mrb[14].mxu1 %vm1317_vm3, %v2214_v52 }
 0x493   : > { %5937 = vmatprep.mubr.msk.f32.mxu1 %vm6346_vm2, %v6345_v10 }
 0x517   : > { %v1965_v5 = vpop.xlane.xlu1 %1964 }
 0x518   : > { %v1968_v6 = vpop.xlane.xlu0 %1967  ;;  %6239 = vrcp.f32 %v1965_v5 }
 0x519   : > { %6241 = vrcp.f32 %v1968_v6 }
 0x51c   : > { %v1638_v8 = vpop.xlane.xlu0 %1637 }
 0x51d   : > { %6243 = vrcp.f32 %v1638_v8 }
 0x522   : > { %v6240_v12 = vpop.eup %6239 }
 0x523   : > { %v6242_v16 = vpop.eup %6241 }
 0x527   : > { %v6244_v26 = vpop.eup %6243 }
 0x528   : > { %v1642_v28 = vmul.f32 %v6244_v26, %v6724_v41  ;;  %v5670_v26 = vld [vmem:[%s7238_s5] ss:$0 sm:$0xff]  ;;  %s7241_s5 = sld [smem:[#allocation15_spill]] }
 0x52e   : > { %s7242_s27 = scalar_lea.vmem %s7241_s5, %s6515_s8 }
 0x55c   : > { %v1883_v13 = vpop.f32.mrb[4].mxu0 }
 0x55d   : > { %v1971_v17 = vmul.f32 %v6240_v12, %v1883_v13  ;;  %v5904_v18 = vpop.f32.mrb[5].mxu0  ;;  %v1959_v19 = vpop.f32.mrb[10].mxu1  ;;  %v1222_v13 = vld [vmem:[%s7236_s7 + $0x18] sm:$0xff]  ;;  %s7245_s7 = sld [smem:[#allocation16_spill]] }
 0x55e   : > { %v1972_v20 = vmul.f32 %v6242_v16, %v1959_v19  ;;  %v5909_v21 = vpop.f32.mrb[11].mxu1 }
 0x55f   : > { %5912 = vmatprep.mubr.msk.f32.mxu0 %vm1317_vm3, %v1971_v17 }
 0x560   : > { %5913 = vmatmul.mubr.msk.f32.vlgmr.msra.gmra.mrb[6].mxu0 %vm1317_vm3, %v1972_v20 }
 0x561   : > { %5917 = vmatprep.mubr.msk.f32.mxu0 %vm1317_vm3, %v1641_v22  ;;  %v2209_v23 = vpop.f32.mrb[12].mxu1  ;;  %5916 = vmatpush3.msra.mxu0 %v1219_v3 }
 0x562   : > { %v5924_v24 = vpop.f32.mrb[13].mxu1  ;;  %v2291_v25 = vsel %vm1317_vm3, %v2209_v23, -inf  ;;  %5930 = vmatprep.subr.mxu0 %v6345_v10 }
 0x563   : > { %2292 = vmax.xlane.f32.xlu0 %v2291_v25 }
 0x565   : > { %v2287_v27 = vpop.f32.mrb[14].mxu1 }
 0x566   : > { %v5929_v29 = vpop.f32.mrb[15].mxu1  ;;  %v2294_v30 = vsel %vm1317_vm3, %v2287_v27, -inf }
 0x567   : > { %2295 = vmax.xlane.f32.xlu1 %v2294_v30 }
 0x568   : > { %5918 = vmatmul.mubr.msk.f32.vlgmr.msra.gmra.mrb[6].mxu0 %vm1317_vm3, %v1642_v28 }
 0x569   : > { %5932 = vmatprep.mubr.msk.f32.mxu0 %vm6346_vm2, %v6345_v10 }
 0x578   : > { %2379 = vrot.lane.b32.xlu1 %v6667_v15, %s6354_s24 }
 0x579   : > { %2303 = vrot.lane.b32.xlu0 %v6663_v14, %s6354_s24  ;;  %s7243_s24 = sld [smem:[#allocation9_spill]] }
 0x57c   : > { %2628 = vrot.lane.b32.xlu1 %v6667_v15, %s6355_s25 }
 0x57d   : > { %2550 = vrot.lane.b32.xlu0 %v6663_v14, %s6355_s25 }
 0x5f0   : > { %v2293_v31 = vpop.xlane.xlu0 %2292 }
 0x5f1   : > { %v2297_v32 = vsub.f32 %v2209_v23, %v2293_v31 }
 0x5f3   : > { %v2299_v33 = vmul.f32 1.442695, %v2297_v32 }
 0x5f4   : > { %v2296_v34 = vpop.xlane.xlu1 %2295  ;;  %v2304_v35 = vpop.permute.xlu0 %2303 }
 0x5f5   : > { %6245 = vpow2.f32 %v2299_v33  ;;  %v2298_v36 = vsub.f32 %v2287_v27, %v2296_v34  ;;  %5931 = vmatpush3.msra.mxu0 %v2304_v35 }
 0x5f6   : > { %5940 = vmatprep.subr.mxu0 %v1221_v44 }
 0x5f7   : > { %v2301_v37 = vmul.f32 1.442695, %v2298_v36 }
 0x5f8   : > { %v2380_v38 = vpop.permute.xlu1 %2379  ;;  %v2551_v42 = vpop.permute.xlu0 %2550 }
 0x5f9   : > { %6247 = vpow2.f32 %v2301_v37  ;;  %5936 = vmatpush3.msra.mxu1 %v2380_v38 }
 0x5fa   : > { %5945 = vmatprep.subr.mxu1 %v6345_v10 }
 0x5fc   : > { %v2629_v45 = vpop.permute.xlu1 %2628 }
 0x5ff   : > { %v6246_v39 = vpop.eup %6245 }
 0x600   : > { %5933 = vmatmul.mubr.msk.f32.vlgmr.msra.gmra.mrb[8].mxu0 %vm1317_vm3, %v6246_v39  ;;  %v2455_v40 = vsel %vm1317_vm3, %v6246_v39, 0.0 }
 0x601   : > { %2456 = vadd.xlane.f32.xlu1 %v2455_v40  ;;  %5941 = vmatpush3.msra.mxu0 %v1221_v44 }
 0x602   : > { %5950 = vmatprep.subr.mxu0 %v6345_v10 }
 0x603   : > { %v6248_v41 = vpop.eup %6247 }
 0x604   : > { %5938 = vmatmul.mubr.msk.f32.vlgmr.msra.gmra.mrb[16].mxu1 %vm1317_vm3, %v6248_v41  ;;  %v2458_v43 = vsel %vm1317_vm3, %v6248_v41, 0.0 }
 0x605   : > { %5946 = vmatpush3.xpose.msk.msra.mxu1 %vm1317_vm3, %v2551_v42  ;;  %2459 = vadd.xlane.f32.xlu0 %v2458_v43 }
 0x606   : > { %5947 = vmatprep.mubr.msk.f32.mxu1 %vm6346_vm2, %v6345_v10  ;;  %5955 = vmatprep.subr.mxu1 %v6345_v10 }
 0x612   : > { %2548 = vrot.lane.b32.xlu1 %v6663_v14, %s6356_s3 }
 0x61b   : > { %2626 = vrot.lane.b32.xlu0 %v6667_v15, %s6356_s3 }
 0x68e   : > { %v2457_v46 = vpop.xlane.xlu1 %2456 }
 0x68f   : > { %6249 = vrcp.f32 %v2457_v46 }
 0x692   : > { %v2549_v47 = vpop.permute.xlu1 %2548  ;;  %v2460_v48 = vpop.xlane.xlu0 %2459 }
 0x693   : > { %5948 = vmatmul.mubr.msk.f32.vlgmr.msra.gmra.mrb[18].mxu1 %vm1317_vm3, %v2549_v47  ;;  %6251 = vrcp.f32 %v2460_v48 }
 0x694   : > { %5957 = vmatprep.mubr.msk.f32.mxu1 %vm6346_vm2, %v6345_v10 }
 0x696   : > { %v2627_v57 = vpop.permute.xlu0 %2626 }
 0x699   : > { %v6250_v49 = vpop.eup %6249 }
 0x69d   : > { %v6252_v53 = vpop.eup %6251 }
 0x6d3   : > { %v2375_v50 = vpop.f32.mrb[8].mxu0 }
 0x6d4   : > { %v2463_v51 = vmul.f32 %v6250_v49, %v2375_v50  ;;  %v5934_v52 = vpop.f32.mrb[9].mxu0 }
 0x6d6   : > { %5942 = vmatprep.mubr.msk.f32.mxu0 %vm1317_vm3, %v2463_v51 }
 0x6d7   : > { %v2451_v54 = vpop.f32.mrb[16].mxu1 }
 0x6d8   : > { %v2464_v55 = vmul.f32 %v6252_v53, %v2451_v54  ;;  %v5939_v56 = vpop.f32.mrb[17].mxu1 }
 0x6da   : > { %5943 = vmatmul.mubr.msk.f32.vlgmr.msra.gmra.mrb[6].mxu0 %vm1317_vm3, %v2464_v55  ;;  %v5672_v55 = vld [vmem:[%s7242_s27] ss:$0 sm:$0xff]  ;;  %s7253_s27 = sld [smem:[#allocation20_spill]] }
 0x6db   : > { %5951 = vmatpush3.xpose.msk.msra.mxu0 %vm1317_vm3, %v2629_v45  ;;  %5952 = vmatprep.mubr.msk.f32.mxu0 %vm6346_vm2, %v6345_v10 }
 0x6dc   : > { %5960 = vmatprep.subr.mxu0 %v6345_v10 }
 0x6de   : > { %5953 = vmatmul.mubr.msk.f32.vlgmr.msra.gmra.mrb[10].mxu0 %vm1317_vm3, %v2627_v57 }
 0x6df   : > { %5962 = vmatprep.mubr.msk.f32.mxu0 %vm6346_vm2, %v6345_v10 }
 0x766   : > { %v2622_v58 = vpop.f32.mrb[18].mxu1 }
 0x767   : > { %v5949_v59 = vpop.f32.mrb[19].mxu1  ;;  %v2704_v60 = vsel %vm1317_vm3, %v2622_v58, -inf }
 0x768   : > { %2705 = vmax.xlane.f32.xlu1 %v2704_v60 }
 0x779   : > { %2792 = vrot.lane.b32.xlu1 %v6667_v15, %s6357_s29 }
 0x7b1   : > { %v2700_v61 = vpop.f32.mrb[10].mxu0 }
 0x7b2   : > { %v5954_v62 = vpop.f32.mrb[11].mxu0  ;;  %v2707_v63 = vsel %vm1317_vm3, %v2700_v61, -inf }
 0x7b3   : > { %2708 = vmax.xlane.f32.xlu0 %v2707_v63 }
 0x7c9   : > { %2716 = vrot.lane.b32.xlu0 %v6663_v14, %s6357_s29  ;;  %s7239_s29 = sld [smem:[#allocation14_spill]] }
 0x7cf   : > { %s7240_s21 = scalar_lea.vmem %s7239_s29, %s6515_s8  ;;  %s7246_s29 = scalar_lea.vmem %s7245_s7, %s6515_s8 }
 0x7d0   : > { %v5671_v52 = vld [vmem:[%s7240_s21] ss:$0 sm:$0xff]  ;;  %s7254_s7 = scalar_lea.vmem %s7253_s27, %s6515_s8  ;;  %s7263_s27 = sld [smem:[#allocation28_spill]] }
 0x7f5   : > { %v2706_v0 = vpop.xlane.xlu1 %2705 }
 0x7f6   : > { %v2710_v1 = vsub.f32 %v2622_v58, %v2706_v0 }
 0x7f8   : > { %v2712_v2 = vmul.f32 1.442695, %v2710_v1 }
 0x7f9   : > { %v2793_v3 = vpop.permute.xlu1 %2792 }
 0x7fa   : > { %6253 = vpow2.f32 %v2712_v2  ;;  %5961 = vmatpush3.msra.mxu0 %v2793_v3 }
 0x7fb   : > { %5965 = vmatprep.subr.mxu0 %v1222_v13 }
 0x804   : > { %v6254_v4 = vpop.eup %6253 }
 0x805   : > { %v2868_v5 = vsel %vm1317_vm3, %v6254_v4, 0.0 }
 0x806   : > { %2869 = vadd.xlane.f32.xlu1 %v2868_v5 }
 0x840   : > { %v2709_v6 = vpop.xlane.xlu0 %2708 }
 0x841   : > { %v2711_v15 = vsub.f32 %v2700_v61, %v2709_v6 }
 0x843   : > { %v2714_v8 = vmul.f32 1.442695, %v2711_v15 }
 0x844   : > { %v2717_v11 = vpop.permute.xlu0 %2716 }
 0x845   : > { %6255 = vpow2.f32 %v2714_v8  ;;  %5956 = vmatpush3.msra.mxu1 %v2717_v11  ;;  %v3062_v11 = vld [vmem:[%s6555_s23 + $0x10] sm:$0xff] }
 0x846   : > { %5958 = vmatmul.mubr.msk.f32.vlgmr.msra.gmra.mrb[20].mxu1 %vm1317_vm3, %v6254_v4 }
 0x84f   : > { %v6256_v14 = vpop.eup %6255 }
 0x850   : > { %5963 = vmatmul.mubr.msk.f32.vlgmr.msra.gmra.mrb[12].mxu0 %vm1317_vm3, %v6256_v14  ;;  %v2871_v12 = vsel %vm1317_vm3, %v6256_v14, 0.0  ;;  %v3063_v14 = vld [vmem:[%s6555_s23 + $0x18] sm:$0xff] }
 0x851   : > { %2872 = vadd.xlane.f32.xlu0 %v2871_v12  ;;  %5966 = vmatpush3.msra.mxu0 %v1222_v13  ;;  %v6224_v12 = vpack.i.bf16 %v3063_v14, %v3062_v11  ;;  %v3060_v13 = vld [vmem:[%s6555_s23] sm:$0xff] }
 0x893   : > { %v2870_v16 = vpop.xlane.xlu1 %2869 }
 0x894   : > { %6257 = vrcp.f32 %v2870_v16  ;;  %v3061_v16 = vld [vmem:[%s6555_s23 + $0x8] sm:$0xff]  ;;  %s7244_s23 = scalar_lea.vmem %s7157_s11, %s6515_s8 }
 0x89e   : > { %v6258_v18 = vpop.eup %6257 }
 0x8de   : > { %v2873_v17 = vpop.xlane.xlu0 %2872 }
 0x8df   : > { %6259 = vrcp.f32 %v2873_v17  ;;  %v6219_v17 = vpack.i.bf16 %v3061_v16, %v3060_v13 }
 0x8e9   : > { %v6260_v22 = vpop.eup %6259 }
 0x919   : > { %v2788_v19 = vpop.f32.mrb[20].mxu1 }
 0x91a   : > { %v2876_v20 = vmul.f32 %v6258_v18, %v2788_v19  ;;  %v5959_v21 = vpop.f32.mrb[21].mxu1  ;;  %v6130_v18 = vpack.c.bf16 %v3061_v16, %v3060_v13  ;;  %v1212_v19 = vld [vmem:[%s7243_s24] sm:$0xff] }
 0x91b   : > { %v5675_v21 = vld [vmem:[%s7244_s23] ss:$0 sm:$0xff]  ;;  %s7255_s23 = sld [smem:[#allocation22_spill]] }
 0x91c   : > { %5967 = vmatprep.mubr.msk.f32.mxu0 %vm1317_vm3, %v2876_v20  ;;  %6131 = vmatprep.subr.bf16.mxu1 %v6130_v18  ;;  %v6134_v20 = vpack.c.bf16 %v3063_v14, %v3062_v11 }
 0x91d   : > { %6133 = vmatpush3.bf16.msra.mxu1 %v6130_v18 }
 0x91e   : > { %6135 = vmatprep.subr.bf16.mxu1 %v6134_v20 }
 0x921   : > { %6137 = vmatpush3.bf16.msra.mxu1 %v6134_v20 }
 0x922   : > { %5992 = vmatprep.subr.mxu1 %v6345_v10 }
 0x923   : > { %v2864_v23 = vpop.f32.mrb[12].mxu0 }
 0x924   : > { %v2877_v24 = vmul.f32 %v6260_v22, %v2864_v23  ;;  %v5964_v25 = vpop.f32.mrb[13].mxu0 }
 0x926   : > { %5968 = vmatmul.mubr.msk.f32.vlgmr.msra.gmra.mrb[6].mxu0 %vm1317_vm3, %v2877_v24 }
 0x927   : > { %5989 = vmatprep.mubr.msk.f32.mxu0 %vm1232_vm1, %v1212_v19 }
 0x9f9   : > { %v5969_v27 = vpop.f32.mrb[6].mxu0 }
 0x9fa   : > { %v2968_v28 = vadd.f32 %v5969_v27, %v5670_v26  ;;  %v2950_v29 = vpop.f32.mrb[7].mxu0 }
 0x9fb   : > { %v2967_v30 = vadd.f32 %v5670_v26, %v2950_v29 }
 0x9fc   : > { %v2970_v31 = vadd.f32 %v2968_v28, %v6648_v9 }
 0x9fd   : > { %v2969_v32 = vadd.f32 %v2967_v30, %v6641_v7 }
 0x9fe   : > { %v2974_v33 = vsel %vm1232_vm1, %v2970_v31, 0.0 }
 0x9ff   : > { %2975 = vadd.xlane.f32.xlu1 %v2974_v33  ;;  %v2971_v34 = vsel %vm1232_vm1, %v2969_v32, 0.0 }
 0xa00   : > { %2972 = vadd.xlane.f32.xlu0 %v2971_v34 }
 0xa8c   : > { %v2976_v35 = vpop.xlane.xlu1 %2975 }
 0xa8d   : > { %v2979_v36 = vmul.f32 0.03125, %v2976_v35  ;;  %v2973_v37 = vpop.xlane.xlu0 %2972 }
 0xa8e   : > { %v2978_v38 = vmul.f32 0.03125, %v2973_v37  ;;  %v1213_v37 = vld [vmem:[%s7243_s24 + $0x8] sm:$0xff] }
 0xa8f   : > { %v2981_v39 = vsub.f32 %v2970_v31, %v2979_v36 }
 0xa90   : > { %v2980_v40 = vsub.f32 %v2969_v32, %v2978_v38  ;;  %v5673_v38 = vld [vmem:[%s7246_s29] ss:$0 sm:$0xff] }
 0xa91   : > { %v2983_v41 = vmul.f32 %v2981_v39, %v2981_v39 }
 0xa92   : > { %v2982_v42 = vmul.f32 %v2980_v40, %v2980_v40 }
 0xa93   : > { %v2987_v43 = vsel %vm1232_vm1, %v2983_v41, 0.0 }
 0xa94   : > { %2988 = vadd.xlane.f32.xlu1 %v2987_v43  ;;  %v2984_v44 = vsel %vm1232_vm1, %v2982_v42, 0.0  ;;  %v5674_v42 = vld [vmem:[%s7248_s18] ss:$0 sm:$0xff]  ;;  %s7256_s18 = scalar_lea.vmem %s7255_s23, %s6515_s8 }
 0xa95   : > { %2985 = vadd.xlane.f32.xlu0 %v2984_v44 }
 0xb21   : > { %v2989_v45 = vpop.xlane.xlu1 %2988 }
 0xb22   : > { %v2991_v46 = vmul.f32 0.03125, %v2989_v45  ;;  %v2986_v47 = vpop.xlane.xlu0 %2985 }
 0xb23   : > { %v2990_v48 = vmul.f32 0.03125, %v2986_v47 }
 0xb24   : > { %v2993_v49 = vadd.f32 1e-05, %v2991_v46 }
 0xb25   : > { %v2992_v50 = vadd.f32 1e-05, %v2990_v48 }
 0xb26   : > { %6261 = vrsqrt.f32 %v2993_v49 }
 0xb27   : > { %6263 = vrsqrt.f32 %v2992_v50 }
 0xb30   : > { %v6262_v51 = vpop.eup %6261 }
 0xb31   : > { %v6264_v53 = vpop.eup %6263  ;;  %v2997_v54 = vmul.f32 %v6262_v51, %v2981_v39 }
 0xb32   : > { %v2996_v56 = vmul.f32 %v6264_v53, %v2980_v40 }
 0xb33   : > { %v3005_v57 = vmul.f32 %v5671_v52, %v2997_v54 }
 0xb34   : > { %v3004_v58 = vmul.f32 %v5671_v52, %v2996_v56 }
 0xb35   : > { %v3013_v59 = vadd.f32 %v5672_v55, %v3005_v57 }
 0xb36   : > { %v3012_v60 = vadd.f32 %v5672_v55, %v3004_v58 }
 0xb37   : > { %v3015_v61 = vadd.f32 %v3013_v59, %v6648_v9 }
 0xb38   : > { %v3014_v62 = vadd.f32 %v3012_v60, %v6641_v7 }
 0xb39   : > { %v3021_v63 = vsel %vm1232_vm1, %v3015_v61, 0.0 }
 0xb3a   : > { %3022 = vadd.xlane.f32.xlu1 %v3021_v63  ;;  %v3018_v0 = vsel %vm1232_vm1, %v3014_v62, 0.0 }
 0xb3b   : > { %3019 = vadd.xlane.f32.xlu0 %v3018_v0 }
 0xbc7   : > { %v3023_v1 = vpop.xlane.xlu1 %3022 }
 0xbc8   : > { %v3025_v2 = vmul.f32 0.03125, %v3023_v1  ;;  %v3020_v3 = vpop.xlane.xlu0 %3019 }
 0xbc9   : > { %v3024_v4 = vmul.f32 0.03125, %v3020_v3 }
 0xbca   : > { %v3027_v5 = vsub.f32 %v3015_v61, %v3025_v2 }
 0xbcb   : > { %v3026_v6 = vsub.f32 %v3014_v62, %v3024_v4 }
 0xbcc   : > { %v3029_v15 = vmul.f32 %v3027_v5, %v3027_v5 }
 0xbcd   : > { %v3028_v9 = vmul.f32 %v3026_v6, %v3026_v6 }
 0xbce   : > { %v3033_v7 = vsel %vm1232_vm1, %v3029_v15, 0.0 }
 0xbcf   : > { %3034 = vadd.xlane.f32.xlu1 %v3033_v7  ;;  %v3030_v8 = vsel %vm1232_vm1, %v3028_v9, 0.0 }
 0xbd0   : > { %3031 = vadd.xlane.f32.xlu0 %v3030_v8 }
 0xbe0   : > { %6225 = vrot.lane.b32.xlu1 %v6224_v12, %s6347_s12 }
 0xbe4   : > { %3175 = vrot.lane.b32.xlu1 %v5675_v21, %s6347_s12 }
 0xbe6   : > { %6220 = vrot.lane.b32.xlu0 %v6219_v17, %s6347_s12 }
 0xc5c   : > { %v3035_v22 = vpop.xlane.xlu1 %3034 }
 0xc5d   : > { %v3037_v23 = vmul.f32 0.03125, %v3035_v22  ;;  %v3032_v24 = vpop.xlane.xlu0 %3031 }
 0xc5e   : > { %v3036_v25 = vmul.f32 0.03125, %v3032_v24 }
 0xc5f   : > { %v3039_v26 = vadd.f32 1e-05, %v3037_v23 }
 0xc60   : > { %v3038_v27 = vadd.f32 1e-05, %v3036_v25  ;;  %v6226_v28 = vpop.permute.xlu1 %6225 }
 0xc61   : > { %6265 = vrsqrt.f32 %v3039_v26  ;;  %v6221_v29 = vpop.permute.xlu0 %6220  ;;  %v6228_v30 = vunpack.i.h.bf16 %v6226_v28  ;;  %v6227_v31 = vunpack.i.l.bf16 %v6226_v28 }
 0xc62   : > { %6267 = vrsqrt.f32 %v3038_v27  ;;  %v6223_v32 = vunpack.i.h.bf16 %v6221_v29  ;;  %v6222_v33 = vunpack.i.l.bf16 %v6221_v29 }
 0xc63   : > { %v6142_v35 = vpack.c.bf16 %v6228_v30, %v6227_v31 }
 0xc64   : > { %v6138_v34 = vpack.c.bf16 %v6223_v32, %v6222_v33  ;;  %v3176_v47 = vpop.permute.xlu1 %3175 }
 0xc66   : > { %6139 = vmatprep.subr.bf16.mxu0 %v6138_v34 }
 0xc67   : > { %6141 = vmatpush3.bf16.msra.mxu0 %v6138_v34 }
 0xc68   : > { %6143 = vmatprep.subr.bf16.mxu0 %v6142_v35 }
 0xc6b   : > { %v6266_v36 = vpop.eup %6265  ;;  %6145 = vmatpush3.bf16.msra.mxu0 %v6142_v35 }
 0xc6c   : > { %v6268_v39 = vpop.eup %6267  ;;  %v3043_v40 = vmul.f32 %v6266_v36, %v3027_v5  ;;  %6002 = vmatprep.subr.mxu0 %v6345_v10 }
 0xc6d   : > { %v3042_v41 = vmul.f32 %v6268_v39, %v3026_v6 }
 0xc6e   : > { %5990 = vmatmul.mubr.msk.f32.vlgmr.msra.gmra.mrb[14].mxu0 %vm1232_vm1, %v1213_v37  ;;  %v3051_v43 = vmul.f32 %v5673_v38, %v3043_v40 }
 0xc6f   : > { %v3050_v44 = vmul.f32 %v5673_v38, %v3042_v41  ;;  %6004 = vmatprep.mubr.msk.f32.mxu0 %vm6346_vm2, %v6345_v10  ;;  %v3066_v41 = vld [vmem:[%s6564_s2 + $0x8] sm:$0xff] }
 0xc70   : > { %v6870_v46 = vadd.f32 %v5674_v42, %v3051_v43 }
 0xc71   : > { %v6868_v45 = vadd.f32 %v5674_v42, %v3050_v44  ;;  %v3065_v42 = vld [vmem:[%s6564_s2] sm:$0xff] }
 0xc73   : > { %5978 = vmatprep.mubr.msk.f32.mxu1 %vm1232_vm1, %v6868_v45 }
 0xc74   : > { %5979 = vmatmul.mubr.msk.f32.vlgmr.msra.gmra.mrb[22].mxu1 %vm1232_vm1, %v6870_v46 }
 0xc75   : > { %5994 = vmatprep.mubr.msk.f32.mxu1 %vm6346_vm2, %v6345_v10 }
 0xd41   : > { %v5991_v48 = vpop.f32.mrb[14].mxu0 }
 0xd42   : > { %v6878_v49 = vadd.f32 %v5991_v48, %v3176_v47  ;;  %v3250_v50 = vpop.f32.mrb[15].mxu0 }
 0xd43   : > { %v6880_v51 = vadd.f32 %v3250_v50, %v3176_v47 }
 0xd44   : > { %3499 = vrot.lane.b32.xlu1 %v6878_v49, %s6347_s12 }
 0xd45   : > { %5993 = vmatpush3.xpose.msk.msra.mxu1 %vm1317_vm3, %v6880_v51 }
 0xd46   : > { %5997 = vmatprep.subr.mxu1 %v6345_v10 }
 0xd47   : > { %v5980_v52 = vpop.f32.mrb[22].mxu1 }
 0xd48   : > { %v3150_v53 = vpop.f32.mrb[23].mxu1  ;;  %3665 = vrot.lane.b32.xlu1 %v6878_v49, %s6349_s4  ;;  %v6891_v55 = vadd.f32 %v5980_v52, %v5675_v21 }
 0xd49   : > { %v6889_v54 = vadd.f32 %v5675_v21, %v3150_v53 }
 0xd4b   : > { %5995 = vmatmul.mubr.msk.f32.vlgmr.msra.gmra.mrb[24].mxu1 %vm1317_vm3, %v6889_v54 }
 0xd4c   : > { %5998 = vmatpush3.xpose.msk.msra.mxu1 %vm1317_vm3, %v6878_v49  ;;  %3663 = vrot.lane.b32.xlu1 %v6891_v55, %s6349_s4 }
 0xd4d   : > { %5999 = vmatprep.mubr.msk.f32.mxu1 %vm6346_vm2, %v6345_v10  ;;  %6007 = vmatprep.subr.mxu1 %v6345_v10 }
 0xd4f   : > { %6000 = vmatmul.mubr.msk.f32.vlgmr.msra.gmra.mrb[26].mxu1 %vm1317_vm3, %v6891_v55 }
 0xd50   : > { %6009 = vmatprep.mubr.msk.f32.mxu1 %vm6346_vm2, %v6345_v10 }
 0xdb6   : > { %v3500_v56 = vpop.permute.xlu1 %3499 }
 0xdb7   : > { %6008 = vmatpush3.msra.mxu1 %v3500_v56 }
 0xdb8   : > { %6017 = vmatprep.subr.mxu1 %v6345_v10 }
 0xdba   : > { %v3666_v63 = vpop.permute.xlu1 %3665 }
 0xdbe   : > { %v3664_v0 = vpop.permute.xlu1 %3663 }
 0xe1e   : > { %v3331_v57 = vpop.f32.mrb[24].mxu1 }
 0xe1f   : > { %v5996_v58 = vpop.f32.mrb[25].mxu1  ;;  %v3411_v59 = vsel %vm1317_vm3, %v3331_v57, -inf }
 0xe20   : > { %3412 = vmax.xlane.f32.xlu1 %v3411_v59 }
 0xe22   : > { %v3407_v60 = vpop.f32.mrb[26].mxu1 }
 0xe23   : > { %v6001_v61 = vpop.f32.mrb[27].mxu1  ;;  %v3414_v62 = vsel %vm1317_vm3, %v3407_v60, -inf }
 0xe24   : > { %3415 = vmax.xlane.f32.xlu0 %v3414_v62 }
 0xe31   : > { %3587 = vrot.lane.b32.xlu1 %v6880_v51, %s6349_s4 }
 0xe35   : > { %3829 = vrot.lane.b32.xlu1 %v6878_v49, %s6348_s0 }
 0xe39   : > { %4079 = vrot.lane.b32.xlu1 %v6880_v51, %s6353_s20 }
 0xe3a   : > { %3423 = vrot.lane.b32.xlu0 %v6880_v51, %s6347_s12 }
 0xe3d   : > { %4077 = vrot.lane.b32.xlu1 %v6889_v54, %s6353_s20 }
 0xe3e   : > { %3585 = vrot.lane.b32.xlu0 %v6889_v54, %s6349_s4  ;;  %s7250_s4 = scalar_lea.vmem %s7160_s14, %s6515_s8 }
 0xe41   : > { %4157 = vrot.lane.b32.xlu1 %v6878_v49, %s6353_s20 }
 0xe45   : > { %4155 = vrot.lane.b32.xlu1 %v6891_v55, %s6353_s20  ;;  %s7259_s20 = sld [smem:[#allocation26_spill]] }
 0xead   : > { %v3413_v1 = vpop.xlane.xlu1 %3412 }
 0xeae   : > { %v3417_v2 = vsub.f32 %v3331_v57, %v3413_v1 }
 0xeb0   : > { %v3419_v3 = vmul.f32 1.442695, %v3417_v2 }
 0xeb1   : > { %v3416_v4 = vpop.xlane.xlu0 %3415  ;;  %v3588_v7 = vpop.permute.xlu1 %3587 }
 0xeb2   : > { %6269 = vpow2.f32 %v3419_v3  ;;  %v3418_v5 = vsub.f32 %v3407_v60, %v3416_v4 }
 0xeb4   : > { %v3421_v6 = vmul.f32 1.442695, %v3418_v5 }
 0xeb5   : > { %v3424_v15 = vpop.permute.xlu0 %3423  ;;  %v3830_v14 = vpop.permute.xlu1 %3829 }
 0xeb6   : > { %6271 = vpow2.f32 %v3421_v6  ;;  %6003 = vmatpush3.msra.mxu0 %v3424_v15 }
 0xeb7   : > { %6012 = vmatprep.subr.mxu0 %v6345_v10 }
 0xeb9   : > { %v3586_v11 = vpop.permute.xlu0 %3585  ;;  %v4080_v26 = vpop.permute.xlu1 %4079 }
 0xebc   : > { %v6270_v9 = vpop.eup %6269 }
 0xebd   : > { %6005 = vmatmul.mubr.msk.f32.vlgmr.msra.gmra.mrb[16].mxu0 %vm1317_vm3, %v6270_v9  ;;  %v3575_v23 = vsel %vm1317_vm3, %v6270_v9, 0.0  ;;  %v4078_v27 = vpop.permute.xlu1 %4077 }
 0xebe   : > { %6013 = vmatpush3.xpose.msk.msra.mxu0 %vm1317_vm3, %v3588_v7  ;;  %6014 = vmatprep.mubr.msk.f32.mxu0 %vm6346_vm2, %v6345_v10 }
 0xebf   : > { %6022 = vmatprep.subr.mxu0 %v6345_v10 }
 0xec0   : > { %v6272_v8 = vpop.eup %6271 }
 0xec1   : > { %6010 = vmatmul.mubr.msk.f32.vlgmr.msra.gmra.mrb[28].mxu1 %vm1317_vm3, %v6272_v8  ;;  %6015 = vmatmul.mubr.msk.f32.vlgmr.msra.gmra.mrb[18].mxu0 %vm1317_vm3, %v3586_v11  ;;  %v3578_v25 = vsel %vm1317_vm3, %v6272_v8, 0.0  ;;  %v4158_v28 = vpop.permute.xlu1 %4157 }
 0xec2   : > { %6018 = vmatpush3.xpose.msk.msra.mxu1 %vm1317_vm3, %v3666_v63  ;;  %6019 = vmatprep.mubr.msk.f32.mxu1 %vm6346_vm2, %v6345_v10 }
 0xec3   : > { %6027 = vmatprep.subr.mxu1 %v6345_v10  ;;  %6024 = vmatprep.mubr.msk.f32.mxu0 %vm6346_vm2, %v6345_v10 }
 0xec5   : > { %6020 = vmatmul.mubr.msk.f32.vlgmr.msra.gmra.mrb[30].mxu1 %vm1317_vm3, %v3664_v0  ;;  %v4156_v29 = vpop.permute.xlu1 %4155 }
 0xec6   : > { %6028 = vmatpush3.msra.mxu1 %v3830_v14  ;;  %6029 = vmatprep.mubr.msk.f32.mxu1 %vm6346_vm2, %v6345_v10 }
 0xec7   : > { %6042 = vmatprep.subr.mxu1 %v6345_v10 }
 0xf90   : > { %v6943_v12 = vpop.f32.mrb[16].mxu0 }
 0xf91   : > { %v6006_v13 = vpop.f32.mrb[17].mxu0 }
 0xf94   : > { %v6945_v16 = vpop.f32.mrb[28].mxu1  ;;  %v3659_v17 = vpop.f32.mrb[18].mxu0 }
 0xf95   : > { %v6011_v18 = vpop.f32.mrb[29].mxu1  ;;  %v6016_v19 = vpop.f32.mrb[19].mxu0  ;;  %v3741_v20 = vsel %vm1317_vm3, %v3659_v17, -inf }
 0xf96   : > { %3742 = vmax.xlane.f32.xlu1 %v3741_v20 }
 0xf98   : > { %v3737_v21 = vpop.f32.mrb[30].mxu1 }
 0xf99   : > { %v6021_v22 = vpop.f32.mrb[31].mxu1  ;;  %v3744_v24 = vsel %vm1317_vm3, %v3737_v21, -inf }
 0xf9a   : > { %3576 = vadd.xlane.f32.xlu1 %v3575_v23  ;;  %3745 = vmax.xlane.f32.xlu0 %v3744_v24 }
 0xf9e   : > { %3579 = vadd.xlane.f32.xlu1 %v3578_v25 }
 0xfb0   : > { %3753 = vrot.lane.b32.xlu0 %v6880_v51, %s6348_s0 }
0x1023   : > { %v3743_v30 = vpop.xlane.xlu1 %3742 }
0x1024   : > { %v3747_v31 = vsub.f32 %v3659_v17, %v3743_v30 }
0x1026   : > { %v3749_v32 = vmul.f32 1.442695, %v3747_v31 }
0x1027   : > { %v3746_v33 = vpop.xlane.xlu0 %3745  ;;  %v3577_v43 = vpop.xlane.xlu1 %3576 }
0x1028   : > { %6273 = vpow2.f32 %v3749_v32  ;;  %v3748_v34 = vsub.f32 %v3737_v21, %v3746_v33  ;;  %v3067_v21 = vld [vmem:[%s6564_s2 + $0x10] sm:$0xff] }
0x102a   : > { %v3751_v35 = vmul.f32 1.442695, %v3748_v34 }
0x102b   : > { %v3754_v36 = vpop.permute.xlu0 %3753  ;;  %v3580_v44 = vpop.xlane.xlu1 %3579 }
0x102c   : > { %6275 = vpow2.f32 %v3751_v35  ;;  %6023 = vmatpush3.msra.mxu0 %v3754_v36 }
0x102d   : > { %6032 = vmatprep.subr.mxu0 %v3066_v41 }
0x1032   : > { %v6274_v37 = vpop.eup %6273 }
0x1033   : > { %6025 = vmatmul.mubr.msk.f32.vlgmr.msra.gmra.mrb[20].mxu0 %vm1317_vm3, %v6274_v37  ;;  %v3905_v38 = vsel %vm1317_vm3, %v6274_v37, 0.0 }
0x1034   : > { %3906 = vadd.xlane.f32.xlu0 %v3905_v38  ;;  %6033 = vmatpush3.msra.mxu0 %v3066_v41 }
0x1035   : > { %6037 = vmatprep.subr.mxu0 %v3065_v42 }
0x1036   : > { %v6276_v39 = vpop.eup %6275 }
0x1037   : > { %6030 = vmatmul.mubr.msk.f32.vlgmr.msra.gmra.mrb[32].mxu1 %vm1317_vm3, %v6276_v39  ;;  %v3908_v40 = vsel %vm1317_vm3, %v6276_v39, 0.0 }
0x1038   : > { %6043 = vmatpush3.xpose.msk.msra.mxu1 %vm1317_vm3, %v4080_v26  ;;  %3909 = vadd.xlane.f32.xlu1 %v3908_v40 }
0x1039   : > { %6044 = vmatprep.mubr.msk.f32.mxu1 %vm6346_vm2, %v6345_v10  ;;  %6047 = vmatprep.subr.mxu1 %v6345_v10 }
0x103b   : > { %6045 = vmatmul.mubr.msk.f32.vlgmr.msra.gmra.mrb[34].mxu1 %vm1317_vm3, %v4078_v27 }
0x103c   : > { %6048 = vmatpush3.xpose.msk.msra.mxu1 %vm1317_vm3, %v4158_v28  ;;  %6049 = vmatprep.mubr.msk.f32.mxu1 %vm6346_vm2, %v6345_v10 }
0x103d   : > { %6057 = vmatprep.subr.mxu1 %v6345_v10 }
0x103f   : > { %6050 = vmatmul.mubr.msk.f32.vlgmr.msra.gmra.mrb[36].mxu1 %vm1317_vm3, %v4156_v29 }
0x1040   : > { %6059 = vmatprep.mubr.msk.f32.mxu1 %vm6346_vm2, %v6345_v10 }
0x104a   : > { %4245 = vrot.lane.b32.xlu0 %v6880_v51, %s6352_s17 }
0x104e   : > { %4492 = vrot.lane.b32.xlu0 %v6880_v51, %s6356_s3 }
0x10c1   : > { %v3907_v47 = vpop.xlane.xlu0 %3906 }
0x10c2   : > { %6277 = vrcp.f32 %v3907_v47 }
0x10c3   : > { %6279 = vrcp.f32 %v3577_v43 }
0x10c5   : > { %v3910_v48 = vpop.xlane.xlu1 %3909  ;;  %v4246_v15 = vpop.permute.xlu0 %4245 }
0x10c6   : > { %6281 = vrcp.f32 %v3910_v48 }
0x10c7   : > { %6283 = vrcp.f32 %v3580_v44 }
0x10c9   : > { %v4493_v19 = vpop.permute.xlu0 %4492 }
0x10cc   : > { %v6278_v50 = vpop.eup %6277 }
0x10cd   : > { %v6280_v57 = vpop.eup %6279 }
0x10ce   : > { %v3583_v62 = vmul.f32 %v6280_v57, %v6943_v12 }
0x10d0   : > { %v6282_v58 = vpop.eup %6281 }
0x10d1   : > { %v6284_v2 = vpop.eup %6283 }
0x10d2   : > { %v3584_v4 = vmul.f32 %v6284_v2, %v6945_v16 }
0x1106   : > { %v3825_v52 = vpop.f32.mrb[20].mxu0 }
0x1107   : > { %v3913_v53 = vmul.f32 %v6278_v50, %v3825_v52  ;;  %v6026_v56 = vpop.f32.mrb[21].mxu0  ;;  %v3068_v52 = vld [vmem:[%s6564_s2 + $0x18] sm:$0xff]  ;;  %s7249_s2 = scalar_lea.vmem %s7159_s13, %s6515_s8 }
0x1109   : > { %6034 = vmatprep.mubr.msk.f32.mxu0 %vm1317_vm3, %v3913_v53 }
0x110a   : > { %v3901_v59 = vpop.f32.mrb[32].mxu1 }
0x110b   : > { %v3914_v60 = vmul.f32 %v6282_v58, %v3901_v59  ;;  %v6031_v61 = vpop.f32.mrb[33].mxu1 }
0x110d   : > { %6035 = vmatmul.mubr.msk.f32.vlgmr.msra.gmra.mrb[22].mxu0 %vm1317_vm3, %v3914_v60 }
0x110e   : > { %6039 = vmatprep.mubr.msk.f32.mxu0 %vm1317_vm3, %v3583_v62  ;;  %v4151_v63 = vpop.f32.mrb[34].mxu1  ;;  %6038 = vmatpush3.msra.mxu0 %v3065_v42 }
0x110f   : > { %v6046_v0 = vpop.f32.mrb[35].mxu1  ;;  %v4233_v1 = vsel %vm1317_vm3, %v4151_v63, -inf  ;;  %6052 = vmatprep.subr.mxu0 %v6345_v10 }
0x1110   : > { %4234 = vmax.xlane.f32.xlu1 %v4233_v1  ;;  %v5712_v1 = vld [vmem:[%s7249_s2] ss:$0 sm:$0xff] }
0x1112   : > { %v4229_v3 = vpop.f32.mrb[36].mxu1 }
0x1113   : > { %v6051_v5 = vpop.f32.mrb[37].mxu1  ;;  %v4236_v6 = vsel %vm1317_vm3, %v4229_v3, -inf }
0x1114   : > { %4237 = vmax.xlane.f32.xlu1 %v4236_v6 }
0x1115   : > { %6040 = vmatmul.mubr.msk.f32.vlgmr.msra.gmra.mrb[22].mxu0 %vm1317_vm3, %v3584_v4 }
0x1116   : > { %6053 = vmatpush3.msra.mxu0 %v4246_v15  ;;  %6054 = vmatprep.mubr.msk.f32.mxu0 %vm6346_vm2, %v6345_v10 }
0x1117   : > { %6062 = vmatprep.subr.mxu0 %v3067_v21 }
0x1125   : > { %4321 = vrot.lane.b32.xlu1 %v6878_v49, %s6352_s17 }
0x1129   : > { %4570 = vrot.lane.b32.xlu1 %v6878_v49, %s6356_s3 }
0x119d   : > { %v4235_v9 = vpop.xlane.xlu1 %4234 }
0x119e   : > { %v4239_v7 = vsub.f32 %v4151_v63, %v4235_v9 }
0x11a0   : > { %v4241_v8 = vmul.f32 1.442695, %v4239_v7 }
0x11a1   : > { %v4238_v11 = vpop.xlane.xlu1 %4237 }
0x11a2   : > { %6285 = vpow2.f32 %v4241_v8  ;;  %v4240_v14 = vsub.f32 %v4229_v3, %v4238_v11 }
0x11a4   : > { %v4243_v12 = vmul.f32 1.442695, %v4240_v14 }
0x11a5   : > { %v4322_v13 = vpop.permute.xlu1 %4321 }
0x11a6   : > { %6287 = vpow2.f32 %v4243_v12  ;;  %6058 = vmatpush3.msra.mxu1 %v4322_v13 }
0x11a7   : > { %6067 = vmatprep.subr.mxu1 %v6345_v10 }
0x11a9   : > { %v4571_v22 = vpop.permute.xlu1 %4570 }
0x11ac   : > { %v6286_v16 = vpop.eup %6285 }
0x11ad   : > { %6055 = vmatmul.mubr.msk.f32.vlgmr.msra.gmra.mrb[24].mxu0 %vm1317_vm3, %v6286_v16  ;;  %v4397_v17 = vsel %vm1317_vm3, %v6286_v16, 0.0 }
0x11ae   : > { %4398 = vadd.xlane.f32.xlu1 %v4397_v17  ;;  %6063 = vmatpush3.msra.mxu0 %v3067_v21 }
0x11af   : > { %6072 = vmatprep.subr.mxu0 %v6345_v10 }
0x11b0   : > { %v6288_v18 = vpop.eup %6287 }
0x11b1   : > { %6060 = vmatmul.mubr.msk.f32.vlgmr.msra.gmra.mrb[38].mxu1 %vm1317_vm3, %v6288_v18  ;;  %v4400_v20 = vsel %vm1317_vm3, %v6288_v18, 0.0 }
0x11b2   : > { %6068 = vmatpush3.xpose.msk.msra.mxu1 %vm1317_vm3, %v4493_v19  ;;  %4401 = vadd.xlane.f32.xlu0 %v4400_v20 }
0x11b3   : > { %6069 = vmatprep.mubr.msk.f32.mxu1 %vm6346_vm2, %v6345_v10  ;;  %6077 = vmatprep.subr.mxu1 %v6345_v10 }
0x11bf   : > { %4490 = vrot.lane.b32.xlu1 %v6889_v54, %s6356_s3 }
0x11c8   : > { %4568 = vrot.lane.b32.xlu0 %v6891_v55, %s6356_s3 }
0x123b   : > { %v4399_v23 = vpop.xlane.xlu1 %4398 }
0x123c   : > { %6289 = vrcp.f32 %v4399_v23 }
0x123f   : > { %v4491_v24 = vpop.permute.xlu1 %4490  ;;  %v4402_v25 = vpop.xlane.xlu0 %4401 }
0x1240   : > { %6070 = vmatmul.mubr.msk.f32.vlgmr.msra.gmra.mrb[40].mxu1 %vm1317_vm3, %v4491_v24  ;;  %6291 = vrcp.f32 %v4402_v25 }
0x1241   : > { %6079 = vmatprep.mubr.msk.f32.mxu1 %vm6346_vm2, %v6345_v10 }
0x1243   : > { %v4569_v32 = vpop.permute.xlu0 %4568 }
0x1246   : > { %v6290_v54 = vpop.eup %6289 }
0x124a   : > { %v6292_v29 = vpop.eup %6291 }
0x1280   : > { %v4317_v26 = vpop.f32.mrb[24].mxu0 }
0x1281   : > { %v4405_v27 = vmul.f32 %v6290_v54, %v4317_v26  ;;  %v6056_v28 = vpop.f32.mrb[25].mxu0 }
0x1283   : > { %6064 = vmatprep.mubr.msk.f32.mxu0 %vm1317_vm3, %v4405_v27  ;;  %v5713_v27 = vld [vmem:[%s7250_s4] ss:$0 sm:$0xff] }
0x1284   : > { %v4393_v30 = vpop.f32.mrb[38].mxu1 }
0x1285   : > { %v4406_v55 = vmul.f32 %v6292_v29, %v4393_v30  ;;  %v6061_v31 = vpop.f32.mrb[39].mxu1 }
0x1287   : > { %6065 = vmatmul.mubr.msk.f32.vlgmr.msra.gmra.mrb[22].mxu0 %vm1317_vm3, %v4406_v55 }
0x1288   : > { %6073 = vmatpush3.xpose.msk.msra.mxu0 %vm1317_vm3, %v4571_v22  ;;  %6074 = vmatprep.mubr.msk.f32.mxu0 %vm6346_vm2, %v6345_v10 }
0x1289   : > { %6082 = vmatprep.subr.mxu0 %v6345_v10 }
0x128b   : > { %6075 = vmatmul.mubr.msk.f32.vlgmr.msra.gmra.mrb[26].mxu0 %vm1317_vm3, %v4569_v32 }
0x128c   : > { %6084 = vmatprep.mubr.msk.f32.mxu0 %vm6346_vm2, %v6345_v10 }
0x1313   : > { %v4564_v33 = vpop.f32.mrb[40].mxu1 }
0x1314   : > { %v6071_v34 = vpop.f32.mrb[41].mxu1  ;;  %v4646_v35 = vsel %vm1317_vm3, %v4564_v33, -inf }
0x1315   : > { %4647 = vmax.xlane.f32.xlu1 %v4646_v35 }
0x1326   : > { %4734 = vrot.lane.b32.xlu1 %v6878_v49, %s6355_s25 }
0x135e   : > { %v4642_v36 = vpop.f32.mrb[26].mxu0 }
0x135f   : > { %v6076_v37 = vpop.f32.mrb[27].mxu0  ;;  %v4649_v38 = vsel %vm1317_vm3, %v4642_v36, -inf }
0x1360   : > { %4650 = vmax.xlane.f32.xlu0 %v4649_v38 }
0x1376   : > { %4658 = vrot.lane.b32.xlu0 %v6880_v51, %s6355_s25  ;;  %s7251_s25 = scalar_lea.vmem %s7161_s15, %s6515_s8 }
0x1377   : > { %v5714_v30 = vld [vmem:[%s7251_s25] ss:$0 sm:$0xff]  ;;  %s7260_s25 = scalar_lea.vmem %s7259_s20, %s6515_s8 }
0x13a2   : > { %v4648_v39 = vpop.xlane.xlu1 %4647 }
0x13a3   : > { %v4652_v40 = vsub.f32 %v4564_v33, %v4648_v39 }
0x13a5   : > { %v4654_v41 = vmul.f32 1.442695, %v4652_v40 }
0x13a6   : > { %v4735_v10 = vpop.permute.xlu1 %4734 }
0x13a7   : > { %6293 = vpow2.f32 %v4654_v41  ;;  %6083 = vmatpush3.msra.mxu0 %v4735_v10 }
0x13a8   : > { %6087 = vmatprep.subr.mxu0 %v3068_v52 }
0x13b1   : > { %v6294_v42 = vpop.eup %6293 }
0x13b2   : > { %v4810_v43 = vsel %vm1317_vm3, %v6294_v42, 0.0 }
0x13b3   : > { %4811 = vadd.xlane.f32.xlu1 %v4810_v43 }
0x13ed   : > { %v4651_v49 = vpop.xlane.xlu0 %4650 }
0x13ee   : > { %v4653_v44 = vsub.f32 %v4642_v36, %v4651_v49 }
0x13f0   : > { %v4656_v47 = vmul.f32 1.442695, %v4653_v44 }
0x13f1   : > { %v4659_v48 = vpop.permute.xlu0 %4658 }
0x13f2   : > { %6295 = vpow2.f32 %v4656_v47  ;;  %6078 = vmatpush3.msra.mxu1 %v4659_v48  ;;  %v5001_v47 = vld [vmem:[%s6589_s10] sm:$0xff]  ;;  %v5002_v48 = vld [vmem:[%s6589_s10 + $0x8] sm:$0xff] }
0x13f3   : > { %6080 = vmatmul.mubr.msk.f32.vlgmr.msra.gmra.mrb[42].mxu1 %vm1317_vm3, %v6294_v42 }
0x13fc   : > { %v6296_v51 = vpop.eup %6295 }
0x13fd   : > { %6085 = vmatmul.mubr.msk.f32.vlgmr.msra.gmra.mrb[28].mxu0 %vm1317_vm3, %v6296_v51  ;;  %v4813_v50 = vsel %vm1317_vm3, %v6296_v51, 0.0  ;;  %v6146_v51 = vpack.c.bf16 %v5002_v48, %v5001_v47 }
0x13fe   : > { %4814 = vadd.xlane.f32.xlu0 %v4813_v50  ;;  %6088 = vmatpush3.msra.mxu0 %v3068_v52  ;;  %v5003_v50 = vld [vmem:[%s6589_s10 + $0x10] sm:$0xff]  ;;  %v5004_v52 = vld [vmem:[%s6589_s10 + $0x18] sm:$0xff]  ;;  %s7261_s10 = sld [smem:[#allocation27_spill]] }
0x13ff   : > { %6147 = vmatprep.subr.bf16.mxu1 %v6146_v51 }
0x1400   : > { %6149 = vmatpush3.bf16.msra.mxu1 %v6146_v51 }
0x1440   : > { %v4812_v53 = vpop.xlane.xlu1 %4811 }
0x1441   : > { %6297 = vrcp.f32 %v4812_v53  ;;  %v6150_v53 = vpack.c.bf16 %v5004_v52, %v5003_v50 }
0x1443   : > { %6151 = vmatprep.subr.bf16.mxu1 %v6150_v53 }
0x1444   : > { %6153 = vmatpush3.bf16.msra.mxu1 %v6150_v53 }
0x144b   : > { %v6298_v57 = vpop.eup %6297 }
0x148b   : > { %v4815_v56 = vpop.xlane.xlu0 %4814 }
0x148c   : > { %6299 = vrcp.f32 %v4815_v56 }
0x1496   : > { %v6300_v61 = vpop.eup %6299 }
0x14c6   : > { %v4730_v58 = vpop.f32.mrb[42].mxu1 }
0x14c7   : > { %v4818_v59 = vmul.f32 %v6298_v57, %v4730_v58  ;;  %v6081_v60 = vpop.f32.mrb[43].mxu1 }
0x14c9   : > { %6089 = vmatprep.mubr.msk.f32.mxu0 %vm1317_vm3, %v4818_v59 }
0x14d0   : > { %v4806_v62 = vpop.f32.mrb[28].mxu0 }
0x14d1   : > { %v4819_v63 = vmul.f32 %v6300_v61, %v4806_v62  ;;  %v6086_v0 = vpop.f32.mrb[29].mxu0 }
0x14d3   : > { %6090 = vmatmul.mubr.msk.f32.vlgmr.msra.gmra.mrb[22].mxu0 %vm1317_vm3, %v4819_v63  ;;  %v5715_v63 = vld [vmem:[%s7252_s6] ss:$0 sm:$0xff]  ;;  %s7262_s6 = scalar_lea.vmem %s7261_s10, %s6515_s8 }
0x15a6   : > { %v6091_v2 = vpop.f32.mrb[22].mxu0 }
0x15a7   : > { %v4910_v3 = vadd.f32 %v6091_v2, %v5712_v1  ;;  %v4892_v4 = vpop.f32.mrb[23].mxu0 }
0x15a8   : > { %v4909_v5 = vadd.f32 %v5712_v1, %v4892_v4 }
0x15a9   : > { %v4912_v6 = vadd.f32 %v4910_v3, %v6870_v46  ;;  %v5716_v3 = vld [vmem:[%s7254_s7] ss:$0 sm:$0xff]  ;;  %s7264_s7 = scalar_lea.vmem %s7263_s27, %s6515_s8 }
0x15aa   : > { %v4911_v15 = vadd.f32 %v4909_v5, %v6868_v45 }
0x15ab   : > { %v4916_v9 = vsel %vm1232_vm1, %v4912_v6, 0.0 }
0x15ac   : > { %4917 = vadd.xlane.f32.xlu1 %v4916_v9  ;;  %v4913_v7 = vsel %vm1232_vm1, %v4911_v15, 0.0  ;;  %v5006_v9 = vld [vmem:[%s6599_s26] sm:$0xff] }
0x15ad   : > { %4914 = vadd.xlane.f32.xlu0 %v4913_v7  ;;  %v5007_v7 = vld [vmem:[%s6599_s26 + $0x8] sm:$0xff] }
0x1639   : > { %v4918_v8 = vpop.xlane.xlu1 %4917 }
0x163a   : > { %v4920_v11 = vmul.f32 0.03125, %v4918_v8  ;;  %v4915_v14 = vpop.xlane.xlu0 %4914  ;;  %v5008_v8 = vld [vmem:[%s6599_s26 + $0x10] sm:$0xff] }
0x163b   : > { %v4919_v12 = vmul.f32 0.03125, %v4915_v14  ;;  %v5009_v14 = vld [vmem:[%s6599_s26 + $0x18] sm:$0xff] }
0x163c   : > { %v4922_v13 = vsub.f32 %v4912_v6, %v4920_v11  ;;  %v6154_v11 = vpack.c.bf16 %v5007_v7, %v5006_v9 }
0x163d   : > { %v4921_v16 = vsub.f32 %v4911_v15, %v4919_v12  ;;  %v6158_v12 = vpack.c.bf16 %v5009_v14, %v5008_v8  ;;  %v5724_v8 = vld [vmem:[%s7260_s25] ss:$0 sm:$0xff] }
0x163e   : > { %v4924_v17 = vmul.f32 %v4922_v13, %v4922_v13  ;;  %6155 = vmatprep.subr.bf16.mxu0 %v6154_v11 }
0x163f   : > { %v4923_v18 = vmul.f32 %v4921_v16, %v4921_v16  ;;  %6157 = vmatpush3.bf16.msra.mxu0 %v6154_v11 }
0x1640   : > { %v4928_v19 = vsel %vm1232_vm1, %v4924_v17, 0.0  ;;  %6159 = vmatprep.subr.bf16.mxu0 %v6158_v12 }
0x1641   : > { %4929 = vadd.xlane.f32.xlu1 %v4928_v19  ;;  %v4925_v20 = vsel %vm1232_vm1, %v4923_v18, 0.0  ;;  %v5012_v18 = vld [vmem:[%s6599_s26 + $0x30] sm:$0xff]  ;;  %v5013_v19 = vld [vmem:[%s6599_s26 + $0x38] sm:$0xff] }
0x1642   : > { %4926 = vadd.xlane.f32.xlu0 %v4925_v20  ;;  %v6166_v20 = vpack.c.bf16 %v5013_v19, %v5012_v18 }
0x1643   : > { %6161 = vmatpush3.bf16.msra.mxu0 %v6158_v12 }
0x16ce   : > { %v4930_v21 = vpop.xlane.xlu1 %4929 }
0x16cf   : > { %v4932_v22 = vmul.f32 0.03125, %v4930_v21  ;;  %v4927_v23 = vpop.xlane.xlu0 %4926  ;;  %v5717_v21 = vld [vmem:[%s7256_s18] ss:$0 sm:$0xff] }
0x16d0   : > { %v4931_v24 = vmul.f32 0.03125, %v4927_v23 }
0x16d1   : > { %v4934_v25 = vadd.f32 1e-05, %v4932_v22 }
0x16d2   : > { %v4933_v54 = vadd.f32 1e-05, %v4931_v24 }
0x16d3   : > { %6301 = vrsqrt.f32 %v4934_v25 }
0x16d4   : > { %6303 = vrsqrt.f32 %v4933_v54 }
0x16dd   : > { %v6302_v26 = vpop.eup %6301 }
0x16de   : > { %v6304_v28 = vpop.eup %6303  ;;  %v4938_v29 = vmul.f32 %v6302_v26, %v4922_v13  ;;  %v5010_v13 = vld [vmem:[%s6599_s26 + $0x20] sm:$0xff] }
0x16df   : > { %v4937_v55 = vmul.f32 %v6304_v28, %v4921_v16  ;;  %v5011_v16 = vld [vmem:[%s6599_s26 + $0x28] sm:$0xff] }
0x16e0   : > { %v4946_v31 = vmul.f32 %v5713_v27, %v4938_v29  ;;  %v6162_v17 = vpack.c.bf16 %v5011_v16, %v5010_v13 }
0x16e1   : > { %v4945_v32 = vmul.f32 %v5713_v27, %v4937_v55 }
0x16e2   : > { %v4954_v33 = vadd.f32 %v5714_v30, %v4946_v31  ;;  %6163 = vmatprep.subr.bf16.mxu0 %v6162_v17 }
0x16e3   : > { %v4953_v34 = vadd.f32 %v5714_v30, %v4945_v32  ;;  %6165 = vmatpush3.bf16.msra.mxu0 %v6162_v17 }
0x16e4   : > { %v4956_v35 = vadd.f32 %v4954_v33, %v6870_v46  ;;  %6167 = vmatprep.subr.bf16.mxu0 %v6166_v20 }
0x16e5   : > { %v4955_v36 = vadd.f32 %v4953_v34, %v6868_v45 }
0x16e6   : > { %v4962_v37 = vsel %vm1232_vm1, %v4956_v35, 0.0 }
0x16e7   : > { %4963 = vadd.xlane.f32.xlu1 %v4962_v37  ;;  %v4959_v38 = vsel %vm1232_vm1, %v4955_v36, 0.0  ;;  %6169 = vmatpush3.bf16.msra.mxu0 %v6166_v20 }
0x16e8   : > { %4960 = vadd.xlane.f32.xlu0 %v4959_v38 }
0x1774   : > { %v4964_v39 = vpop.xlane.xlu1 %4963 }
0x1775   : > { %v4966_v40 = vmul.f32 0.03125, %v4964_v39  ;;  %v4961_v41 = vpop.xlane.xlu0 %4960 }
0x1776   : > { %v4965_v10 = vmul.f32 0.03125, %v4961_v41 }
0x1777   : > { %v4968_v42 = vsub.f32 %v4956_v35, %v4966_v40 }
0x1778   : > { %v4967_v43 = vsub.f32 %v4955_v36, %v4965_v10  ;;  %v5720_v10 = vld [vmem:[%s1182_s30] ss:$0 sm:$0xff] }
0x1779   : > { %v4970_v49 = vmul.f32 %v4968_v42, %v4968_v42 }
0x177a   : > { %v4969_v46 = vmul.f32 %v4967_v43, %v4967_v43 }
0x177b   : > { %v4974_v45 = vsel %vm1232_vm1, %v4970_v49, 0.0 }
0x177c   : > { %4975 = vadd.xlane.f32.xlu1 %v4974_v45  ;;  %v4971_v44 = vsel %vm1232_vm1, %v4969_v46, 0.0 }
0x177d   : > { %4972 = vadd.xlane.f32.xlu0 %v4971_v44 }
0x1809   : > { %v4976_v56 = vpop.xlane.xlu1 %4975 }
0x180a   : > { %v4978_v57 = vmul.f32 0.03125, %v4976_v56  ;;  %v4973_v58 = vpop.xlane.xlu0 %4972 }
0x180b   : > { %v4977_v59 = vmul.f32 0.03125, %v4973_v58 }
0x180c   : > { %v4980_v60 = vadd.f32 1e-05, %v4978_v57 }
0x180d   : > { %v4979_v61 = vadd.f32 1e-05, %v4977_v59 }
0x180e   : > { %6305 = vrsqrt.f32 %v4980_v60 }
0x180f   : > { %6307 = vrsqrt.f32 %v4979_v61 }
0x1818   : > { %v6306_v62 = vpop.eup %6305 }
0x1819   : > { %v6308_v0 = vpop.eup %6307  ;;  %v4984_v1 = vmul.f32 %v6306_v62, %v4968_v42 }
0x181a   : > { %v4983_v2 = vmul.f32 %v6308_v0, %v4967_v43 }
0x181b   : > { %v4992_v4 = vmul.f32 %v5715_v63, %v4984_v1 }
0x181c   : > { %v4991_v5 = vmul.f32 %v5715_v63, %v4983_v2 }
0x181d   : > { %v7073_v15 = vadd.f32 %v5716_v3, %v4992_v4 }
0x181e   : > { %v7071_v6 = vadd.f32 %v5716_v3, %v4991_v5  ;;  %v5723_v5 = vld [vmem:[%s1185_s9] ss:$0 sm:$0xff] }
0x1820   : > { %6100 = vmatprep.mubr.msk.f32.mxu1 %vm1232_vm1, %v7071_v6 }
0x1821   : > { %6101 = vmatmul.mubr.msk.f32.vlgmr.msra.gmra.mrb[44].mxu1 %vm1232_vm1, %v7073_v15 }
0x18f4   : > { %v6102_v22 = vpop.f32.mrb[44].mxu1 }
0x18f5   : > { %v5101_v23 = vadd.f32 %v6102_v22, %v5717_v21  ;;  %v5095_v24 = vpop.f32.mrb[45].mxu1 }
0x18f6   : > { %v5096_v25 = vadd.f32 %v5717_v21, %v5095_v24 }
0x18f7   : > { %v5107_v54 = vmul.f32 0.044715, %v5101_v23  ;;  %v5105_v39 = vmul.f32 0.5, %v5101_v23 }
0x18f8   : > { %v5106_v26 = vmul.f32 0.044715, %v5096_v25  ;;  %v5104_v37 = vmul.f32 0.5, %v5096_v25 }
0x18f9   : > { %v5109_v27 = vmul.f32 %v5107_v54, %v5101_v23 }
0x18fa   : > { %v5108_v28 = vmul.f32 %v5106_v26, %v5096_v25 }
0x18fb   : > { %v5111_v29 = vmul.f32 %v5109_v27, %v5101_v23 }
0x18fc   : > { %v5110_v30 = vmul.f32 %v5108_v28, %v5096_v25 }
0x18fd   : > { %v5113_v55 = vadd.f32 %v5111_v29, %v5101_v23 }
0x18fe   : > { %v5112_v31 = vadd.f32 %v5110_v30, %v5096_v25 }
0x18ff   : > { %v5115_v32 = vmul.f32 0.7978846, %v5113_v55 }
0x1900   : > { %v5114_v33 = vmul.f32 0.7978846, %v5112_v31 }
0x1901   : > { %6309 = vtanh.f32 %v5115_v32 }
0x1902   : > { %6311 = vtanh.f32 %v5114_v33 }
0x190b   : > { %v6310_v34 = vpop.eup %6309 }
0x190c   : > { %v6312_v35 = vpop.eup %6311  ;;  %v5119_v36 = vadd.f32 1.0, %v6310_v34  ;;  %v5725_v34 = vld [vmem:[%s7262_s6] ss:$0 sm:$0xff] }
0x190d   : > { %v5118_v38 = vadd.f32 1.0, %v6312_v35 }
0x190e   : > { %v5121_v41 = vmul.f32 %v5119_v36, %v5105_v39 }
0x190f   : > { %v5120_v40 = vmul.f32 %v5118_v38, %v5104_v37  ;;  %v5726_v37 = vld [vmem:[%s7264_s7] ss:$0 sm:$0xff] }
0x1911   : > { %6119 = vmatprep.mubr.msk.f32.mxu0 %vm5128_vm4, %v5120_v40 }
0x1912   : > { %6120 = vmatmul.mubr.msk.f32.vlgmr.msra.gmra.mrb[30].mxu0 %vm5128_vm4, %v5121_v41 }
0x19e5   : > { %v6121_v42 = vpop.f32.mrb[30].mxu0 }
0x19e6   : > { %v5207_v43 = vadd.f32 %v6121_v42, %v5720_v10  ;;  %v5201_v49 = vpop.f32.mrb[31].mxu0 }
0x19e7   : > { %v5202_v46 = vadd.f32 %v5720_v10, %v5201_v49 }
0x19e8   : > { %v5211_v45 = vadd.f32 %v5207_v43, %v7073_v15 }
0x19e9   : > { %v5210_v44 = vadd.f32 %v5202_v46, %v7071_v6 }
0x19ea   : > { %v5215_v47 = vsel %vm1232_vm1, %v5211_v45, 0.0 }
0x19eb   : > { %5216 = vadd.xlane.f32.xlu1 %v5215_v47  ;;  %v5212_v48 = vsel %vm1232_vm1, %v5210_v44, 0.0 }
0x19ec   : > { %5213 = vadd.xlane.f32.xlu0 %v5212_v48 }
0x1a78   : > { %v5217_v51 = vpop.xlane.xlu1 %5216 }
0x1a79   : > { %v5219_v50 = vmul.f32 0.03125, %v5217_v51  ;;  %v5214_v52 = vpop.xlane.xlu0 %5213 }
0x1a7a   : > { %v5218_v53 = vmul.f32 0.03125, %v5214_v52 }
0x1a7b   : > { %v5221_v56 = vsub.f32 %v5211_v45, %v5219_v50 }
0x1a7c   : > { %v5220_v57 = vsub.f32 %v5210_v44, %v5218_v53 }
0x1a7d   : > { %v5223_v58 = vmul.f32 %v5221_v56, %v5221_v56 }
0x1a7e   : > { %v5222_v59 = vmul.f32 %v5220_v57, %v5220_v57 }
0x1a7f   : > { %v5227_v60 = vsel %vm1232_vm1, %v5223_v58, 0.0 }
0x1a80   : > { %5228 = vadd.xlane.f32.xlu1 %v5227_v60  ;;  %v5224_v61 = vsel %vm1232_vm1, %v5222_v59, 0.0 }
0x1a81   : > { %5225 = vadd.xlane.f32.xlu0 %v5224_v61 }
0x1b0d   : > { %v5229_v62 = vpop.xlane.xlu1 %5228 }
0x1b0e   : > { %v5231_v63 = vmul.f32 0.03125, %v5229_v62  ;;  %v5226_v0 = vpop.xlane.xlu0 %5225 }
0x1b0f   : > { %v5230_v1 = vmul.f32 0.03125, %v5226_v0 }
0x1b10   : > { %v5233_v2 = vadd.f32 1e-05, %v5231_v63 }
0x1b11   : > { %v5232_v3 = vadd.f32 1e-05, %v5230_v1 }
0x1b12   : > { %6313 = vrsqrt.f32 %v5233_v2 }
0x1b13   : > { %6315 = vrsqrt.f32 %v5232_v3 }
0x1b1c   : > { %v6314_v4 = vpop.eup %6313 }
0x1b1d   : > { %v6316_v9 = vpop.eup %6315  ;;  %v5237_v7 = vmul.f32 %v6314_v4, %v5221_v56 }
0x1b1e   : > { %v5236_v11 = vmul.f32 %v6316_v9, %v5220_v57 }
0x1b1f   : > { %v5245_v14 = vmul.f32 %v5723_v5, %v5237_v7 }
0x1b20   : > { %v5244_v12 = vmul.f32 %v5723_v5, %v5236_v11 }
0x1b21   : > { %v5253_v13 = vadd.f32 %v5724_v8, %v5245_v14 }
0x1b22   : > { %v5252_v16 = vadd.f32 %v5724_v8, %v5244_v12 }
0x1b23   : > { %v5255_v17 = vadd.f32 %v5253_v13, %v7073_v15 }
0x1b24   : > { %v5254_v18 = vadd.f32 %v5252_v16, %v7071_v6 }
0x1b25   : > { %v5261_v19 = vsel %vm1232_vm1, %v5255_v17, 0.0 }
0x1b26   : > { %5262 = vadd.xlane.f32.xlu1 %v5261_v19  ;;  %v5258_v20 = vsel %vm1232_vm1, %v5254_v18, 0.0 }
0x1b27   : > { %5259 = vadd.xlane.f32.xlu0 %v5258_v20 }
0x1bb3   : > { %v5263_v21 = vpop.xlane.xlu1 %5262 }
0x1bb4   : > { %v5265_v22 = vmul.f32 0.03125, %v5263_v21  ;;  %v5260_v23 = vpop.xlane.xlu0 %5259 }
0x1bb5   : > { %v5264_v24 = vmul.f32 0.03125, %v5260_v23 }
0x1bb6   : > { %v5267_v25 = vsub.f32 %v5255_v17, %v5265_v22 }
0x1bb7   : > { %v5266_v54 = vsub.f32 %v5254_v18, %v5264_v24 }
0x1bb8   : > { %v5269_v26 = vmul.f32 %v5267_v25, %v5267_v25 }
0x1bb9   : > { %v5268_v27 = vmul.f32 %v5266_v54, %v5266_v54 }
0x1bba   : > { %v5273_v28 = vsel %vm1232_vm1, %v5269_v26, 0.0 }
0x1bbb   : > { %5274 = vadd.xlane.f32.xlu1 %v5273_v28  ;;  %v5270_v6 = vsel %vm1232_vm1, %v5268_v27, 0.0 }
0x1bbc   : > { %5271 = vadd.xlane.f32.xlu0 %v5270_v6 }
0x1c48   : > { %v5275_v15 = vpop.xlane.xlu1 %5274 }
0x1c49   : > { %v5277_v29 = vmul.f32 0.03125, %v5275_v15  ;;  %v5272_v30 = vpop.xlane.xlu0 %5271 }
0x1c4a   : > { %v5276_v55 = vmul.f32 0.03125, %v5272_v30 }
0x1c4b   : > { %v5279_v31 = vadd.f32 1e-05, %v5277_v29 }
0x1c4c   : > { %v5278_v32 = vadd.f32 1e-05, %v5276_v55 }
0x1c4d   : > { %6317 = vrsqrt.f32 %v5279_v31 }
0x1c4e   : > { %6319 = vrsqrt.f32 %v5278_v32 }
0x1c57   : > { %v6318_v33 = vpop.eup %6317 }
0x1c58   : > { %v6320_v35 = vpop.eup %6319  ;;  %v5283_v36 = vmul.f32 %v6318_v33, %v5267_v25 }
0x1c59   : > { %v5282_v38 = vmul.f32 %v6320_v35, %v5266_v54 }
0x1c5a   : > { %v5291_v39 = vmul.f32 %v5725_v34, %v5283_v36 }
0x1c5b   : > { %v5290_v40 = vmul.f32 %v5725_v34, %v5282_v38 }
0x1c5c   : > { %v5299_v41 = vadd.f32 %v5726_v37, %v5291_v39 }
0x1c5d   : > { %v5298_v10 = vadd.f32 %v5726_v37, %v5290_v40 }
0x1c5e   : > { %5301 = vst.msk [vmem:[%s7233_s28 + $0x8] sm:$0xff] %vm1232_vm1, %v5299_v41 }
0x1c5f   : > { %5300 = vst.msk [vmem:[%s7233_s28] sm:$0xff] %vm1232_vm1, %v5298_v10 }
0x1c60 PF: > { %s7265_s26 = sld [smem:[#allocation4_spill]]  ;;  %s7266_s27 = sld [smem:[#allocation3_spill]] }
0x1c61   : > { %s7267_s3 = sld [smem:[#allocation5_spill]] }
0x1c66   : > { %s36_s7 = sadd.s32 1, %s7265_s26  }
0x1c67   : > { %p33_p6 = scmp.ge.s32.totalorder %s36_s7, 4  }
0x1c69   :  { %35 = sbr.rel (!%p33_p6) target bundleno = 23 (0x17), region = 233 }

</bundles_post_ra>
